<compile_context>
chip_gen: v7x
topology: tpu7x:2x2x1
jax: 0.10.0
libtpu: 0.0.40
codegen_flags: <defaults>
</compile_context>

<pallas_src>
import functools

import jax
import jax.numpy as jnp
from jax.experimental import pallas as pl
from jax.experimental.pallas import tpu as pltpu


def _round_up(x, m):
    return ((x + m - 1) // m) * m


def _vmem_capacity_bytes():
    try:
        return int(pltpu.get_tpu_info().vmem_capacity_bytes)
    except Exception:
        return 128 * 1024 * 1024


def _fixed_spec(shape, buffers=1):
    """Constant-index (weight) input: the block index never changes, so a single
    VMEM buffer suffices -- reclaim the default second buffer."""
    n = len(shape)
    idx = lambda b, i, n=n: (0,) * n
    try:
        return pl.BlockSpec(shape, idx, pipeline_mode=pl.Buffered(buffers))
    except Exception:  # older Pallas without pipeline_mode / Buffered
        return pl.BlockSpec(shape, idx)


# ----------------------------------------------------------------------------
# Pallas kernel: grid = (batch_tile, step).  One step == one MAC cell
# (ControlUnit -> ReadUnit -> WriteUnit); ctrl/mem recurrent state lives in VMEM
# scratch across the step axis and is re-initialised per batch tile.
# ----------------------------------------------------------------------------
def mac_unit_kernel(
    # inputs
    ctx_ref,      # [Bt, L, D]       contextual words (stream dtype)
    q_ref,        # [Bt, 2D]         question encoding (stream dtype)
    kbt_ref,      # [Bt, HW, D]      knowledge (transposed, stream dtype)
    kbpt_ref,     # [Bt, HW, D]      kb_proj   (transposed, stream dtype)
    c0_ref,       # [1, D]           control_0 parameter (f32)
    m0_ref,       # [1, D]           mem_0 parameter (f32)
    posw_ref,     # [max_step|1, 2D, D]  position-aware layer weight (stream dtype)
    posb_ref,     # [max_step|1, 1, D]   position-aware layer bias (f32)
    cqw_ref,      # [2D, D]          ControlUnit.ctrl_question (stream dtype)
    cqb_ref,      # [1, D]
    caw_ref,      # [1, D]           ControlUnit.attn weight (f32)
    cab_ref,      # [1]  (SMEM)      ControlUnit.attn bias
    mpw_ref,      # [D, D]           ReadUnit.mem_proj_layer (stream dtype)
    mpb_ref,      # [1, D]
    rcwT_ref,     # [2, D, D]        ReadUnit.concat_layer weight, split + transposed
    rcb_ref,      # [1, D]
    raw_ref,      # [1, D]           ReadUnit.attn weight (f32)
    rab_ref,      # [1]  (SMEM)      ReadUnit.attn bias
    wcw_ref,      # [2D, D]          WriteUnit.concat_layer (stream dtype)
    wcb_ref,      # [1, D]
    # output
    out_ref,      # [Bt, D]          final memory state (f32)
    # scratch
    ctrl_s,       # VMEM [Bt, D] f32
    mem_s,        # VMEM [Bt, D] f32
    *, pos_resident,
):
    D = ctrl_s.shape[1]
    cd = cqw_ref.dtype                      # MXU operand dtype (bf16 in production)
    step = pl.program_id(1)
    last_step = pl.num_programs(1) - 1

    @pl.when(step == 0)
    def _init():
        ctrl_s[...] = jnp.broadcast_to(c0_ref[...], ctrl_s.shape)
        mem_s[...] = jnp.broadcast_to(m0_ref[...], mem_s.shape)

    ctrl = ctrl_s[...]                      # [Bt, D] f32
    mem = mem_s[...]                        # [Bt, D] f32
    context = ctx_ref[...]                  # [Bt, L, D]
    knowledge_t = kbt_ref[...]              # [Bt, HW, D]
    kb_proj_t = kbpt_ref[...]               # [Bt, HW, D]

    # per-step position-aware weights: dynamic index into the resident slab, or the
    # per-step streamed slab (block 0).
    pw = posw_ref[step] if pos_resident else posw_ref[0]    # [2D, D]
    pb = posb_ref[step] if pos_resident else posb_ref[0]    # [1, D]

    # ------------------------- ControlUnit -------------------------
    q = q_ref[...]                                                              # [Bt, 2D]
    q_proj = jnp.dot(q, pw, preferred_element_type=jnp.float32) + pb            # [Bt, D]
    # cqi = Linear(cat([ctrl, q_proj], -1)); concat expressed by splitting weight rows
    cqi = (jnp.dot(ctrl.astype(cd), cqw_ref[0:D, :], preferred_element_type=jnp.float32)
           + jnp.dot(q_proj.astype(cd), cqw_ref[D:, :], preferred_element_type=jnp.float32)
           + cqb_ref[...])                                                      # [Bt, D]
    # attention vector folded into the query side: sum_d ctx*cqi*caw == sum_d ctx*(cqi*caw)
    w_c = cqi * caw_ref[...]                                                    # [Bt, D] f32
    raw_cai = jnp.sum(context * w_c[:, None, :], axis=-1) + cab_ref[0]          # [Bt, L]
    m_c = jnp.max(raw_cai, axis=-1, keepdims=True)
    e_c = jnp.exp(raw_cai - m_c)
    cai = e_c * pl.reciprocal(jnp.sum(e_c, axis=-1, keepdims=True), approx=True)
    new_ctrl = jnp.sum(cai[:, :, None] * context, axis=1)                       # [Bt, D] f32

    # -------------------------- ReadUnit ---------------------------
    # Algebraic rewrite of attn(concat_layer(cat([I, kb], ch).permute) * ctrl):
    #   rai[b,h] = sum_k kb_proj_t[b,h,k]*(proj_mem[b,k]*v1[b,k])
    #            + sum_k knowledge_t[b,h,k]*v2[b,k] + (rc_b . w_eff[b]) + rab
    # with w_eff = new_ctrl * raw, v{1,2} = w_eff @ rc_w{1,2}^T.  Exact up to reassociation.
    proj_mem = (jnp.dot(mem.astype(cd), mpw_ref[...], preferred_element_type=jnp.float32)
                + mpb_ref[...])                                                 # [Bt, D]
    w_eff = new_ctrl * raw_ref[...]                                             # [Bt, D]
    w_eff_c = w_eff.astype(cd)
    v1 = jnp.dot(w_eff_c, rcwT_ref[0], preferred_element_type=jnp.float32)      # [Bt, D]
    v2 = jnp.dot(w_eff_c, rcwT_ref[1], preferred_element_type=jnp.float32)      # [Bt, D]
    bias_r = jnp.sum(w_eff * rcb_ref[...], axis=-1, keepdims=True) + rab_ref[0]  # [Bt, 1]
    w1 = proj_mem * v1                                                          # [Bt, D] f32
    # fused: ONE cross-lane reduce instead of two on the [Bt,HW,D] terms
    rai = (jnp.sum(kb_proj_t * w1[:, None, :] + knowledge_t * v2[:, None, :], axis=-1)
           + bias_r)                                                            # [Bt, HW]
    m_r = jnp.max(rai, axis=-1, keepdims=True)
    e_r = jnp.exp(rai - m_r)
    rvi = e_r * pl.reciprocal(jnp.sum(e_r, axis=-1, keepdims=True), approx=True)
    read = jnp.sum(rvi[:, :, None] * knowledge_t, axis=1)                       # [Bt, D] f32

    # -------------------------- WriteUnit --------------------------
    # (self_attention=False, memory_gate=False)
    new_mem = (jnp.dot(read.astype(cd), wcw_ref[0:D, :], preferred_element_type=jnp.float32)
               + jnp.dot(mem.astype(cd), wcw_ref[D:, :], preferred_element_type=jnp.float32)
               + wcb_ref[...])                                                  # [Bt, D] f32

    ctrl_s[...] = new_ctrl
    mem_s[...] = new_mem

    @pl.when(step == last_step)
    def _store():
        out_ref[...] = new_mem


# ----------------------------------------------------------------------------
# Wrapper
# ----------------------------------------------------------------------------
def mac_unit_forward(context, question, knowledge, kb_proj, p, max_step,
                     stream_dtype=jnp.bfloat16, b_tile=None, vmem_limit_bytes=None):
    B, L, D = context.shape
    HW = knowledge.shape[-1]
    sd = jnp.dtype(stream_dtype)
    sbytes = sd.itemsize
    wbytes = sbytes                       # weights share the stream dtype

    # ---- per-generation VMEM budget (52 MiB on 64-MiB v7x, ~104 MiB on v5e/v6e) ----
    vmem_cap = _vmem_capacity_bytes()
    if vmem_limit_bytes is None:
        vmem_limit_bytes = min(int(vmem_cap * 0.82), 110 * 1024 * 1024)
    vmem_limit_bytes = int(vmem_limit_bytes)

    # pos-aware weights resident across all steps when they are small relative to the
    # budget (true on 128-MiB parts for CLEVR-scale dims); per-step slab otherwise (v7x).
    pos_bytes = wbytes * max_step * (2 * D * D + D)
    pos_resident = pos_bytes <= vmem_limit_bytes // 6

    # ---- batch tile sized from the VMEM budget; batch padded to a multiple ----
    if b_tile is None:
        row_stream = sbytes * (L * D + 2 * HW * D + 2 * D)          # ctx, kbt, kbpt, question
        row_state = 4 * 3 * D                                       # output block + ctrl/mem scratch
        row_tmp = 4 * (HW * D + L * D + 8 * D + 2 * HW + 2 * L)     # promoted f32 temporaries
        per_row = 2 * row_stream + row_state + row_tmp              # streams double-buffered
        const = wbytes * (3 * (2 * D * D) + D * D)                  # cq_w, wc_w, rc_wT, mp_w (1-buffered)
        const += pos_bytes if pos_resident else 2 * wbytes * (2 * D * D + D)
        const += 4 * 16 * D + (1 << 16)                             # small f32 params + slack
        budget = vmem_limit_bytes - const - (4 << 20)               # compiler-scratch headroom
        tile_fit = max(budget, 8 * per_row) // per_row
        b_tile = int(max(8, min(256, (tile_fit // 8) * 8)))
    b_tile = int(max(8, (int(b_tile) // 8) * 8))
    b_tile = min(b_tile, _round_up(B, 8))
    if B >= 16:
        # keep >= 2 batch tiles so the leading 'parallel' axis can shard across
        # TensorCores on multi-core chips (v7x megacore); harmless on 1-TC parts.
        b_tile = min(b_tile, _round_up((B + 1) // 2, 8))

    B_pad = _round_up(B, b_tile)
    nb = B_pad // b_tile
    if B_pad != B:
        pad = B_pad - B
        context = jnp.pad(context, ((0, pad), (0, 0), (0, 0)))
        question = jnp.pad(question, ((0, pad), (0, 0)))
        knowledge = jnp.pad(knowledge, ((0, pad), (0, 0), (0, 0)))
        kb_proj = jnp.pad(kb_proj, ((0, pad), (0, 0), (0, 0)))

    # glue: channels-first -> lane-friendly [B, HW, D]; streams & matmul weights in sd.
    knowledge_t = jnp.transpose(knowledge, (0, 2, 1)).astype(sd)
    kb_proj_t = jnp.transpose(kb_proj, (0, 2, 1)).astype(sd)
    context_s = context.astype(sd)
    question_s = question.astype(sd)

    pos_w = p['pos_w'].astype(sd)                                      # [max_step, 2D, D]
    pos_b = p['pos_b'].reshape(max_step, 1, D).astype(jnp.float32)
    # ReadUnit concat weight split & transposed for the algebraic rewrite.
    rc_wT = jnp.stack([jnp.transpose(p['rc_w'][0:D, :]),
                       jnp.transpose(p['rc_w'][D:2 * D, :])], axis=0).astype(sd)

    args = (
        context_s, question_s, knowledge_t, kb_proj_t,
        p['control_0'].astype(jnp.float32), p['mem_0'].astype(jnp.float32),
        pos_w, pos_b,
        p['cq_w'].astype(sd), p['cq_b'].reshape(1, D).astype(jnp.float32),
        p['cattn_w'].reshape(1, D).astype(jnp.float32),
        p['cattn_b'].reshape(1).astype(jnp.float32),
        p['mp_w'].astype(sd), p['mp_b'].reshape(1, D).astype(jnp.float32),
        rc_wT, p['rc_b'].reshape(1, D).astype(jnp.float32),
        p['rattn_w'].reshape(1, D).astype(jnp.float32),
        p['rattn_b'].reshape(1).astype(jnp.float32),
        p['wc_w'].astype(sd), p['wc_b'].reshape(1, D).astype(jnp.float32),
    )

    smem_scalar = pl.BlockSpec(memory_space=pltpu.MemorySpace.SMEM)
    if pos_resident:
        posw_spec = _fixed_spec((max_step, 2 * D, D))
        posb_spec = _fixed_spec((max_step, 1, D))
    else:
        posw_spec = pl.BlockSpec((1, 2 * D, D), lambda b, i: (i, 0, 0))
        posb_spec = pl.BlockSpec((1, 1, D), lambda b, i: (i, 0, 0))

    in_specs = [
        pl.BlockSpec((b_tile, L, D), lambda b, i: (b, 0, 0)),      # context
        pl.BlockSpec((b_tile, 2 * D), lambda b, i: (b, 0)),        # question
        pl.BlockSpec((b_tile, HW, D), lambda b, i: (b, 0, 0)),     # knowledge_t
        pl.BlockSpec((b_tile, HW, D), lambda b, i: (b, 0, 0)),     # kb_proj_t
        _fixed_spec((1, D)),                                       # control_0
        _fixed_spec((1, D)),                                       # mem_0
        posw_spec,                                                 # pos_w
        posb_spec,                                                 # pos_b
        _fixed_spec((2 * D, D)),                                   # cq_w
        _fixed_spec((1, D)),                                       # cq_b
        _fixed_spec((1, D)),                                       # cattn_w
        smem_scalar,                                               # cattn_b (SMEM scalar)
        _fixed_spec((D, D)),                                       # mp_w
        _fixed_spec((1, D)),                                       # mp_b
        _fixed_spec((2, D, D)),                                    # rc_wT
        _fixed_spec((1, D)),                                       # rc_b
        _fixed_spec((1, D)),                                       # rattn_w
        smem_scalar,                                               # rattn_b (SMEM scalar)
        _fixed_spec((2 * D, D)),                                   # wc_w
        _fixed_spec((1, D)),                                       # wc_b
    ]

    kernel = functools.partial(mac_unit_kernel, pos_resident=pos_resident)
    out = pl.pallas_call(
        kernel,
        out_shape=jax.ShapeDtypeStruct((B_pad, D), jnp.float32),
        grid_spec=pltpu.PrefetchScalarGridSpec(
            num_scalar_prefetch=0,
            grid=(nb, max_step),                                   # (batch tile, MAC step)
            in_specs=in_specs,
            out_specs=pl.BlockSpec((b_tile, D), lambda b, i: (b, 0)),
            scratch_shapes=[pltpu.VMEM((b_tile, D), jnp.float32),
                            pltpu.VMEM((b_tile, D), jnp.float32)],
        ),
        compiler_params=pltpu.CompilerParams(
            # batch tiles independent (megacore), recurrence carried across the step axis
            dimension_semantics=("parallel", "arbitrary"),
            vmem_limit_bytes=vmem_limit_bytes),
    )(*args)
    return out[:B]


# ----------------------------------------------------------------------------
# Pure-JAX reference (mirrors the torch module literally) for correctness check.
# ----------------------------------------------------------------------------
def mac_unit_reference(context, question, knowledge, kb_proj, p, max_step):
    hp = jax.lax.Precision.HIGHEST
    B = question.shape[0]
    D = context.shape[-1]
    ctrl = jnp.broadcast_to(p['control_0'], (B, D))
    mem = jnp.broadcast_to(p['mem_0'], (B, D))
    controls, memories = [ctrl], [mem]
    for i in range(max_step):
        # ControlUnit
        q_proj = jnp.dot(question, p['pos_w'][i], precision=hp) + p['pos_b'][i]
        cqi = jnp.dot(jnp.concatenate([controls[-1], q_proj], axis=-1),
                      p['cq_w'], precision=hp) + p['cq_b']
        cp = cqi[:, None, :] * context
        raw_cai = jnp.einsum('bld,do->blo', cp, p['cattn_w'].reshape(D, 1),
                             precision=hp)[..., 0] + p['cattn_b'][0]
        cai = jax.nn.softmax(raw_cai, axis=-1)
        ctrl = jnp.sum(cai[:, :, None] * context, axis=1)
        controls.append(ctrl)
        # ReadUnit
        proj_mem = jnp.dot(memories[-1], p['mp_w'], precision=hp) + p['mp_b']
        I = proj_mem[:, :, None] * kb_proj                        # [B, D, HW]
        cat = jnp.transpose(jnp.concatenate([I, knowledge], axis=1), (0, 2, 1))  # [B, HW, 2D]
        concat = jnp.einsum('bhk,kd->bhd', cat, p['rc_w'], precision=hp) + p['rc_b']
        rai = jnp.einsum('bhd,do->bho', concat * ctrl[:, None, :],
                         p['rattn_w'].reshape(D, 1), precision=hp)[..., 0] + p['rattn_b'][0]
        rvi = jax.nn.softmax(rai, axis=-1)
        read = jnp.sum(rvi[:, None, :] * knowledge, axis=-1)      # [B, D]
        # WriteUnit
        mem = jnp.dot(jnp.concatenate([read, memories[-1]], axis=-1),
                      p['wc_w'], precision=hp) + p['wc_b']
        memories.append(mem)
    return mem


# ----------------------------------------------------------------------------
# Deterministic synthetic parameters (shapes from MACUnit.__init__ / sub-units).
# ----------------------------------------------------------------------------
def init_params(key, dim, max_step):
    ks = jax.random.split(key, 16)

    def w(k, shape, fan_in):
        return jax.random.normal(k, shape, jnp.float32) / jnp.sqrt(float(fan_in))

    def b(k, shape):
        return 0.01 * jax.random.normal(k, shape, jnp.float32)

    return dict(
        control_0=jnp.zeros((1, dim), jnp.float32),
        mem_0=jnp.zeros((1, dim), jnp.float32),
        # ControlUnit
        pos_w=w(ks[0], (max_step, 2 * dim, dim), 2 * dim),
        pos_b=b(ks[1], (max_step, dim)),
        cq_w=w(ks[2], (2 * dim, dim), 2 * dim),
        cq_b=b(ks[3], (dim,)),
        cattn_w=w(ks[4], (dim,), dim),
        cattn_b=b(ks[5], (1,)),
        # ReadUnit
        mp_w=w(ks[6], (dim, dim), dim),
        mp_b=b(ks[7], (dim,)),
        rc_w=w(ks[8], (2 * dim, dim), 2 * dim),
        rc_b=b(ks[9], (dim,)),
        rattn_w=w(ks[10], (dim,), dim),
        rattn_b=b(ks[11], (1,)),
        # WriteUnit
        wc_w=w(ks[12], (2 * dim, dim), 2 * dim),
        wc_b=b(ks[13], (dim,)),
    )


if __name__ == "__main__":
    # Small shapes; B=3 (odd) deliberately exercises the batch-padding path,
    # D=128 keeps the lane dimension dense.
    B, L, D, HW, MAX_STEP = 3, 8, 128, 16, 4

    key = jax.random.PRNGKey(0)
    k_ctx, k_q, k_kb, k_kbp, k_par = jax.random.split(key, 5)
    context = jax.random.normal(k_ctx, (B, L, D), jnp.float32)
    question = jax.random.normal(k_q, (B, 2 * D), jnp.float32)
    knowledge = jax.random.normal(k_kb, (B, D, HW), jnp.float32)
    kb_proj = jax.random.normal(k_kbp, (B, D, HW), jnp.float32)
    params = init_params(k_par, D, MAX_STEP)

    ref = mac_unit_reference(context, question, knowledge, kb_proj, params, MAX_STEP)

    # f32 streams/weights: validates the algebraic ReadUnit rewrite tightly.
    run_f32 = jax.jit(functools.partial(mac_unit_forward, max_step=MAX_STEP,
                                        stream_dtype=jnp.float32))
    mem_f32 = jax.block_until_ready(run_f32(context, question, knowledge, kb_proj, params))
    assert mem_f32.shape == (B, D) and mem_f32.dtype == jnp.float32
    assert jnp.allclose(mem_f32, ref, rtol=2e-2, atol=5e-3), (
        f"f32 path max abs diff {jnp.max(jnp.abs(mem_f32 - ref))}")

    # bf16 streams/weights (production config: half DMA/VMEM, native MXU dtype).
    run_bf16 = jax.jit(functools.partial(mac_unit_forward, max_step=MAX_STEP,
                                         stream_dtype=jnp.bfloat16))
    mem_bf16 = jax.block_until_ready(run_bf16(context, question, knowledge, kb_proj, params))
    assert mem_bf16.shape == (B, D) and mem_bf16.dtype == jnp.float32
    assert jnp.allclose(mem_bf16, ref, rtol=6e-2, atol=6e-2), (
        f"bf16 path max abs diff {jnp.max(jnp.abs(mem_bf16 - ref))}")

    print("KERNEL_OK")
</pallas_src>

<mosaic_0001>
module attributes {stable_mosaic.version = 11 : i64} {
  func.func @mac_unit_kernel(%arg0: i32, %arg1: i32, %arg2: memref<8x8x128xf32, #tpu.memory_space<vmem>>, %arg3: memref<8x256xf32, #tpu.memory_space<vmem>>, %arg4: memref<8x16x128xf32, #tpu.memory_space<vmem>>, %arg5: memref<8x16x128xf32, #tpu.memory_space<vmem>>, %arg6: memref<1x128xf32, #tpu.memory_space<vmem>>, %arg7: memref<1x128xf32, #tpu.memory_space<vmem>>, %arg8: memref<4x256x128xf32, #tpu.memory_space<vmem>>, %arg9: memref<4x1x128xf32, #tpu.memory_space<vmem>>, %arg10: memref<256x128xf32, #tpu.memory_space<vmem>>, %arg11: memref<1x128xf32, #tpu.memory_space<vmem>>, %arg12: memref<1x128xf32, #tpu.memory_space<vmem>>, %arg13: memref<1xf32, #tpu.memory_space<smem>>, %arg14: memref<128x128xf32, #tpu.memory_space<vmem>>, %arg15: memref<1x128xf32, #tpu.memory_space<vmem>>, %arg16: memref<2x128x128xf32, #tpu.memory_space<vmem>>, %arg17: memref<1x128xf32, #tpu.memory_space<vmem>>, %arg18: memref<1x128xf32, #tpu.memory_space<vmem>>, %arg19: memref<1xf32, #tpu.memory_space<smem>>, %arg20: memref<256x128xf32, #tpu.memory_space<vmem>>, %arg21: memref<1x128xf32, #tpu.memory_space<vmem>>, %arg22: memref<8x128xf32, #tpu.memory_space<vmem>>, %arg23: memref<8x128xf32, #tpu.memory_space<vmem>>, %arg24: memref<8x128xf32, #tpu.memory_space<vmem>>) attributes {dimension_semantics = [#tpu.dimension_semantics<parallel>, #tpu.dimension_semantics<arbitrary>], iteration_bounds = array<i64: 1, 4>, scalar_prefetch = 0 : i64, scratch_operands = 2 : i64, tpu.core_type = #tpu.core_type<tc>, window_params = [{transform_indices = @transform_0, window_bounds = array<i64: 8, 8, 128>}, {transform_indices = @transform_1, window_bounds = array<i64: 8, 256>}, {transform_indices = @transform_2, window_bounds = array<i64: 8, 16, 128>}, {transform_indices = @transform_3, window_bounds = array<i64: 8, 16, 128>}, {pipeline_mode = #tpu.pipeline_mode<synchronous>, transform_indices = @transform_4, window_bounds = array<i64: 1, 128>}, {pipeline_mode = #tpu.pipeline_mode<synchronous>, transform_indices = @transform_5, window_bounds = array<i64: 1, 128>}, {pipeline_mode = #tpu.pipeline_mode<synchronous>, transform_indices = @transform_6, window_bounds = array<i64: 4, 256, 128>}, {pipeline_mode = #tpu.pipeline_mode<synchronous>, transform_indices = @transform_7, window_bounds = array<i64: 4, 1, 128>}, {pipeline_mode = #tpu.pipeline_mode<synchronous>, transform_indices = @transform_8, window_bounds = array<i64: 256, 128>}, {pipeline_mode = #tpu.pipeline_mode<synchronous>, transform_indices = @transform_9, window_bounds = array<i64: 1, 128>}, {pipeline_mode = #tpu.pipeline_mode<synchronous>, transform_indices = @transform_10, window_bounds = array<i64: 1, 128>}, {transform_indices = @transform_11, window_bounds = array<i64: 1>}, {pipeline_mode = #tpu.pipeline_mode<synchronous>, transform_indices = @transform_12, window_bounds = array<i64: 128, 128>}, {pipeline_mode = #tpu.pipeline_mode<synchronous>, transform_indices = @transform_13, window_bounds = array<i64: 1, 128>}, {pipeline_mode = #tpu.pipeline_mode<synchronous>, transform_indices = @transform_14, window_bounds = array<i64: 2, 128, 128>}, {pipeline_mode = #tpu.pipeline_mode<synchronous>, transform_indices = @transform_15, window_bounds = array<i64: 1, 128>}, {pipeline_mode = #tpu.pipeline_mode<synchronous>, transform_indices = @transform_16, window_bounds = array<i64: 1, 128>}, {transform_indices = @transform_17, window_bounds = array<i64: 1>}, {pipeline_mode = #tpu.pipeline_mode<synchronous>, transform_indices = @transform_18, window_bounds = array<i64: 256, 128>}, {pipeline_mode = #tpu.pipeline_mode<synchronous>, transform_indices = @transform_19, window_bounds = array<i64: 1, 128>}, {transform_indices = @transform_20, window_bounds = array<i64: 8, 128>}]} {
    %c0_i32 = arith.constant 0 : i32
    %0 = arith.cmpi eq, %arg1, %c0_i32 : i32
    %1 = arith.extui %0 : i1 to i32
    %c0_i32_0 = arith.constant 0 : i32
    %2 = arith.cmpi ne, %1, %c0_i32_0 : i32
    scf.if %2 {
      %c0_68 = arith.constant 0 : index
      %c0_69 = arith.constant 0 : index
      %110 = vector.load %arg6[%c0_68, %c0_69] : memref<1x128xf32, #tpu.memory_space<vmem>>, vector<1x128xf32>
      %111 = vector.shape_cast %110 : vector<1x128xf32> to vector<1x128xf32>
      %112 = vector.broadcast %111 : vector<1x128xf32> to vector<8x128xf32>
      %c0_70 = arith.constant 0 : index
      %c0_71 = arith.constant 0 : index
      %113 = vector.load %arg23[%c0_70, %c0_71] : memref<8x128xf32, #tpu.memory_space<vmem>>, vector<8x128xf32>
      tpu.vector_store %arg23[%c0_70, %c0_71], %112 {strides = array<i32>} : memref<8x128xf32, #tpu.memory_space<vmem>>, vector<8x128xf32>,
      %c0_72 = arith.constant 0 : index
      %c0_73 = arith.constant 0 : index
      %114 = vector.load %arg7[%c0_72, %c0_73] : memref<1x128xf32, #tpu.memory_space<vmem>>, vector<1x128xf32>
      %115 = vector.shape_cast %114 : vector<1x128xf32> to vector<1x128xf32>
      %116 = vector.broadcast %115 : vector<1x128xf32> to vector<8x128xf32>
      %c0_74 = arith.constant 0 : index
      %c0_75 = arith.constant 0 : index
      %117 = vector.load %arg24[%c0_74, %c0_75] : memref<8x128xf32, #tpu.memory_space<vmem>>, vector<8x128xf32>
      tpu.vector_store %arg24[%c0_74, %c0_75], %116 {strides = array<i32>} : memref<8x128xf32, #tpu.memory_space<vmem>>, vector<8x128xf32>,
    } else {
    }
    %c0 = arith.constant 0 : index
    %c0_1 = arith.constant 0 : index
    %3 = vector.load %arg23[%c0, %c0_1] : memref<8x128xf32, #tpu.memory_space<vmem>>, vector<8x128xf32>
    %c0_2 = arith.constant 0 : index
    %c0_3 = arith.constant 0 : index
    %4 = vector.load %arg24[%c0_2, %c0_3] : memref<8x128xf32, #tpu.memory_space<vmem>>, vector<8x128xf32>
    %c0_4 = arith.constant 0 : index
    %c0_5 = arith.constant 0 : index
    %c0_6 = arith.constant 0 : index
    %5 = vector.load %arg2[%c0_4, %c0_5, %c0_6] : memref<8x8x128xf32, #tpu.memory_space<vmem>>, vector<8x8x128xf32>
    %c0_7 = arith.constant 0 : index
    %c0_8 = arith.constant 0 : index
    %c0_9 = arith.constant 0 : index
    %6 = vector.load %arg4[%c0_7, %c0_8, %c0_9] : memref<8x16x128xf32, #tpu.memory_space<vmem>>, vector<8x16x128xf32>
    %c0_10 = arith.constant 0 : index
    %c0_11 = arith.constant 0 : index
    %c0_12 = arith.constant 0 : index
    %7 = vector.load %arg5[%c0_10, %c0_11, %c0_12] : memref<8x16x128xf32, #tpu.memory_space<vmem>>, vector<8x16x128xf32>
    %8 = arith.index_cast %arg1 : i32 to index
    %c0_13 = arith.constant 0 : index
    %c0_14 = arith.constant 0 : index
    %9 = vector.load %arg8[%8, %c0_13, %c0_14] : memref<4x256x128xf32, #tpu.memory_space<vmem>>, vector<1x256x128xf32>
    %10 = vector.shape_cast %9 : vector<1x256x128xf32> to vector<256x128xf32>
    %11 = arith.index_cast %arg1 : i32 to index
    %c0_15 = arith.constant 0 : index
    %c0_16 = arith.constant 0 : index
    %12 = vector.load %arg9[%11, %c0_15, %c0_16] : memref<4x1x128xf32, #tpu.memory_space<vmem>>, vector<1x1x128xf32>
    %13 = vector.shape_cast %12 : vector<1x1x128xf32> to vector<1x128xf32>
    %c0_17 = arith.constant 0 : index
    %c0_18 = arith.constant 0 : index
    %14 = vector.load %arg3[%c0_17, %c0_18] : memref<8x256xf32, #tpu.memory_space<vmem>>, vector<8x256xf32>
    %cst = arith.constant dense<0.000000e+00> : vector<8x128xf32>
    %15 = tpu.matmul %14, %10, %cst {dimension_numbers = #tpu.dot_dimension_numbers<[1], [0], [0], [1], [0, 0, 1, 1], [], []>} : vector<8x256xf32>, vector<256x128xf32>, vector<8x128xf32> -> vector<8x128xf32>
    %16 = vector.broadcast %13 : vector<1x128xf32> to vector<8x128xf32>
    %17 = arith.addf %15, %16 : vector<8x128xf32>
    %c0_19 = arith.constant 0 : index
    %c0_20 = arith.constant 0 : index
    %18 = vector.load %arg10[%c0_19, %c0_20] : memref<256x128xf32, #tpu.memory_space<vmem>>, vector<128x128xf32>
    %cst_21 = arith.constant dense<0.000000e+00> : vector<8x128xf32>
    %19 = tpu.matmul %3, %18, %cst_21 {dimension_numbers = #tpu.dot_dimension_numbers<[1], [0], [0], [1], [0, 0, 1, 1], [], []>} : vector<8x128xf32>, vector<128x128xf32>, vector<8x128xf32> -> vector<8x128xf32>
    %c128 = arith.constant 128 : index
    %c0_22 = arith.constant 0 : index
    %20 = vector.load %arg10[%c128, %c0_22] : memref<256x128xf32, #tpu.memory_space<vmem>>, vector<128x128xf32>
    %cst_23 = arith.constant dense<0.000000e+00> : vector<8x128xf32>
    %21 = tpu.matmul %17, %20, %cst_23 {dimension_numbers = #tpu.dot_dimension_numbers<[1], [0], [0], [1], [0, 0, 1, 1], [], []>} : vector<8x128xf32>, vector<128x128xf32>, vector<8x128xf32> -> vector<8x128xf32>
    %22 = arith.addf %19, %21 : vector<8x128xf32>
    %c0_24 = arith.constant 0 : index
    %c0_25 = arith.constant 0 : index
    %23 = vector.load %arg11[%c0_24, %c0_25] : memref<1x128xf32, #tpu.memory_space<vmem>>, vector<1x128xf32>
    %24 = vector.broadcast %23 : vector<1x128xf32> to vector<8x128xf32>
    %25 = arith.addf %22, %24 : vector<8x128xf32>
    %c0_26 = arith.constant 0 : index
    %c0_27 = arith.constant 0 : index
    %26 = vector.load %arg12[%c0_26, %c0_27] : memref<1x128xf32, #tpu.memory_space<vmem>>, vector<1x128xf32>
    %27 = vector.broadcast %26 : vector<1x128xf32> to vector<8x128xf32>
    %28 = arith.mulf %25, %27 : vector<8x128xf32>
    %29 = vector.shape_cast %28 : vector<8x128xf32> to vector<8x1x128xf32>
    %30 = vector.broadcast %29 : vector<8x1x128xf32> to vector<8x8x128xf32>
    %31 = arith.mulf %5, %30 : vector<8x8x128xf32>
    %cst_28 = arith.constant dense<0.000000e+00> : vector<8x8xf32>
    %32 = vector.multi_reduction <add>, %31, %cst_28 [2] : vector<8x8x128xf32> to vector<8x8xf32>
    %c0_29 = arith.constant 0 : index
    %33 = memref.load %arg13[%c0_29] : memref<1xf32, #tpu.memory_space<smem>>
    %34 = vector.broadcast %33 : f32 to vector<8x8xf32>
    %35 = arith.addf %32, %34 : vector<8x8xf32>
    %cst_30 = arith.constant dense<0xFF800000> : vector<8xf32>
    %36 = vector.multi_reduction <maximumf>, %35, %cst_30 [1] : vector<8x8xf32> to vector<8xf32>
    %37 = vector.shape_cast %36 : vector<8xf32> to vector<8x1xf32>
    %38 = vector.broadcast %37 : vector<8x1xf32> to vector<8x8xf32>
    %39 = arith.subf %35, %38 : vector<8x8xf32>
    %40 = math.exp %39 : vector<8x8xf32>
    %cst_31 = arith.constant dense<0.000000e+00> : vector<8xf32>
    %41 = vector.multi_reduction <add>, %40, %cst_31 [1] : vector<8x8xf32> to vector<8xf32>
    %42 = vector.shape_cast %41 : vector<8xf32> to vector<8x1xf32>
    %43 = tpu.reciprocal %42 {approx = true} : vector<8x1xf32> -> vector<8x1xf32>
    %44 = vector.broadcast %43 : vector<8x1xf32> to vector<8x8xf32>
    %45 = arith.mulf %40, %44 : vector<8x8xf32>
    %46 = vector.shape_cast %45 : vector<8x8xf32> to vector<8x8x1xf32>
    %47 = vector.broadcast %46 : vector<8x8x1xf32> to vector<8x8x128xf32>
    %48 = arith.mulf %47, %5 : vector<8x8x128xf32>
    %cst_32 = arith.constant dense<0.000000e+00> : vector<8x128xf32>
    %49 = vector.multi_reduction <add>, %48, %cst_32 [1] : vector<8x8x128xf32> to vector<8x128xf32>
    %c0_33 = arith.constant 0 : index
    %c0_34 = arith.constant 0 : index
    %50 = vector.load %arg14[%c0_33, %c0_34] : memref<128x128xf32, #tpu.memory_space<vmem>>, vector<128x128xf32>
    %cst_35 = arith.constant dense<0.000000e+00> : vector<8x128xf32>
    %51 = tpu.matmul %4, %50, %cst_35 {dimension_numbers = #tpu.dot_dimension_numbers<[1], [0], [0], [1], [0, 0, 1, 1], [], []>} : vector<8x128xf32>, vector<128x128xf32>, vector<8x128xf32> -> vector<8x128xf32>
    %c0_36 = arith.constant 0 : index
    %c0_37 = arith.constant 0 : index
    %52 = vector.load %arg15[%c0_36, %c0_37] : memref<1x128xf32, #tpu.memory_space<vmem>>, vector<1x128xf32>
    %53 = vector.broadcast %52 : vector<1x128xf32> to vector<8x128xf32>
    %54 = arith.addf %51, %53 : vector<8x128xf32>
    %c0_38 = arith.constant 0 : index
    %c0_39 = arith.constant 0 : index
    %55 = vector.load %arg18[%c0_38, %c0_39] : memref<1x128xf32, #tpu.memory_space<vmem>>, vector<1x128xf32>
    %56 = vector.broadcast %55 : vector<1x128xf32> to vector<8x128xf32>
    %57 = arith.mulf %49, %56 : vector<8x128xf32>
    %c0_40 = arith.constant 0 : index
    %c0_41 = arith.constant 0 : index
    %c0_42 = arith.constant 0 : index
    %58 = vector.load %arg16[%c0_40, %c0_41, %c0_42] : memref<2x128x128xf32, #tpu.memory_space<vmem>>, vector<1x128x128xf32>
    %59 = vector.shape_cast %58 : vector<1x128x128xf32> to vector<128x128xf32>
    %cst_43 = arith.constant dense<0.000000e+00> : vector<8x128xf32>
    %60 = tpu.matmul %57, %59, %cst_43 {dimension_numbers = #tpu.dot_dimension_numbers<[1], [0], [0], [1], [0, 0, 1, 1], [], []>} : vector<8x128xf32>, vector<128x128xf32>, vector<8x128xf32> -> vector<8x128xf32>
    %c1 = arith.constant 1 : index
    %c0_44 = arith.constant 0 : index
    %c0_45 = arith.constant 0 : index
    %61 = vector.load %arg16[%c1, %c0_44, %c0_45] : memref<2x128x128xf32, #tpu.memory_space<vmem>>, vector<1x128x128xf32>
    %62 = vector.shape_cast %61 : vector<1x128x128xf32> to vector<128x128xf32>
    %cst_46 = arith.constant dense<0.000000e+00> : vector<8x128xf32>
    %63 = tpu.matmul %57, %62, %cst_46 {dimension_numbers = #tpu.dot_dimension_numbers<[1], [0], [0], [1], [0, 0, 1, 1], [], []>} : vector<8x128xf32>, vector<128x128xf32>, vector<8x128xf32> -> vector<8x128xf32>
    %c0_47 = arith.constant 0 : index
    %c0_48 = arith.constant 0 : index
    %64 = vector.load %arg17[%c0_47, %c0_48] : memref<1x128xf32, #tpu.memory_space<vmem>>, vector<1x128xf32>
    %65 = vector.broadcast %64 : vector<1x128xf32> to vector<8x128xf32>
    %66 = arith.mulf %57, %65 : vector<8x128xf32>
    %cst_49 = arith.constant dense<0.000000e+00> : vector<8xf32>
    %67 = vector.multi_reduction <add>, %66, %cst_49 [1] : vector<8x128xf32> to vector<8xf32>
    %68 = vector.shape_cast %67 : vector<8xf32> to vector<8x1xf32>
    %c0_50 = arith.constant 0 : index
    %69 = memref.load %arg19[%c0_50] : memref<1xf32, #tpu.memory_space<smem>>
    %70 = vector.broadcast %69 : f32 to vector<8x1xf32>
    %71 = arith.addf %68, %70 : vector<8x1xf32>
    %72 = arith.mulf %54, %60 : vector<8x128xf32>
    %73 = vector.shape_cast %72 : vector<8x128xf32> to vector<8x1x128xf32>
    %74 = vector.broadcast %73 : vector<8x1x128xf32> to vector<8x16x128xf32>
    %75 = arith.mulf %7, %74 : vector<8x16x128xf32>
    %76 = vector.shape_cast %63 : vector<8x128xf32> to vector<8x1x128xf32>
    %77 = vector.broadcast %76 : vector<8x1x128xf32> to vector<8x16x128xf32>
    %78 = arith.mulf %6, %77 : vector<8x16x128xf32>
    %79 = arith.addf %75, %78 : vector<8x16x128xf32>
    %cst_51 = arith.constant dense<0.000000e+00> : vector<8x16xf32>
    %80 = vector.multi_reduction <add>, %79, %cst_51 [2] : vector<8x16x128xf32> to vector<8x16xf32>
    %81 = vector.broadcast %71 : vector<8x1xf32> to vector<8x16xf32>
    %82 = arith.addf %80, %81 : vector<8x16xf32>
    %cst_52 = arith.constant dense<0xFF800000> : vector<8xf32>
    %83 = vector.multi_reduction <maximumf>, %82, %cst_52 [1] : vector<8x16xf32> to vector<8xf32>
    %84 = vector.shape_cast %83 : vector<8xf32> to vector<8x1xf32>
    %85 = vector.broadcast %84 : vector<8x1xf32> to vector<8x16xf32>
    %86 = arith.subf %82, %85 : vector<8x16xf32>
    %87 = math.exp %86 : vector<8x16xf32>
    %cst_53 = arith.constant dense<0.000000e+00> : vector<8xf32>
    %88 = vector.multi_reduction <add>, %87, %cst_53 [1] : vector<8x16xf32> to vector<8xf32>
    %89 = vector.shape_cast %88 : vector<8xf32> to vector<8x1xf32>
    %90 = tpu.reciprocal %89 {approx = true} : vector<8x1xf32> -> vector<8x1xf32>
    %91 = vector.broadcast %90 : vector<8x1xf32> to vector<8x16xf32>
    %92 = arith.mulf %87, %91 : vector<8x16xf32>
    %93 = vector.shape_cast %92 : vector<8x16xf32> to vector<8x16x1xf32>
    %94 = vector.broadcast %93 : vector<8x16x1xf32> to vector<8x16x128xf32>
    %95 = arith.mulf %94, %6 : vector<8x16x128xf32>
    %cst_54 = arith.constant dense<0.000000e+00> : vector<8x128xf32>
    %96 = vector.multi_reduction <add>, %95, %cst_54 [1] : vector<8x16x128xf32> to vector<8x128xf32>
    %c0_55 = arith.constant 0 : index
    %c0_56 = arith.constant 0 : index
    %97 = vector.load %arg20[%c0_55, %c0_56] : memref<256x128xf32, #tpu.memory_space<vmem>>, vector<128x128xf32>
    %cst_57 = arith.constant dense<0.000000e+00> : vector<8x128xf32>
    %98 = tpu.matmul %96, %97, %cst_57 {dimension_numbers = #tpu.dot_dimension_numbers<[1], [0], [0], [1], [0, 0, 1, 1], [], []>} : vector<8x128xf32>, vector<128x128xf32>, vector<8x128xf32> -> vector<8x128xf32>
    %c128_58 = arith.constant 128 : index
    %c0_59 = arith.constant 0 : index
    %99 = vector.load %arg20[%c128_58, %c0_59] : memref<256x128xf32, #tpu.memory_space<vmem>>, vector<128x128xf32>
    %cst_60 = arith.constant dense<0.000000e+00> : vector<8x128xf32>
    %100 = tpu.matmul %4, %99, %cst_60 {dimension_numbers = #tpu.dot_dimension_numbers<[1], [0], [0], [1], [0, 0, 1, 1], [], []>} : vector<8x128xf32>, vector<128x128xf32>, vector<8x128xf32> -> vector<8x128xf32>
    %101 = arith.addf %98, %100 : vector<8x128xf32>
    %c0_61 = arith.constant 0 : index
    %c0_62 = arith.constant 0 : index
    %102 = vector.load %arg21[%c0_61, %c0_62] : memref<1x128xf32, #tpu.memory_space<vmem>>, vector<1x128xf32>
    %103 = vector.broadcast %102 : vector<1x128xf32> to vector<8x128xf32>
    %104 = arith.addf %101, %103 : vector<8x128xf32>
    %c0_63 = arith.constant 0 : index
    %c0_64 = arith.constant 0 : index
    %105 = vector.load %arg23[%c0_63, %c0_64] : memref<8x128xf32, #tpu.memory_space<vmem>>, vector<8x128xf32>
    tpu.vector_store %arg23[%c0_63, %c0_64], %49 {strides = array<i32>} : memref<8x128xf32, #tpu.memory_space<vmem>>, vector<8x128xf32>,
    %c0_65 = arith.constant 0 : index
    %c0_66 = arith.constant 0 : index
    %106 = vector.load %arg24[%c0_65, %c0_66] : memref<8x128xf32, #tpu.memory_space<vmem>>, vector<8x128xf32>
    tpu.vector_store %arg24[%c0_65, %c0_66], %104 {strides = array<i32>} : memref<8x128xf32, #tpu.memory_space<vmem>>, vector<8x128xf32>,
    %c3_i32 = arith.constant 3 : i32
    %107 = arith.cmpi eq, %arg1, %c3_i32 : i32
    %108 = arith.extui %107 : i1 to i32
    %c0_i32_67 = arith.constant 0 : i32
    %109 = arith.cmpi ne, %108, %c0_i32_67 : i32
    scf.if %109 {
      %c0_68 = arith.constant 0 : index
      %c0_69 = arith.constant 0 : index
      %110 = vector.load %arg22[%c0_68, %c0_69] : memref<8x128xf32, #tpu.memory_space<vmem>>, vector<8x128xf32>
      tpu.vector_store %arg22[%c0_68, %c0_69], %104 {strides = array<i32>} : memref<8x128xf32, #tpu.memory_space<vmem>>, vector<8x128xf32>,
    } else {
    }
    return
  }
  func.func @transform_0(%arg0: i32, %arg1: i32) -> (i32, i32, i32) {
    %c0_i32 = arith.constant 0 : i32
    %c0_i32_0 = arith.constant 0 : i32
    %c0_i32_1 = arith.constant 0 : i32
    return %arg0, %c0_i32, %c0_i32_0 : i32, i32, i32
  }
  func.func @transform_1(%arg0: i32, %arg1: i32) -> (i32, i32) {
    %c0_i32 = arith.constant 0 : i32
    %c0_i32_0 = arith.constant 0 : i32
    return %arg0, %c0_i32 : i32, i32
  }
  func.func @transform_2(%arg0: i32, %arg1: i32) -> (i32, i32, i32) {
    %c0_i32 = arith.constant 0 : i32
    %c0_i32_0 = arith.constant 0 : i32
    %c0_i32_1 = arith.constant 0 : i32
    return %arg0, %c0_i32, %c0_i32_0 : i32, i32, i32
  }
  func.func @transform_3(%arg0: i32, %arg1: i32) -> (i32, i32, i32) {
    %c0_i32 = arith.constant 0 : i32
    %c0_i32_0 = arith.constant 0 : i32
    %c0_i32_1 = arith.constant 0 : i32
    return %arg0, %c0_i32, %c0_i32_0 : i32, i32, i32
  }
  func.func @transform_4(%arg0: i32, %arg1: i32) -> (i32, i32) {
    %c0_i32 = arith.constant 0 : i32
    %c0_i32_0 = arith.constant 0 : i32
    %c0_i32_1 = arith.constant 0 : i32
    return %c0_i32, %c0_i32_0 : i32, i32
  }
  func.func @transform_5(%arg0: i32, %arg1: i32) -> (i32, i32) {
    %c0_i32 = arith.constant 0 : i32
    %c0_i32_0 = arith.constant 0 : i32
    %c0_i32_1 = arith.constant 0 : i32
    return %c0_i32, %c0_i32_0 : i32, i32
  }
  func.func @transform_6(%arg0: i32, %arg1: i32) -> (i32, i32, i32) {
    %c0_i32 = arith.constant 0 : i32
    %c0_i32_0 = arith.constant 0 : i32
    %c0_i32_1 = arith.constant 0 : i32
    %c0_i32_2 = arith.constant 0 : i32
    return %c0_i32, %c0_i32_0, %c0_i32_1 : i32, i32, i32
  }
  func.func @transform_7(%arg0: i32, %arg1: i32) -> (i32, i32, i32) {
    %c0_i32 = arith.constant 0 : i32
    %c0_i32_0 = arith.constant 0 : i32
    %c0_i32_1 = arith.constant 0 : i32
    %c0_i32_2 = arith.constant 0 : i32
    return %c0_i32, %c0_i32_0, %c0_i32_1 : i32, i32, i32
  }
  func.func @transform_8(%arg0: i32, %arg1: i32) -> (i32, i32) {
    %c0_i32 = arith.constant 0 : i32
    %c0_i32_0 = arith.constant 0 : i32
    %c0_i32_1 = arith.constant 0 : i32
    return %c0_i32, %c0_i32_0 : i32, i32
  }
  func.func @transform_9(%arg0: i32, %arg1: i32) -> (i32, i32) {
    %c0_i32 = arith.constant 0 : i32
    %c0_i32_0 = arith.constant 0 : i32
    %c0_i32_1 = arith.constant 0 : i32
    return %c0_i32, %c0_i32_0 : i32, i32
  }
  func.func @transform_10(%arg0: i32, %arg1: i32) -> (i32, i32) {
    %c0_i32 = arith.constant 0 : i32
    %c0_i32_0 = arith.constant 0 : i32
    %c0_i32_1 = arith.constant 0 : i32
    return %c0_i32, %c0_i32_0 : i32, i32
  }
  func.func @transform_11(%arg0: i32, %arg1: i32) -> i32 {
    %c0_i32 = arith.constant 0 : i32
    %c0_i32_0 = arith.constant 0 : i32
    return %c0_i32 : i32
  }
  func.func @transform_12(%arg0: i32, %arg1: i32) -> (i32, i32) {
    %c0_i32 = arith.constant 0 : i32
    %c0_i32_0 = arith.constant 0 : i32
    %c0_i32_1 = arith.constant 0 : i32
    return %c0_i32, %c0_i32_0 : i32, i32
  }
  func.func @transform_13(%arg0: i32, %arg1: i32) -> (i32, i32) {
    %c0_i32 = arith.constant 0 : i32
    %c0_i32_0 = arith.constant 0 : i32
    %c0_i32_1 = arith.constant 0 : i32
    return %c0_i32, %c0_i32_0 : i32, i32
  }
  func.func @transform_14(%arg0: i32, %arg1: i32) -> (i32, i32, i32) {
    %c0_i32 = arith.constant 0 : i32
    %c0_i32_0 = arith.constant 0 : i32
    %c0_i32_1 = arith.constant 0 : i32
    %c0_i32_2 = arith.constant 0 : i32
    return %c0_i32, %c0_i32_0, %c0_i32_1 : i32, i32, i32
  }
  func.func @transform_15(%arg0: i32, %arg1: i32) -> (i32, i32) {
    %c0_i32 = arith.constant 0 : i32
    %c0_i32_0 = arith.constant 0 : i32
    %c0_i32_1 = arith.constant 0 : i32
    return %c0_i32, %c0_i32_0 : i32, i32
  }
  func.func @transform_16(%arg0: i32, %arg1: i32) -> (i32, i32) {
    %c0_i32 = arith.constant 0 : i32
    %c0_i32_0 = arith.constant 0 : i32
    %c0_i32_1 = arith.constant 0 : i32
    return %c0_i32, %c0_i32_0 : i32, i32
  }
  func.func @transform_17(%arg0: i32, %arg1: i32) -> i32 {
    %c0_i32 = arith.constant 0 : i32
    %c0_i32_0 = arith.constant 0 : i32
    return %c0_i32 : i32
  }
  func.func @transform_18(%arg0: i32, %arg1: i32) -> (i32, i32) {
    %c0_i32 = arith.constant 0 : i32
    %c0_i32_0 = arith.constant 0 : i32
    %c0_i32_1 = arith.constant 0 : i32
    return %c0_i32, %c0_i32_0 : i32, i32
  }
  func.func @transform_19(%arg0: i32, %arg1: i32) -> (i32, i32) {
    %c0_i32 = arith.constant 0 : i32
    %c0_i32_0 = arith.constant 0 : i32
    %c0_i32_1 = arith.constant 0 : i32
    return %c0_i32, %c0_i32_0 : i32, i32
  }
  func.func @transform_20(%arg0: i32, %arg1: i32) -> (i32, i32) {
    %c0_i32 = arith.constant 0 : i32
    %c0_i32_0 = arith.constant 0 : i32
    return %arg0, %c0_i32 : i32, i32
  }
}

</mosaic_0001>

<bundles_post_ra>
// kernel: mac_unit_forward.1
= control target key start
LH: loop header
LB: loop body
LE: loop exit
PB: predicated region body
PF: predicated region fallthrough
CT: control target
= control target key end

     0   :  { %s6261_s0 = inlined_call_operand.hbm [shape: f32[8,8,128], index: 0, kind: input, shape index: {}]   ;;  %s6262_s1 = inlined_call_operand.hbm [shape: f32[8,256], index: 1, kind: input, shape index: {}]   ;;  %s6263_s2 = inlined_call_operand.hbm [shape: f32[8,16,128], index: 2, kind: input, shape index: {}]   ;;  %s6264_s3 = inlined_call_operand.hbm [shape: f32[8,16,128], index: 3, kind: input, shape index: {}]   ;;  %s6265_s4 = inlined_call_operand.hbm [shape: f32[1,128], index: 4, kind: input, shape index: {}]   ;;  %s6266_s5 = inlined_call_operand.hbm [shape: f32[1,128], index: 5, kind: input, shape index: {}]   ;;  %s6267_s6 = inlined_call_operand.hbm [shape: f32[4,256,128], index: 6, kind: input, shape index: {}]   ;;  %s6268_s7 = inlined_call_operand.hbm [shape: f32[4,1,128], index: 7, kind: input, shape index: {}]   ;;  %s6269_s8 = inlined_call_operand.hbm [shape: f32[256,128], index: 8, kind: input, shape index: {}]   ;;  %s6270_s9 = inlined_call_operand.hbm [shape: f32[1,128], index: 9, kind: input, shape index: {}]   ;;  %s6271_s10 = inlined_call_operand.hbm [shape: f32[1,128], index: 10, kind: input, shape index: {}]   ;;  %s6272_s11 = inlined_call_operand.<no memory space> [shape: f32[1], index: 11, kind: input, shape index: {}]   ;;  %s6273_s12 = inlined_call_operand.hbm [shape: f32[128,128], index: 12, kind: input, shape index: {}]   ;;  %s6274_s13 = inlined_call_operand.hbm [shape: f32[1,128], index: 13, kind: input, shape index: {}]   ;;  %s6275_s14 = inlined_call_operand.hbm [shape: f32[2,128,128], index: 14, kind: input, shape index: {}]   ;;  %s6276_s15 = inlined_call_operand.hbm [shape: f32[1,128], index: 15, kind: input, shape index: {}]   ;;  %s6277_s16 = inlined_call_operand.hbm [shape: f32[1,128], index: 16, kind: input, shape index: {}]   ;;  %s6278_s17 = inlined_call_operand.<no memory space> [shape: f32[1], index: 17, kind: input, shape index: {}]   ;;  %s6279_s18 = inlined_call_operand.hbm [shape: f32[256,128], index: 18, kind: input, shape index: {}]   ;;  %s6280_s19 = inlined_call_operand.hbm [shape: f32[1,128], index: 19, kind: input, shape index: {}]   ;;  %s6281_s20 = inlined_call_operand.hbm [shape: f32[8,128], index: 20, kind: output, shape index: {}]  }
   0x1   :  { %6305 = sst [smem:[#allocation51_spill]] %s6261_s0 }
   0x2   :  { %6306 = sst [smem:[#allocation52_spill]] %s6262_s1 }
   0x3   :  { %6307 = sst [smem:[#allocation53_spill]] %s6263_s2 }
   0x4   :  { %6308 = sst [smem:[#allocation54_spill]] %s6264_s3 }
   0x5   :  { %6309 = sst [smem:[#allocation55_spill]] %s6265_s4 }
   0x6   :  { %6310 = sst [smem:[#allocation56_spill]] %s6266_s5 }
   0x7   :  { %6311 = sst [smem:[#allocation57_spill]] %s6268_s7 }
   0x8   :  { %6312 = sst [smem:[#allocation58_spill]] %s6270_s9 }
   0x9   :  { %6313 = sst [smem:[#allocation59_spill]] %s6273_s12 }
   0xa   :  { %6314 = sst [smem:[#allocation60_spill]] %s6281_s20 }
   0xb   :  { %25 = sst [smem:[#allocation4]] %s6272_s11 }
   0xc   :  { %26 = sst [smem:[#allocation5]] %s6278_s17 }
   0xd   :  { %27 = vsyncpa [#allocation7], 0 }
   0xe   :  { %28 = vsyncpa [#allocation10], 0 }
   0xf   :  { %29 = vsyncpa [#allocation13], 0 }
  0x10   :  { %30 = vsyncpa [#allocation16], 0 }
  0x11   :  { %31 = vsyncpa [#allocation19], 0 }
  0x12   :  { %32 = vsyncpa [#allocation22], 0 }
  0x13   :  { %33 = vsyncpa [#allocation25], 0 }
  0x14   :  { %34 = vsyncpa [#allocation28], 0 }
  0x15   :  { %35 = vsyncpa [#allocation31], 0 }
  0x16   :  { %36 = vsyncpa [#allocation34], 0 }
  0x17   :  { %37 = vsyncpa [#allocation8], 0  ;;  %s5112_s2 = smov 0   ;;  %s5114_s25 = smov 0  }
  0x18   :  { %s5116_s11 = smov 0  }
  0x19 LB: > { %6315 = sst [smem:[#allocation47_spill]] %s4963_s2  ;;  %s4973_s17 = smov [#allocation9]   ;;  %s4971_s11 = sphi %s5116_s11, %s43_s11   ;;  %s4967_s25 = sphi %s5114_s25, %s6350_s25   ;;  %s4963_s2 = sphi %s5112_s2, %s6349_s2  }
  0x1a   : > { %6316 = sst [smem:[#allocation48_spill]] %s4971_s11  ;;  %s558_s3 = sshll.u32 %s4973_s17, 4  ;;  %s5136_s3 = int_to_ptr.vmem [resolvable:$true] %s558_s3 }
  0x1b   : > { %s6287_s26 = sadd.s32 4294967295, %s4971_s11   ;;  %p3444_p0 = scmp.ge.s32.totalorder %s4971_s11, 1 }
  0x1c   : > { %p526_p1 = scmp.lt.s32.totalorder %s4971_s11, 5  ;;  %p5132_p2 = scmp.eq.s32.totalorder %s6287_s26, 0 }
  0x1d   : > { %s4974_s4 = smov [#allocation12]   ;;  %s4975_s0 = smov [#allocation15]  }
  0x1e   : > { %s6317_s27 = scalar_select %p5132_p2, 1, 0 }
  0x1f   : > { %p5138_p3 = pnand %p3444_p0, %p526_p1  ;;  %s589_s29 = sshll.u32 %s4974_s4, 4  ;;  %s5144_s29 = int_to_ptr.vmem [resolvable:$true] %s589_s29 }
  0x20   : > { %6318 = sst [smem:[#allocation49_spill]] %s6317_s27  ;;  %s614_s21 = sshll.u32 %s4975_s0, 4  ;;  %s5152_s21 = int_to_ptr.vmem [resolvable:$true] %s614_s21 }
  0x21   : > { %s6319_s28 = scalar_select %p5138_p3, 1, 0 }
  0x22   : > { %p4173_p4 = pneg %p5138_p3  ;;  %s4976_s1 = smov [#allocation18]  }
  0x23   : > { %6320 = sst [smem:[#allocation50_spill]] %s6319_s28  ;;  %s5154_s22 = sshll.u32 %s4976_s1, 4  ;;  %s638_s22 = int_to_ptr.vmem [resolvable:$true] %s5154_s22 }
  0x24   : > { %p5148_p5 = pnand %p5132_p2, %p4173_p4  ;;  %s6322_s17 = sld [smem:[#allocation52_spill]] }
  0x26   : > { %p5164_p7 = pneg %p5148_p5 }
  0x2a   : > { %s4375_s26 = scalar_lea.hbm %s6322_s17, 256 }
  0x2b   : > { %p4376_p6 = scmp.ne.s32.totalorder %s6322_s17, %s4375_s26  ;;  %p4382_p10 = scmp.lt.u32.totalorder %s4375_s26, %s6322_s17 }
  0x2d   : > { %p4378_p8 = pnand %p5164_p7, %p4376_p6 }
  0x2f   : > { %p4379_p9 = pneg %p4378_p8 }
  0x31   : > { %p4384_p11 = pnand %p4382_p10, %p4379_p9 }
  0x33   : > { %4387 = shalt.err (!%p4384_p11)
}
  0x34   : > { %s4388_s20 = scalar_lea.vmem %s5136_s3, 256  ;;  %p4396_p1 = scmp.lt.s32.totalorder %s5136_s3, %s5136_s3 }
  0x35   : > { %p4389_p12 = scmp.ne.s32.totalorder %s5136_s3, %s4388_s20  ;;  %p4397_p4 = scmp.lt.s32.totalorder %s4388_s20, %s4388_s20 }
  0x37   : > { %p4391_p13 = pnand %p4389_p12, %p5164_p7  ;;  %p4398_p6 = por %p4397_p4, %p4396_p1 }
  0x39   : > { %p4392_p0 = pneg %p4391_p13 }
  0x3b   : > { %p4399_p8 = pnand %p4398_p6, %p4392_p0 }
  0x3d   : > { %4402 = shalt.err (!%p4399_p8)
}
  0x3e   : > { %4179 = dma.hbm_to_vmem [thread:$0]  (!%p5148_p5), %s6322_s17, 256, %s5136_s3, [#allocation10]  }
  0x3f   : > { %s6324_s0 = sld [smem:[#allocation54_spill]] }
  0x45   : > { %s4403_s1 = scalar_lea.hbm %s6324_s0, 2048 }
  0x46   : > { %p4404_p9 = scmp.ne.s32.totalorder %s6324_s0, %s4403_s1  ;;  %p4410_p12 = scmp.lt.u32.totalorder %s4403_s1, %s6324_s0 }
  0x48   : > { %p4406_p10 = pnand %p4404_p9, %p5164_p7 }
  0x4a   : > { %p4407_p11 = pneg %p4406_p10 }
  0x4c   : > { %p4412_p13 = pnand %p4410_p12, %p4407_p11 }
  0x4e   : > { %4415 = shalt.err (!%p4412_p13)
}
  0x4f   : > { %s4416_s3 = scalar_lea.vmem %s5144_s29, 2048  ;;  %p4424_p6 = scmp.lt.s32.totalorder %s5144_s29, %s5144_s29 }
  0x50   : > { %p4417_p0 = scmp.ne.s32.totalorder %s5144_s29, %s4416_s3  ;;  %p4425_p8 = scmp.lt.s32.totalorder %s4416_s3, %s4416_s3 }
  0x52   : > { %p4419_p1 = pnand %p4417_p0, %p5164_p7  ;;  %p4426_p9 = por %p4425_p8, %p4424_p6 }
  0x54   : > { %p4420_p4 = pneg %p4419_p1 }
  0x56   : > { %p4427_p10 = pnand %p4426_p9, %p4420_p4 }
  0x58   : > { %4430 = shalt.err (!%p4427_p10)
}
  0x59   : > { %s6298_s2 = smov 128   ;;  %s6300_s27 = smov 8  }
  0x5a   : > { %4185 = dma.hbm_to_vmem [thread:$0]  (!%p5148_p5), %s6324_s0, 2048, %s5144_s29, [#allocation13], %s6298_s2, %s6298_s2, %s6300_s27  }
  0x5b   : > { %s6325_s5 = sld [smem:[#allocation56_spill]] }
  0x61   : > { %s4431_s4 = scalar_lea.hbm %s6325_s5, 16 }
  0x62   : > { %p4432_p11 = scmp.ne.s32.totalorder %s6325_s5, %s4431_s4  ;;  %p4438_p0 = scmp.lt.u32.totalorder %s4431_s4, %s6325_s5 }
  0x64   : > { %p4434_p12 = pnand %p4432_p11, %p5164_p7 }
  0x66   : > { %p4435_p13 = pneg %p4434_p12 }
  0x68   : > { %p4440_p1 = pnand %p4438_p0, %p4435_p13 }
  0x6a   : > { %4443 = shalt.err (!%p4440_p1)
}
  0x6b   : > { %s4444_s29 = scalar_lea.vmem %s5152_s21, 16  ;;  %s4451_s28 = scalar_lea.vmem %s5152_s21, 32 }
  0x6c   : > { %p4445_p4 = scmp.ne.s32.totalorder %s5152_s21, %s4444_s29  ;;  %p4452_p9 = scmp.lt.s32.totalorder %s5152_s21, %s5152_s21 }
  0x6d   : > { %p4453_p10 = scmp.lt.s32.totalorder %s4451_s28, %s4444_s29 }
  0x6e   : > { %p4447_p6 = pnand %p4445_p4, %p5164_p7 }
  0x6f   : > { %p4454_p11 = por %p4453_p10, %p4452_p9 }
  0x70   : > { %p4448_p8 = pneg %p4447_p6 }
  0x72   : > { %p4455_p12 = pnand %p4454_p11, %p4448_p8 }
  0x74   : > { %4458 = shalt.err (!%p4455_p12)
}
  0x75   : > { %4191 = dma.hbm_to_vmem [thread:$0]  (!%p5148_p5), %s6325_s5, 16, %s5152_s21, [#allocation16]  }
  0x76   : > { %s6326_s7 = sld [smem:[#allocation57_spill]] }
  0x7c   : > { %s4459_s4 = scalar_lea.hbm %s6326_s7, 64 }
  0x7d   : > { %p4460_p13 = scmp.ne.s32.totalorder %s6326_s7, %s4459_s4  ;;  %p4466_p4 = scmp.lt.u32.totalorder %s4459_s4, %s6326_s7 }
  0x7f   : > { %p4462_p0 = pnand %p4460_p13, %p5164_p7 }
  0x81   : > { %p4463_p1 = pneg %p4462_p0 }
  0x83   : > { %p4468_p6 = pnand %p4466_p4, %p4463_p1 }
  0x85   : > { %4471 = shalt.err (!%p4468_p6)
}
  0x86   : > { %s4472_s28 = scalar_lea.vmem %s638_s22, 64  ;;  %p4480_p11 = scmp.lt.s32.totalorder %s638_s22, %s638_s22 }
  0x87   : > { %p4473_p8 = scmp.ne.s32.totalorder %s638_s22, %s4472_s28  ;;  %p4481_p12 = scmp.lt.s32.totalorder %s4472_s28, %s4472_s28 }
  0x89   : > { %p4475_p9 = pnand %p4473_p8, %p5164_p7  ;;  %p4482_p2 = por %p4481_p12, %p4480_p11 }
  0x8b   : > { %p4476_p10 = pneg %p4475_p9 }
  0x8d   : > { %p4483_p3 = pnand %p4482_p2, %p4476_p10 }
  0x8f   : > { %4486 = shalt.err (!%p4483_p3)
}
  0x90   : > { %s4979_s21 = smov 16   ;;  %s4980_s17 = smov 1  }
  0x91   : > { %4197 = dma.hbm_to_vmem [thread:$0]  (!%p5148_p5), %s6326_s7, 64, %s638_s22, [#allocation19], %s4979_s21, %s4979_s21, %s4980_s17  }
  0x92   : > { %s4981_s24 = smov [#allocation21]   ;;  %s4982_s1 = smov [#allocation24]  }
  0x93   : > { %s664_s4 = sshll.u32 %s4981_s24, 4  ;;  %s688_s20 = sshll.u32 %s4982_s1, 4  ;;  %s665_s4 = int_to_ptr.vmem [resolvable:$true] %s664_s4  ;;  %s689_s20 = int_to_ptr.vmem [resolvable:$true] %s688_s20 }
  0x94   : > { %s6327_s9 = sld [smem:[#allocation58_spill]] }
  0x9a   : > { %s4487_s28 = scalar_lea.hbm %s6327_s9, 16 }
  0x9b   : > { %p4488_p2 = scmp.ne.s32.totalorder %s6327_s9, %s4487_s28  ;;  %p4494_p0 = scmp.lt.u32.totalorder %s4487_s28, %s6327_s9 }
  0x9d   : > { %p4490_p3 = pnand %p4488_p2, %p5164_p7 }
  0x9f   : > { %p4491_p13 = pneg %p4490_p3 }
  0xa1   : > { %p4496_p1 = pnand %p4494_p0, %p4491_p13 }
  0xa3   : > { %4499 = shalt.err (!%p4496_p1)
}
  0xa4   : > { %s4500_s22 = scalar_lea.vmem %s665_s4, 16  ;;  %s4507_s21 = scalar_lea.vmem %s665_s4, 32 }
  0xa5   : > { %p4501_p4 = scmp.ne.s32.totalorder %s665_s4, %s4500_s22  ;;  %p4508_p9 = scmp.lt.s32.totalorder %s665_s4, %s665_s4 }
  0xa6   : > { %p4509_p10 = scmp.lt.s32.totalorder %s4507_s21, %s4500_s22 }
  0xa7   : > { %p4503_p6 = pnand %p4501_p4, %p5164_p7 }
  0xa8   : > { %p4510_p11 = por %p4509_p10, %p4508_p9 }
  0xa9   : > { %p4504_p8 = pneg %p4503_p6 }
  0xab   : > { %p4511_p12 = pnand %p4510_p11, %p4504_p8 }
  0xad   : > { %4514 = shalt.err (!%p4511_p12)
}
  0xae   : > { %4203 = dma.hbm_to_vmem [thread:$0]  (!%p5148_p5), %s6327_s9, 16, %s665_s4, [#allocation22]  }
  0xaf   : > { %s6328_s12 = sld [smem:[#allocation59_spill]] }
  0xb5   : > { %s4515_s17 = scalar_lea.hbm %s6328_s12, 2048 }
  0xb6   : > { %p4516_p2 = scmp.ne.s32.totalorder %s6328_s12, %s4515_s17  ;;  %p4522_p0 = scmp.lt.u32.totalorder %s4515_s17, %s6328_s12 }
  0xb8   : > { %p4518_p3 = pnand %p4516_p2, %p5164_p7 }
  0xba   : > { %p4519_p13 = pneg %p4518_p3 }
  0xbc   : > { %p4524_p1 = pnand %p4522_p0, %p4519_p13 }
  0xbe   : > { %4527 = shalt.err (!%p4524_p1)
}
  0xbf   : > { %s4528_s3 = scalar_lea.vmem %s689_s20, 2048  ;;  %p4536_p9 = scmp.lt.s32.totalorder %s689_s20, %s689_s20 }
  0xc0   : > { %p4529_p4 = scmp.ne.s32.totalorder %s689_s20, %s4528_s3  ;;  %p4537_p10 = scmp.lt.s32.totalorder %s4528_s3, %s4528_s3 }
  0xc2   : > { %p4531_p6 = pnand %p4529_p4, %p5164_p7  ;;  %p4538_p11 = por %p4537_p10, %p4536_p9 }
  0xc4   : > { %p4532_p8 = pneg %p4531_p6 }
  0xc6   : > { %p4539_p12 = pnand %p4538_p11, %p4532_p8 }
  0xc8   : > { %4542 = shalt.err (!%p4539_p12)
}
  0xc9   : > { %s6329_s4 = smov 8   ;;  %s6330_s29 = smov 128  }
  0xca   : > { %4209 = dma.hbm_to_vmem [thread:$0]  (!%p5148_p5), %s6328_s12, 2048, %s689_s20, [#allocation25], %s6330_s29, %s6330_s29, %s6329_s4  }
  0xcb   : > { %s4983_s21 = smov [#allocation27]   ;;  %s4984_s27 = smov [#allocation30]  }
  0xcc   : > { %s712_s2 = sshll.u32 %s4983_s21, 4  ;;  %s737_s5 = sshll.u32 %s4984_s27, 4  ;;  %s713_s2 = int_to_ptr.vmem [resolvable:$true] %s712_s2  ;;  %s738_s5 = int_to_ptr.vmem [resolvable:$true] %s737_s5 }
  0xcd   : > { %s4543_s26 = scalar_lea.hbm %s6275_s14, 4096 }
  0xce   : > { %p4544_p2 = scmp.ne.s32.totalorder %s6275_s14, %s4543_s26  ;;  %p4550_p0 = scmp.lt.u32.totalorder %s4543_s26, %s6275_s14 }
  0xd0   : > { %p4546_p3 = pnand %p4544_p2, %p5164_p7 }
  0xd2   : > { %p4547_p13 = pneg %p4546_p3 }
  0xd4   : > { %p4552_p1 = pnand %p4550_p0, %p4547_p13 }
  0xd6   : > { %4555 = shalt.err (!%p4552_p1)
}
  0xd7   : > { %s4556_s20 = scalar_lea.vmem %s713_s2, 4096  ;;  %p4564_p9 = scmp.lt.s32.totalorder %s713_s2, %s713_s2 }
  0xd8   : > { %p4557_p4 = scmp.ne.s32.totalorder %s713_s2, %s4556_s20  ;;  %p4565_p10 = scmp.lt.s32.totalorder %s4556_s20, %s4556_s20 }
  0xda   : > { %p4559_p6 = pnand %p4557_p4, %p5164_p7  ;;  %p4566_p11 = por %p4565_p10, %p4564_p9 }
  0xdc   : > { %p4560_p8 = pneg %p4559_p6 }
  0xde   : > { %p4567_p12 = pnand %p4566_p11, %p4560_p8 }
  0xe0   : > { %4570 = shalt.err (!%p4567_p12)
}
  0xe1   : > { %4215 = dma.hbm_to_vmem [thread:$0]  (!%p5148_p5), %s6275_s14, 4096, %s713_s2, [#allocation28], %s6330_s29, %s6330_s29, %s6329_s4  }
  0xe2   : > { %s4571_s0 = scalar_lea.hbm %s6277_s16, 16 }
  0xe3   : > { %p4572_p2 = scmp.ne.s32.totalorder %s6277_s16, %s4571_s0  ;;  %p4578_p0 = scmp.lt.u32.totalorder %s4571_s0, %s6277_s16 }
  0xe5   : > { %p4574_p3 = pnand %p4572_p2, %p5164_p7 }
  0xe7   : > { %p4575_p13 = pneg %p4574_p3 }
  0xe9   : > { %p4580_p1 = pnand %p4578_p0, %p4575_p13 }
  0xeb   : > { %4583 = shalt.err (!%p4580_p1)
}
  0xec   : > { %s4584_s1 = scalar_lea.vmem %s738_s5, 16  ;;  %s4591_s2 = scalar_lea.vmem %s738_s5, 32 }
  0xed   : > { %p4585_p4 = scmp.ne.s32.totalorder %s738_s5, %s4584_s1  ;;  %p4592_p9 = scmp.lt.s32.totalorder %s738_s5, %s738_s5 }
  0xee   : > { %p4593_p10 = scmp.lt.s32.totalorder %s4591_s2, %s4584_s1 }
  0xef   : > { %p4587_p6 = pnand %p4585_p4, %p5164_p7 }
  0xf0   : > { %p4594_p11 = por %p4593_p10, %p4592_p9 }
  0xf1   : > { %p4588_p8 = pneg %p4587_p6 }
  0xf3   : > { %p4595_p12 = pnand %p4594_p11, %p4588_p8 }
  0xf5   : > { %4598 = shalt.err (!%p4595_p12)
}
  0xf6   : > { %4221 = dma.hbm_to_vmem [thread:$0]  (!%p5148_p5), %s6277_s16, 16, %s738_s5, [#allocation31]  }
  0xf7   : > { %s52_s28 = sadd.s32 1, %s4967_s25  ;;  %s4985_s22 = smov [#allocation6]  }
  0xf8   : > { %s541_s21 = sshll.u32 %s4985_s22, 4  ;;  %p5333_p2 = scmp.ge.s32.totalorder %s52_s28, 4  ;;  %s542_s21 = int_to_ptr.vmem [resolvable:$true] %s541_s21 }
  0xf9   : > { %s6332_s26 = sld [smem:[#allocation51_spill]] }
  0xfa   : > { %s6331_s27 = scalar_select %p5333_p2, 1, 0 }
  0xff   : > { %s4599_s23 = scalar_lea.hbm %s6332_s26, 1024 }
 0x100   : > { %p4600_p3 = scmp.ne.s32.totalorder %s6332_s26, %s4599_s23  ;;  %p4606_p1 = scmp.lt.u32.totalorder %s4599_s23, %s6332_s26 }
 0x102   : > { %p4602_p13 = pnand %p4600_p3, %p5164_p7 }
 0x104   : > { %p4603_p0 = pneg %p4602_p13 }
 0x106   : > { %p4608_p4 = pnand %p4606_p1, %p4603_p0 }
 0x108   : > { %4611 = shalt.err (!%p4608_p4)
}
 0x109   : > { %s4612_s3 = scalar_lea.vmem %s542_s21, 1024  ;;  %p4620_p10 = scmp.lt.s32.totalorder %s542_s21, %s542_s21 }
 0x10a   : > { %p4613_p6 = scmp.ne.s32.totalorder %s542_s21, %s4612_s3  ;;  %p4621_p11 = scmp.lt.s32.totalorder %s4612_s3, %s4612_s3 }
 0x10c   : > { %p4615_p8 = pnand %p4613_p6, %p5164_p7  ;;  %p4622_p12 = por %p4621_p11, %p4620_p10 }
 0x10e   : > { %p4616_p9 = pneg %p4615_p8 }
 0x110   : > { %p4623_p2 = pnand %p4622_p12, %p4616_p9 }
 0x112   : > { %4626 = shalt.err (!%p4623_p2)
}
 0x113   : > { %4176 = dma.hbm_to_vmem [thread:$0]  (!%p5148_p5), %s6332_s26, 1024, %s542_s21, [#allocation7], %s6330_s29, %s6330_s29, %s6329_s4  }
 0x114   : > { %p6333_p3 = scmp.ne.s32.totalorder %s6331_s27, 0  ;;  %s4986_s0 = smov [#allocation11]  }
 0x115   : > { %s572_s17 = sshll.u32 %s4986_s0, 4  ;;  %s4987_s23 = smov [#allocation14]   ;;  %s573_s17 = int_to_ptr.vmem [resolvable:$true] %s572_s17 }
 0x116   : > { %s6352_s28 = smov (%p6333_p3, %s52_s28), 0  ;;  %s603_s24 = sshll.u32 %s4987_s23, 4  ;;  %s5362_s24 = int_to_ptr.vmem [resolvable:$true] %s603_s24 }
 0x117   : > { %s6334_s2 = sld [smem:[#allocation53_spill]] }
 0x11d   : > { %s6335_s3 = smov %s6334_s2  ;;  %s4627_s7 = scalar_lea.hbm %s6334_s2, 2048 }
 0x11e   : > { %p4628_p2 = scmp.ne.s32.totalorder %s6335_s3, %s4627_s7  ;;  %p4634_p1 = scmp.lt.u32.totalorder %s4627_s7, %s6335_s3 }
 0x120   : > { %p4630_p13 = pnand %p4628_p2, %p5164_p7 }
 0x122   : > { %p4631_p0 = pneg %p4630_p13 }
 0x124   : > { %p4636_p4 = pnand %p4634_p1, %p4631_p0 }
 0x126   : > { %4639 = shalt.err (!%p4636_p4)
}
 0x127   : > { %s4640_s20 = scalar_lea.vmem %s573_s17, 2048  ;;  %p4648_p10 = scmp.lt.s32.totalorder %s573_s17, %s573_s17 }
 0x128   : > { %p4641_p6 = scmp.ne.s32.totalorder %s573_s17, %s4640_s20  ;;  %p4649_p11 = scmp.lt.s32.totalorder %s4640_s20, %s4640_s20 }
 0x12a   : > { %p4643_p8 = pnand %p4641_p6, %p5164_p7  ;;  %p4650_p12 = por %p4649_p11, %p4648_p10 }
 0x12c   : > { %p4644_p9 = pneg %p4643_p8 }
 0x12e   : > { %p4651_p3 = pnand %p4650_p12, %p4644_p9 }
 0x130   : > { %4654 = shalt.err (!%p4651_p3)
}
 0x131   : > { %4182 = dma.hbm_to_vmem [thread:$0]  (!%p5148_p5), %s6335_s3, 2048, %s573_s17, [#allocation10], %s6330_s29, %s6330_s29, %s6329_s4  }
 0x132   : > { %s6336_s0 = sld [smem:[#allocation55_spill]] }
 0x138   : > { %s4655_s23 = scalar_lea.hbm %s6336_s0, 16 }
 0x139   : > { %p4656_p2 = scmp.ne.s32.totalorder %s6336_s0, %s4655_s23  ;;  %p4662_p1 = scmp.lt.u32.totalorder %s4655_s23, %s6336_s0 }
 0x13b   : > { %p4658_p13 = pnand %p4656_p2, %p5164_p7 }
 0x13d   : > { %p4659_p0 = pneg %p4658_p13 }
 0x13f   : > { %p4664_p4 = pnand %p4662_p1, %p4659_p0 }
 0x141   : > { %4667 = shalt.err (!%p4664_p4)
}
 0x142   : > { %s4668_s17 = scalar_lea.vmem %s5362_s24, 16  ;;  %s4675_s27 = scalar_lea.vmem %s5362_s24, 32 }
 0x143   : > { %p4669_p6 = scmp.ne.s32.totalorder %s5362_s24, %s4668_s17  ;;  %p4676_p10 = scmp.lt.s32.totalorder %s5362_s24, %s5362_s24 }
 0x144   : > { %p4677_p11 = scmp.lt.s32.totalorder %s4675_s27, %s4668_s17 }
 0x145   : > { %p4671_p8 = pnand %p4669_p6, %p5164_p7 }
 0x146   : > { %p4678_p12 = por %p4677_p11, %p4676_p10 }
 0x147   : > { %p4672_p9 = pneg %p4671_p8 }
 0x149   : > { %p4679_p3 = pnand %p4678_p12, %p4672_p9 }
 0x14b   : > { %4682 = shalt.err (!%p4679_p3)
}
 0x14c   : > { %4188 = dma.hbm_to_vmem [thread:$0]  (!%p5148_p5), %s6336_s0, 16, %s5362_s24, [#allocation13]  }
 0x14d   : > { %s4988_s7 = smov [#allocation17]   ;;  %s4989_s22 = smov [#allocation20]  }
 0x14e   : > { %s624_s12 = sshll.u32 %s4988_s7, 4  ;;  %s650_s23 = sshll.u32 %s4989_s22, 4  ;;  %s625_s12 = int_to_ptr.vmem [resolvable:$true] %s624_s12  ;;  %s5409_s23 = int_to_ptr.vmem [resolvable:$true] %s650_s23 }
 0x14f   : > { %s4683_s2 = scalar_lea.hbm %s6267_s6, 16384 }
 0x150   : > { %p4684_p2 = scmp.ne.s32.totalorder %s6267_s6, %s4683_s2  ;;  %p4690_p1 = scmp.lt.u32.totalorder %s4683_s2, %s6267_s6 }
 0x152   : > { %p4686_p13 = pnand %p4684_p2, %p5164_p7 }
 0x154   : > { %p4687_p0 = pneg %p4686_p13 }
 0x156   : > { %p4692_p4 = pnand %p4690_p1, %p4687_p0 }
 0x158   : > { %4695 = shalt.err (!%p4692_p4)
}
 0x159   : > { %s4696_s20 = scalar_lea.vmem %s625_s12, 16384  ;;  %p4704_p10 = scmp.lt.s32.totalorder %s625_s12, %s625_s12 }
 0x15a   : > { %p4697_p6 = scmp.ne.s32.totalorder %s625_s12, %s4696_s20  ;;  %p4705_p11 = scmp.lt.s32.totalorder %s4696_s20, %s4696_s20 }
 0x15c   : > { %p4699_p8 = pnand %p4697_p6, %p5164_p7  ;;  %p4706_p12 = por %p4705_p11, %p4704_p10 }
 0x15e   : > { %p4700_p9 = pneg %p4699_p8 }
 0x160   : > { %p4707_p3 = pnand %p4706_p12, %p4700_p9 }
 0x162   : > { %4710 = shalt.err (!%p4707_p3)
}
 0x163   : > { %4194 = dma.hbm_to_vmem [thread:$0]  (!%p5148_p5), %s6267_s6, 16384, %s625_s12, [#allocation16], %s6330_s29, %s6330_s29, %s6329_s4  }
 0x164   : > { %s4711_s5 = scalar_lea.hbm %s6269_s8, 4096 }
 0x165   : > { %p4712_p2 = scmp.ne.s32.totalorder %s6269_s8, %s4711_s5  ;;  %p4718_p1 = scmp.lt.u32.totalorder %s4711_s5, %s6269_s8 }
 0x167   : > { %p4714_p13 = pnand %p4712_p2, %p5164_p7 }
 0x169   : > { %p4715_p0 = pneg %p4714_p13 }
 0x16b   : > { %p4720_p4 = pnand %p4718_p1, %p4715_p0 }
 0x16d   : > { %4723 = shalt.err (!%p4720_p4)
}
 0x16e   : > { %s4724_s12 = scalar_lea.vmem %s5409_s23, 4096  ;;  %p4732_p10 = scmp.lt.s32.totalorder %s5409_s23, %s5409_s23 }
 0x16f   : > { %p4725_p6 = scmp.ne.s32.totalorder %s5409_s23, %s4724_s12  ;;  %p4733_p11 = scmp.lt.s32.totalorder %s4724_s12, %s4724_s12 }
 0x171   : > { %p4727_p8 = pnand %p4725_p6, %p5164_p7  ;;  %p4734_p12 = por %p4733_p11, %p4732_p10 }
 0x173   : > { %p4728_p9 = pneg %p4727_p8 }
 0x175   : > { %p4735_p3 = pnand %p4734_p12, %p4728_p9 }
 0x177   : > { %4738 = shalt.err (!%p4735_p3)
}
 0x178   : > { %4200 = dma.hbm_to_vmem [thread:$0]  (!%p5148_p5), %s6269_s8, 4096, %s5409_s23, [#allocation19], %s6330_s29, %s6330_s29, %s6329_s4  }
 0x179   : > { %s4990_s9 = smov [#allocation23]   ;;  %s4991_s22 = smov [#allocation26]  }
 0x17a   : > { %s675_s7 = sshll.u32 %s4990_s9, 4  ;;  %s702_s1 = sshll.u32 %s4991_s22, 4  ;;  %s676_s7 = int_to_ptr.vmem [resolvable:$true] %s675_s7  ;;  %s5458_s1 = int_to_ptr.vmem [resolvable:$true] %s702_s1 }
 0x17b   : > { %s4739_s21 = scalar_lea.hbm %s6271_s10, 16 }
 0x17c   : > { %p4740_p2 = scmp.ne.s32.totalorder %s6271_s10, %s4739_s21  ;;  %p4746_p1 = scmp.lt.u32.totalorder %s4739_s21, %s6271_s10 }
 0x17e   : > { %p4742_p13 = pnand %p4740_p2, %p5164_p7 }
 0x180   : > { %p4743_p0 = pneg %p4742_p13 }
 0x182   : > { %p4748_p4 = pnand %p4746_p1, %p4743_p0 }
 0x184   : > { %4751 = shalt.err (!%p4748_p4)
}
 0x185   : > { %s4752_s24 = scalar_lea.vmem %s676_s7, 16  ;;  %s4759_s20 = scalar_lea.vmem %s676_s7, 32 }
 0x186   : > { %p4753_p6 = scmp.ne.s32.totalorder %s676_s7, %s4752_s24  ;;  %p4760_p10 = scmp.lt.s32.totalorder %s676_s7, %s676_s7 }
 0x187   : > { %p4761_p11 = scmp.lt.s32.totalorder %s4759_s20, %s4752_s24 }
 0x188   : > { %p4755_p8 = pnand %p4753_p6, %p5164_p7 }
 0x189   : > { %p4762_p12 = por %p4761_p11, %p4760_p10 }
 0x18a   : > { %p4756_p9 = pneg %p4755_p8 }
 0x18c   : > { %p4763_p3 = pnand %p4762_p12, %p4756_p9 }
 0x18e   : > { %4766 = shalt.err (!%p4763_p3)
}
 0x18f   : > { %4206 = dma.hbm_to_vmem [thread:$0]  (!%p5148_p5), %s6271_s10, 16, %s676_s7, [#allocation22]  }
 0x190   : > { %s4767_s21 = scalar_lea.hbm %s6274_s13, 16 }
 0x191   : > { %p4768_p2 = scmp.ne.s32.totalorder %s6274_s13, %s4767_s21  ;;  %p4774_p1 = scmp.lt.u32.totalorder %s4767_s21, %s6274_s13 }
 0x193   : > { %p4770_p13 = pnand %p4768_p2, %p5164_p7 }
 0x195   : > { %p4771_p0 = pneg %p4770_p13 }
 0x197   : > { %p4776_p4 = pnand %p4774_p1, %p4771_p0 }
 0x199   : > { %4779 = shalt.err (!%p4776_p4)
}
 0x19a   : > { %s4780_s7 = scalar_lea.vmem %s5458_s1, 16  ;;  %s4787_s24 = scalar_lea.vmem %s5458_s1, 32 }
 0x19b   : > { %p4781_p6 = scmp.ne.s32.totalorder %s5458_s1, %s4780_s7  ;;  %p4788_p10 = scmp.lt.s32.totalorder %s5458_s1, %s5458_s1 }
 0x19c   : > { %p4789_p11 = scmp.lt.s32.totalorder %s4787_s24, %s4780_s7 }
 0x19d   : > { %p4783_p8 = pnand %p4781_p6, %p5164_p7 }
 0x19e   : > { %p4790_p12 = por %p4789_p11, %p4788_p10 }
 0x19f   : > { %p4784_p9 = pneg %p4783_p8 }
 0x1a1   : > { %p4791_p3 = pnand %p4790_p12, %p4784_p9 }
 0x1a3   : > { %4794 = shalt.err (!%p4791_p3)
}
 0x1a4   : > { %4212 = dma.hbm_to_vmem [thread:$0]  (!%p5148_p5), %s6274_s13, 16, %s5458_s1, [#allocation25]  }
 0x1a5   : > { %s4992_s22 = smov [#allocation29]   ;;  %s4993_s2 = smov [#allocation32]  }
 0x1a6   : > { %s726_s5 = sshll.u32 %s4992_s22, 4  ;;  %s750_s21 = sshll.u32 %s4993_s2, 4  ;;  %s727_s5 = int_to_ptr.vmem [resolvable:$true] %s726_s5  ;;  %s5502_s21 = int_to_ptr.vmem [resolvable:$true] %s750_s21 }
 0x1a7   : > { %s4795_s12 = scalar_lea.hbm %s6276_s15, 16 }
 0x1a8   : > { %p4796_p2 = scmp.ne.s32.totalorder %s6276_s15, %s4795_s12  ;;  %p4802_p1 = scmp.lt.u32.totalorder %s4795_s12, %s6276_s15 }
 0x1aa   : > { %p4798_p13 = pnand %p4796_p2, %p5164_p7 }
 0x1ac   : > { %p4799_p0 = pneg %p4798_p13 }
 0x1ae   : > { %p4804_p4 = pnand %p4802_p1, %p4799_p0 }
 0x1b0   : > { %4807 = shalt.err (!%p4804_p4)
}
 0x1b1   : > { %s4808_s20 = scalar_lea.vmem %s727_s5, 16  ;;  %s4815_s9 = scalar_lea.vmem %s727_s5, 32 }
 0x1b2   : > { %p4809_p6 = scmp.ne.s32.totalorder %s727_s5, %s4808_s20  ;;  %p4816_p10 = scmp.lt.s32.totalorder %s727_s5, %s727_s5 }
 0x1b3   : > { %p4817_p11 = scmp.lt.s32.totalorder %s4815_s9, %s4808_s20 }
 0x1b4   : > { %p4811_p8 = pnand %p4809_p6, %p5164_p7 }
 0x1b5   : > { %p4818_p12 = por %p4817_p11, %p4816_p10 }
 0x1b6   : > { %p4812_p9 = pneg %p4811_p8 }
 0x1b8   : > { %p4819_p3 = pnand %p4818_p12, %p4812_p9 }
 0x1ba   : > { %4822 = shalt.err (!%p4819_p3)
}
 0x1bb   : > { %4218 = dma.hbm_to_vmem [thread:$0]  (!%p5148_p5), %s6276_s15, 16, %s727_s5, [#allocation28]  }
 0x1bc   : > { %s4823_s12 = scalar_lea.hbm %s6279_s18, 4096 }
 0x1bd   : > { %p4824_p2 = scmp.ne.s32.totalorder %s6279_s18, %s4823_s12  ;;  %p4830_p1 = scmp.lt.u32.totalorder %s4823_s12, %s6279_s18 }
 0x1bf   : > { %p4826_p13 = pnand %p4824_p2, %p5164_p7 }
 0x1c1   : > { %p4827_p0 = pneg %p4826_p13 }
 0x1c3   : > { %p4832_p4 = pnand %p4830_p1, %p4827_p0 }
 0x1c5   : > { %4835 = shalt.err (!%p4832_p4)
}
 0x1c6   : > { %s4836_s5 = scalar_lea.vmem %s5502_s21, 4096  ;;  %p4844_p10 = scmp.lt.s32.totalorder %s5502_s21, %s5502_s21 }
 0x1c7   : > { %p4837_p6 = scmp.ne.s32.totalorder %s5502_s21, %s4836_s5  ;;  %p4845_p11 = scmp.lt.s32.totalorder %s4836_s5, %s4836_s5 }
 0x1c9   : > { %p4839_p8 = pnand %p4837_p6, %p5164_p7  ;;  %p4846_p12 = por %p4845_p11, %p4844_p10 }
 0x1cb   : > { %p4840_p9 = pneg %p4839_p8 }
 0x1cd   : > { %p4847_p3 = pnand %p4846_p12, %p4840_p9 }
 0x1cf   : > { %4850 = shalt.err (!%p4847_p3)
}
 0x1d0   : > { %4224 = dma.hbm_to_vmem [thread:$0]  (!%p5148_p5), %s6279_s18, 4096, %s5502_s21, [#allocation31], %s6330_s29, %s6330_s29, %s6329_s4  }
 0x1d1   : > { %s4994_s22 = smov [#allocation33]   ;;  %s4851_s12 = scalar_lea.hbm %s6280_s19, 16 }
 0x1d2   : > { %s764_s2 = sshll.u32 %s4994_s22, 4  ;;  %p4852_p2 = scmp.ne.s32.totalorder %s6280_s19, %s4851_s12  ;;  %s765_s2 = int_to_ptr.vmem [resolvable:$true] %s764_s2 }
 0x1d3   : > { %p4858_p1 = scmp.lt.u32.totalorder %s4851_s12, %s6280_s19 }
 0x1d4   : > { %p4854_p13 = pnand %p4852_p2, %p5164_p7 }
 0x1d6   : > { %p4855_p0 = pneg %p4854_p13 }
 0x1d8   : > { %p4860_p4 = pnand %p4858_p1, %p4855_p0 }
 0x1da   : > { %4863 = shalt.err (!%p4860_p4)
}
 0x1db   : > { %s4864_s4 = scalar_lea.vmem %s765_s2, 16  ;;  %s4871_s29 = scalar_lea.vmem %s765_s2, 32 }
 0x1dc   : > { %p4865_p6 = scmp.ne.s32.totalorder %s765_s2, %s4864_s4  ;;  %p4872_p10 = scmp.lt.s32.totalorder %s765_s2, %s765_s2 }
 0x1dd   : > { %p4873_p11 = scmp.lt.s32.totalorder %s4871_s29, %s4864_s4 }
 0x1de   : > { %p4867_p8 = pnand %p4865_p6, %p5164_p7 }
 0x1df   : > { %p4874_p12 = por %p4873_p11, %p4872_p10 }
 0x1e0   : > { %p4868_p9 = pneg %p4867_p8 }
 0x1e2   : > { %p4875_p3 = pnand %p4874_p12, %p4868_p9 }
 0x1e4   : > { %4878 = shalt.err (!%p4875_p3)
}
 0x1e5   : > { %4227 = dma.hbm_to_vmem [thread:$0]  (!%p5148_p5), %s6280_s19, 16, %s765_s2, [#allocation34]  }
 0x1e6   : > { %s6337_s20 = sld [smem:[#allocation50_spill]] }
 0x1ec   : > { %p6338_p2 = scmp.ne.s32.totalorder %s6337_s20, 0 }
 0x1ed   : > { %s6339_s9 = sld [smem:[#allocation49_spill]] (!%p6338_p2) }
 0x1ee   : > { %777 = sbr.rel (%p6338_p2) target bundleno = 3322 (0xcfa), region = 100 }
 0x1f3   : > { %p6340_p13 = scmp.ne.s32.totalorder (!%p6338_p2), %s6339_s9, 0 }
 0x1f5   : > { %4918 = dma.done.wait (%p6340_p13), [#allocation7], 1024  }
 0x1f6   : > { %4920 = vsyncadd (%p6340_p13), [#allocation7], 4294966272 }
 0x1f7   : > { %4922 = dma.done.wait (%p6340_p13), [#allocation10], 2304  }
 0x1f8   : > { %4924 = vsyncadd (%p6340_p13), [#allocation10], 4294964992 }
 0x1f9   : > { %4926 = dma.done.wait (%p6340_p13), [#allocation13], 2064  }
 0x1fa   : > { %4928 = vsyncadd (%p6340_p13), [#allocation13], 4294965232 }
 0x1fb   : > { %4930 = dma.done.wait (%p6340_p13), [#allocation16], 16400  }
 0x1fc   : > { %4932 = vsyncadd (%p6340_p13), [#allocation16], 4294950896 }
 0x1fd   : > { %4934 = dma.done.wait (%p6340_p13), [#allocation19], 4160  }
 0x1fe   : > { %4936 = vsyncadd (%p6340_p13), [#allocation19], 4294963136 }
 0x1ff   : > { %4938 = dma.done.wait (%p6340_p13), [#allocation22], 32  }
 0x200   : > { %4940 = vsyncadd (%p6340_p13), [#allocation22], 4294967264 }
 0x201   : > { %4942 = dma.done.wait (%p6340_p13), [#allocation25], 2064  }
 0x202   : > { %4944 = vsyncadd (%p6340_p13), [#allocation25], 4294965232 }
 0x203   : > { %4946 = dma.done.wait (%p6340_p13), [#allocation28], 4112  }
 0x204   : > { %4948 = vsyncadd (%p6340_p13), [#allocation28], 4294963184 }
 0x205   : > { %4950 = dma.done.wait (%p6340_p13), [#allocation31], 4112  }
 0x206   : > { %4952 = vsyncadd (%p6340_p13), [#allocation31], 4294963184 }
 0x207   : > { %4954 = dma.done.wait (%p6340_p13), [#allocation34], 16  }
 0x208   : > { %4956 = vsyncadd (%p6340_p13), [#allocation34], 4294967280  ;;  %s6341_s11 = sld [smem:[#allocation47_spill]] }
 0x20e   : > { %p3482_p5 = scmp.ne.s32.totalorder %s6341_s11, 0 }
 0x20f   : > { %v3483_v0 = vld [vmem:[#allocation14] ss:$0 sm:$0xff] (!%p3482_p5)  ;;  %v3484_v1 = vld [vmem:[#allocation15] ss:$0 sm:$0xff] (!%p3482_p5) }
 0x210   : > { %899 = sbr.rel (%p3482_p5) target bundleno = 535 (0x217), region = 176  ;;  %907 = vst [vmem:[#allocation2] sm:$0xff] (!%p3482_p5), %v3483_v0  ;;  %915 = vst [vmem:[#allocation3] sm:$0xff] (!%p3482_p5), %v3484_v1 }
 0x217 PF: > { %s6342_s30 = sld [smem:[#allocation47_spill]]  ;;  %v995_v2 = vld [vmem:[#allocation9 + $0x8] sm:$0xff]  ;;  %v6303_v3 = vmov 0.0|0.0   ;;  %v1088_v4 = vld [vmem:[#allocation20 + $0x80] sm:$0xff]  ;;  %v1089_v5 = vld [vmem:[#allocation20 + $0x88] sm:$0xff]  ;;  %vm4996_vm0 = vmmov 0  }
 0x218   : > { %1066 = vmatprep.mubr.f32.mxu0 %v995_v2  ;;  %3929 = vmatprep.subr.bf16.mxu1 %v6303_v3  ;;  %v3930_v9 = vpack.c.bf16 %v1089_v5, %v1088_v4  ;;  %v1090_v32 = vld [vmem:[#allocation20 + $0x90] sm:$0xff]  ;;  %v1091_v33 = vld [vmem:[#allocation20 + $0x98] sm:$0xff]  ;;  %v1092_v36 = vld [vmem:[#allocation20 + $0xa0] sm:$0xff]  ;;  %s1374_s27 = sld [smem:[#allocation4]]  ;;  %vm1426_vm1 = vcmask 1041409   ;;  %vm1428_vm2 = vcmask 1042434  }
 0x219   : > { %v3933_v35 = vpack.c.bf16 %v1091_v33, %v1090_v32  ;;  %v1093_v40 = vld [vmem:[#allocation20 + $0xa8] sm:$0xff]  ;;  %v1094_v44 = vld [vmem:[#allocation20 + $0xb0] sm:$0xff]  ;;  %v1095_v45 = vld [vmem:[#allocation20 + $0xb8] sm:$0xff]  ;;  %vm1430_vm3 = vcmask 1043459   ;;  %vm1432_vm4 = vcmask 1044484   ;;  %vm1434_vm5 = vcmask 1045509  }
 0x21a   : > { %3931 = vmatpush3.bf16.msra.mxu1 %v3930_v9  ;;  %v3936_v43 = vpack.c.bf16 %v1093_v40, %v1092_v36  ;;  %v3939_v52 = vpack.c.bf16 %v1095_v45, %v1094_v44  ;;  %v1096_v53 = vld [vmem:[#allocation20 + $0xc0] sm:$0xff]  ;;  %v1097_v54 = vld [vmem:[#allocation20 + $0xc8] sm:$0xff]  ;;  %v1098_v62 = vld [vmem:[#allocation20 + $0xd0] sm:$0xff]  ;;  %vm1436_vm6 = vcmask 1046534   ;;  %vm1438_vm7 = vcmask 1047559   ;;  %s2075_s12 = sld [smem:[#allocation5]] }
 0x21b   : > { %3932 = vmatprep.subr.bf16.mxu1 %v6303_v3  ;;  %v3942_v61 = vpack.c.bf16 %v1097_v54, %v1096_v53  ;;  %v1099_v63 = vld [vmem:[#allocation20 + $0xd8] sm:$0xff]  ;;  %v1072_v9 = vld [vmem:[#allocation20] sm:$0xff]  ;;  %v1086_v32 = vld [vmem:[#allocation20 + $0x70] sm:$0xff]  ;;  %vm1441_vm8 = vcmask 64512   ;;  %vm2469_vm9 = vcmask 130112   ;;  %vm2542_vm10 = vcmask 130048  }
 0x21c   : > { %v3945_v5 = vpack.c.bf16 %v1099_v63, %v1098_v62  ;;  %v1087_v33 = vld [vmem:[#allocation20 + $0x78] sm:$0xff]  ;;  %v3487_v53 = vld [vmem:[#allocation21] ss:$0 sm:$0xff] }
 0x21d   : > { %s3485_s22 = sshll.u32 %s6342_s30, 8  ;;  %v1103_v36 = vld [vmem:[#allocation20 + $0xf8] sm:$0xff]  ;;  %s992_s17 = scalar_lea.vmem [#allocation18], %s6342_s30 }
 0x21e   : > { %s5611_s2 = scalar_lea.vmem [#allocation17], %s3485_s22  ;;  %3934 = vmatpush3.bf16.msra.mxu1 %v3933_v35  ;;  %v1102_v35 = vld [vmem:[#allocation20 + $0xf0] sm:$0xff]  ;;  %p3493_p7 = scmp.ne.s32.totalorder %s6342_s30, 3 }
 0x21f   : > { %v976_v6 = vld [vmem:[%s5611_s2 + $0x80] sm:$0xff]  ;;  %v977_v7 = vld [vmem:[%s5611_s2 + $0x88] sm:$0xff]  ;;  %v978_v12 = vld [vmem:[%s5611_s2 + $0x90] sm:$0xff]  ;;  %3935 = vmatprep.subr.bf16.mxu1 %v6303_v3 }
 0x220   : > { %v960_v8 = vld [vmem:[%s5611_s2] sm:$0xff]  ;;  %v3897_v10 = vpack.c.bf16 %v977_v7, %v976_v6  ;;  %v961_v11 = vld [vmem:[%s5611_s2 + $0x8] sm:$0xff]  ;;  %v979_v13 = vld [vmem:[%s5611_s2 + $0x98] sm:$0xff] }
 0x221   : > { %v3899_v14 = vpack.c.bf16 %v961_v11, %v960_v8  ;;  %v3901_v15 = vpack.c.bf16 %v979_v13, %v978_v12  ;;  %v962_v16 = vld [vmem:[%s5611_s2 + $0x10] sm:$0xff]  ;;  %v963_v17 = vld [vmem:[%s5611_s2 + $0x18] sm:$0xff]  ;;  %v980_v18 = vld [vmem:[%s5611_s2 + $0xa0] sm:$0xff] }
 0x222   : > { %3898 = vmatprep.subr.bf16.mxu0 %v3897_v10  ;;  %v981_v19 = vld [vmem:[%s5611_s2 + $0xa8] sm:$0xff]  ;;  %v3903_v20 = vpack.c.bf16 %v963_v17, %v962_v16  ;;  %v964_v22 = vld [vmem:[%s5611_s2 + $0x20] sm:$0xff]  ;;  %v982_v24 = vld [vmem:[%s5611_s2 + $0xb0] sm:$0xff]  ;;  %3937 = vmatpush3.bf16.msra.mxu1 %v3936_v43 }
 0x223   : > { %3900 = vmatpush3.bf16.msra.mxu0 %v3899_v14  ;;  %v3905_v21 = vpack.c.bf16 %v981_v19, %v980_v18  ;;  %v965_v23 = vld [vmem:[%s5611_s2 + $0x28] sm:$0xff]  ;;  %v983_v25 = vld [vmem:[%s5611_s2 + $0xb8] sm:$0xff]  ;;  %v966_v28 = vld [vmem:[%s5611_s2 + $0x30] sm:$0xff]  ;;  %3938 = vmatprep.subr.bf16.mxu1 %v6303_v3 }
 0x224   : > { %3902 = vmatprep.subr.bf16.mxu0 %v3901_v15  ;;  %v3907_v26 = vpack.c.bf16 %v965_v23, %v964_v22  ;;  %v3909_v27 = vpack.c.bf16 %v983_v25, %v982_v24  ;;  %v967_v29 = vld [vmem:[%s5611_s2 + $0x38] sm:$0xff]  ;;  %v984_v30 = vld [vmem:[%s5611_s2 + $0xc0] sm:$0xff]  ;;  %v985_v31 = vld [vmem:[%s5611_s2 + $0xc8] sm:$0xff] }
 0x225   : > { %v3911_v34 = vpack.c.bf16 %v967_v29, %v966_v28  ;;  %v3913_v37 = vpack.c.bf16 %v985_v31, %v984_v30  ;;  %v968_v38 = vld [vmem:[%s5611_s2 + $0x40] sm:$0xff]  ;;  %v969_v39 = vld [vmem:[%s5611_s2 + $0x48] sm:$0xff]  ;;  %v986_v41 = vld [vmem:[%s5611_s2 + $0xd0] sm:$0xff] }
 0x226   : > { %v987_v42 = vld [vmem:[%s5611_s2 + $0xd8] sm:$0xff]  ;;  %v3915_v46 = vpack.c.bf16 %v969_v39, %v968_v38  ;;  %v970_v48 = vld [vmem:[%s5611_s2 + $0x50] sm:$0xff]  ;;  %v988_v50 = vld [vmem:[%s5611_s2 + $0xe0] sm:$0xff]  ;;  %3940 = vmatpush3.bf16.msra.mxu1 %v3939_v52  ;;  %v4997_v38 = vmov 0.0  }
 0x227   : > { %3904 = vmatpush3.bf16.msra.mxu0 %v3903_v20  ;;  %v3917_v47 = vpack.c.bf16 %v987_v42, %v986_v41  ;;  %v971_v49 = vld [vmem:[%s5611_s2 + $0x58] sm:$0xff]  ;;  %v989_v51 = vld [vmem:[%s5611_s2 + $0xe8] sm:$0xff]  ;;  %v972_v57 = vld [vmem:[%s5611_s2 + $0x60] sm:$0xff]  ;;  %3941 = vmatprep.subr.bf16.mxu1 %v6303_v3 }
 0x228   : > { %3906 = vmatprep.subr.bf16.mxu0 %v3905_v21  ;;  %v3919_v55 = vpack.c.bf16 %v971_v49, %v970_v48  ;;  %v3921_v56 = vpack.c.bf16 %v989_v51, %v988_v50  ;;  %v973_v58 = vld [vmem:[%s5611_s2 + $0x68] sm:$0xff]  ;;  %v990_v59 = vld [vmem:[%s5611_s2 + $0xf0] sm:$0xff]  ;;  %v991_v60 = vld [vmem:[%s5611_s2 + $0xf8] sm:$0xff]  ;;  %3684 = vmatprep.mubr.msk.f32.mxu1 %vm4996_vm0, %v4997_v38  ;;  %v1265_v49 = vlaneseq }
 0x229   : > { %v3923_v0 = vpack.c.bf16 %v973_v58, %v972_v57  ;;  %v3925_v1 = vpack.c.bf16 %v991_v60, %v990_v59  ;;  %v974_v2 = vld [vmem:[%s5611_s2 + $0x70] sm:$0xff]  ;;  %v975_v4 = vld [vmem:[%s5611_s2 + $0x78] sm:$0xff]  ;;  %v1100_v6 = vld [vmem:[#allocation20 + $0xe0] sm:$0xff] }
 0x22a   : > { %3943 = vmatpush3.bf16.msra.mxu1 %v3942_v61  ;;  %v1101_v7 = vld [vmem:[#allocation20 + $0xe8] sm:$0xff]  ;;  %v3927_v8 = vpack.c.bf16 %v975_v4, %v974_v2  ;;  %v1074_v14 = vld [vmem:[#allocation20 + $0x10] sm:$0xff]  ;;  %v1075_v15 = vld [vmem:[#allocation20 + $0x18] sm:$0xff]  ;;  %v5671_v51 = vshrl.u32 %v1265_v49, 7 }
 0x22b   : > { %3908 = vmatpush3.bf16.msra.mxu0 %v3907_v26  ;;  %3944 = vmatprep.subr.bf16.mxu1 %v6303_v3  ;;  %v1073_v10 = vld [vmem:[#allocation20 + $0x8] sm:$0xff]  ;;  %v3948_v11 = vpack.c.bf16 %v1101_v7, %v1100_v6  ;;  %v3957_v16 = vpack.c.bf16 %v1075_v15, %v1074_v14  ;;  %v1076_v17 = vld [vmem:[#allocation20 + $0x20] sm:$0xff]  ;;  %v1078_v20 = vld [vmem:[#allocation20 + $0x30] sm:$0xff] }
 0x22c   : > { %3910 = vmatprep.subr.bf16.mxu0 %v3909_v27  ;;  %v994_v12 = vld [vmem:[#allocation9] sm:$0xff]  ;;  %v3954_v13 = vpack.c.bf16 %v1073_v10, %v1072_v9  ;;  %v1079_v21 = vld [vmem:[#allocation20 + $0x38] sm:$0xff]  ;;  %v1080_v23 = vld [vmem:[#allocation20 + $0x40] sm:$0xff]  ;;  %v5678_v62 = vsub.s32 0, %v5671_v51 }
 0x22d   : > { %v1077_v18 = vld [vmem:[#allocation20 + $0x28] sm:$0xff]  ;;  %v3963_v22 = vpack.c.bf16 %v1079_v21, %v1078_v20  ;;  %v1082_v26 = vld [vmem:[#allocation20 + $0x50] sm:$0xff]  ;;  %v1083_v27 = vld [vmem:[#allocation20 + $0x58] sm:$0xff] }
 0x22e   : > { %3946 = vmatpush3.bf16.msra.mxu1 %v3945_v5  ;;  %v3960_v19 = vpack.c.bf16 %v1077_v18, %v1076_v17  ;;  %v1081_v24 = vld [vmem:[#allocation20 + $0x48] sm:$0xff]  ;;  %v3969_v28 = vpack.c.bf16 %v1083_v27, %v1082_v26  ;;  %v1084_v29 = vld [vmem:[#allocation20 + $0x60] sm:$0xff]  ;;  %v916_v39 = vld [vmem:[#allocation2] sm:$0xff] }
 0x22f   : > { %3912 = vmatpush3.bf16.msra.mxu0 %v3911_v34  ;;  %3947 = vmatprep.subr.bf16.mxu1 %v6303_v3  ;;  %v3966_v25 = vpack.c.bf16 %v1081_v24, %v1080_v23  ;;  %v1085_v30 = vld [vmem:[#allocation20 + $0x68] sm:$0xff]  ;;  %v3975_v34 = vpack.c.bf16 %v1087_v33, %v1086_v32  ;;  %v3486_v41 = vld [vmem:[%s992_s17] ss:$0 sm:$0xff]  ;;  %v5692_v14 = vld [vmem:[#allocation6 + $0x8] sm:$0xff] }
 0x230   : > { %3914 = vmatprep.subr.bf16.mxu0 %v3913_v37  ;;  %v3972_v31 = vpack.c.bf16 %v1085_v30, %v1084_v29  ;;  %v3951_v37 = vpack.c.bf16 %v1103_v36, %v1102_v35  ;;  %v5682_v2 = vld [vmem:[#allocation6] sm:$0xff]  ;;  %v5686_v7 = vld [vmem:[#allocation6 + $0x10] sm:$0xff]  ;;  %v5697_v18 = vld [vmem:[#allocation6 + $0x18] sm:$0xff]  ;;  %v5717_v35 = vand.u32 127, %v1265_v49  ;;  %v1375_v36 = vstv %s1374_s27 }
 0x231   : > { %v5705_v26 = vld [vmem:[#allocation6 + $0x28] sm:$0xff]  ;;  %v5709_v29 = vld [vmem:[#allocation6 + $0x30] sm:$0xff]  ;;  %v5713_v32 = vld [vmem:[#allocation6 + $0x38] sm:$0xff] }
 0x232   : > { %3949 = vmatpush3.bf16.msra.mxu1 %v3948_v11 }
 0x233   : > { %3916 = vmatpush3.bf16.msra.mxu0 %v3915_v46  ;;  %3950 = vmatprep.subr.bf16.mxu1 %v6303_v3 }
 0x234   : > { %3918 = vmatprep.subr.bf16.mxu0 %v3917_v47  ;;  %v4998_v47 = vmov 1966171168  }
 0x235   : > { %v1263_v48 = vunpack.c.l.s4 %v4998_v47 }
 0x236   : > { %3952 = vmatpush3.bf16.msra.mxu1 %v3951_v37 }
 0x237   : > { %3920 = vmatpush3.bf16.msra.mxu0 %v3919_v55  ;;  %3977 = vmatprep.subr.bf16.mxu1 %v6303_v3  ;;  %v1264_v50 = vunpack.c.0.s8 %v1263_v48 }
 0x238   : > { %3922 = vmatprep.subr.bf16.mxu0 %v3921_v56  ;;  %v3488_v56 = vld [vmem:[#allocation23] ss:$0 sm:$0xff] }
 0x239   : > { %v5674_v58 = vsub.s32 %v1264_v50, %v5671_v51 }
 0x23b   : > { %3924 = vmatpush3.bf16.msra.mxu0 %v3923_v0 }
 0x23c   : > { %3926 = vmatprep.subr.bf16.mxu0 %v3925_v1 }
 0x23f   : > { %3928 = vmatpush3.bf16.msra.mxu0 %v3927_v8 }
 0x240   : > { %3953 = vmatprep.subr.bf16.mxu0 %v6303_v3 }
 0x242   : > { %1067 = vmatmul.mubr.f32.vlgmr.msra.gmra.mrb[0].mxu0 %v994_v12 }
 0x243   : > { %3955 = vmatpush3.bf16.msra.mxu0 %v3954_v13  ;;  %3719 = vmatprep.mubr.msk.f32.mxu0 %vm4996_vm0, %v4997_v38 }
 0x244   : > { %3956 = vmatprep.subr.bf16.mxu0 %v6303_v3 }
 0x247   : > { %3958 = vmatpush3.bf16.msra.mxu0 %v3957_v16 }
 0x248   : > { %3959 = vmatprep.subr.bf16.mxu0 %v6303_v3 }
 0x24b   : > { %3961 = vmatpush3.bf16.msra.mxu0 %v3960_v19 }
 0x24c   : > { %3962 = vmatprep.subr.bf16.mxu0 %v6303_v3 }
 0x24f   : > { %3964 = vmatpush3.bf16.msra.mxu0 %v3963_v22  ;;  %v5701_v22 = vld [vmem:[#allocation6 + $0x20] sm:$0xff] }
 0x250   : > { %3965 = vmatprep.subr.bf16.mxu0 %v6303_v3 }
 0x253   : > { %3967 = vmatpush3.bf16.msra.mxu0 %v3966_v25 }
 0x254   : > { %3968 = vmatprep.subr.bf16.mxu0 %v6303_v3 }
 0x257   : > { %3970 = vmatpush3.bf16.msra.mxu0 %v3969_v28 }
 0x258   : > { %3971 = vmatprep.subr.bf16.mxu0 %v6303_v3 }
 0x25b   : > { %3973 = vmatpush3.bf16.msra.mxu0 %v3972_v31 }
 0x25c   : > { %3974 = vmatprep.subr.bf16.mxu0 %v6303_v3 }
 0x25f   : > { %3976 = vmatpush3.bf16.msra.mxu0 %v3975_v34 }
 0x260   : > { %4001 = vmatprep.subr.bf16.mxu0 %v6303_v3 }
 0x262   : > { %3720 = vmatmul.mubr.f32.vlgmr.msra.gmra.mrb[2].mxu0 %v916_v39 }
 0x263   : > { %3789 = vmatprep.mubr.msk.f32.mxu0 %vm4996_vm0, %v4997_v38 }
 0x315   : > { %v3530_v40 = vpop.f32.mrb[0].mxu0 }
 0x316   : > { %v3531_v42 = vpop.f32.mrb[1].mxu0 }
 0x317   : > { %v3532_v43 = vadd.f32 %v3531_v42, %v3530_v40  ;;  %v5721_v40 = vsub.s32 %v5717_v35, %v5671_v51 }
 0x319   : > { %v1069_v44 = vadd.f32 %v3532_v43, %v3486_v41 }
 0x31b   : > { %3685 = vmatmul.mubr.f32.vlgmr.msra.gmra.mrb[0].mxu1 %v1069_v44 }
 0x31c   : > { %3754 = vmatprep.mubr.msk.f32.mxu1 %vm4996_vm0, %v4997_v38 }
 0x335   : > { %v1240_v45 = vpop.f32.mrb[2].mxu0 }
 0x336   : > { %v3721_v46 = vpop.f32.mrb[3].mxu0 }
 0x3ee   : > { %v1170_v52 = vpop.f32.mrb[0].mxu1 }
 0x3ef   : > { %v1241_v54 = vadd.f32 %v1240_v45, %v1170_v52  ;;  %v3686_v55 = vpop.f32.mrb[1].mxu1 }
 0x3f1   : > { %v1251_v57 = vadd.f32 %v3487_v53, %v1241_v54 }
 0x3f3   : > { %v1259_v59 = vmul.f32 %v3488_v56, %v1251_v57 }
 0x3f5   : > { %v1261_v60 = vcombine.high %v1259_v59, %v1259_v59  ;;  %v1268_v61 = vrot.slane %v1259_v59, %v5674_v58 }
 0x3f7   : > { %v1284_v63 = vrot.slane %v1268_v61, %v5674_v58  ;;  %v1276_v0 = vcombine.high %v1268_v61, %v1268_v61  ;;  %v1275_v1 = vrot.slane %v1261_v60, %v5674_v58 }
 0x3f9   : > { %v1313_v4 = vrot.slane %v1284_v63, %v5678_v62  ;;  %v1306_v5 = vcombine.high %v1284_v63, %v1284_v63  ;;  %v1298_v6 = vrot.slane %v1276_v0, %v5674_v58  ;;  %v1291_v8 = vrot.slane %v1275_v1, %v5674_v58 }
 0x3fa   : > { %v1277_v9 = vcombine.high %v1275_v1, %v1275_v1 }
 0x3fb   : > { %v1350_v10 = vmul.f32 %v1313_v4, %v5682_v2  ;;  %v1321_v11 = vrot.slane %v1306_v5, %v5678_v62  ;;  %v1317_v12 = vrot.slane %v1298_v6, %v5678_v62  ;;  %v1308_v13 = vcombine.high %v1298_v6, %v1298_v6 }
 0x3fc   : > { %v1305_v17 = vrot.slane %v1277_v9, %v5674_v58  ;;  %v1329_v20 = vrot.slane %v1291_v8, %v5678_v62  ;;  %v1307_v21 = vcombine.high %v1291_v8, %v1291_v8 }
 0x3fd   : > { %1358 = vadd.xlane.f32.xlu0 %v1350_v10  ;;  %v1352_v15 = vmul.f32 %v1321_v11, %v5686_v7  ;;  %v1325_v16 = vrot.slane %v1308_v13, %v5678_v62  ;;  %v1351_v19 = vmul.f32 %v1317_v12, %v5692_v14  ;;  %v4999_v13 = vmov 0  }
 0x3fe   : > { %v1333_v24 = vrot.slane %v1305_v17, %v5678_v62  ;;  %v1309_v25 = vcombine.high %v1305_v17, %v1305_v17  ;;  %v1354_v27 = vmul.f32 %v1329_v20, %v5701_v22  ;;  %v1337_v28 = vrot.slane %v1307_v21, %v5678_v62  ;;  %4319 = vset.pattern.permute.xlu0 %v4999_v13 }
 0x3ff   : > { %1362 = vadd.xlane.f32.xlu1 %v1352_v15  ;;  %v1353_v23 = vmul.f32 %v1325_v16, %v5697_v18  ;;  %v5740_v15 = vsub.s32 1, %v5671_v51  ;;  %v5743_v16 = vsub.s32 2, %v5671_v51  ;;  %v5746_v17 = vsub.s32 3, %v5671_v51 }
 0x400   : > { %v1355_v30 = vmul.f32 %v1333_v24, %v5705_v26  ;;  %v1341_v31 = vrot.slane %v1309_v25, %v5678_v62  ;;  %v1356_v33 = vmul.f32 %v1337_v28, %v5709_v29  ;;  %4318 = vset.pattern.permute.xlu1 %v4999_v13  ;;  %v5752_v24 = vsub.s32 4, %v5671_v51 }
 0x401   : > { %1360 = vadd.xlane.f32.xlu0 %v1351_v19 }
 0x402   : > { %v1357_v34 = vmul.f32 %v1341_v31, %v5713_v32 }
 0x403   : > { %1364 = vadd.xlane.f32.xlu1 %v1353_v23 }
 0x405   : > { %1366 = vadd.xlane.f32.xlu0 %v1354_v27 }
 0x407   : > { %1368 = vadd.xlane.f32.xlu1 %v1355_v30 }
 0x409   : > { %1370 = vadd.xlane.f32.xlu0 %v1356_v33 }
 0x40b   : > { %1372 = vadd.xlane.f32.xlu1 %v1357_v34  ;;  %v5756_v34 = vsub.s32 5, %v5671_v51 }
 0x48a   : > { %v1359_v37 = vpop.xlane.xlu0 %1358 }
 0x48b   : > { %v1376_v41 = vadd.f32 %v1375_v36, %v1359_v37 }
 0x48c   : > { %v1363_v39 = vpop.xlane.xlu1 %1362 }
 0x48d   : > { %v1378_v42 = vadd.f32 %v1375_v36, %v1363_v39  ;;  %v1397_v46 = vrot.slane %v1376_v41, %v5721_v40 }
 0x48e   : > { %v1361_v43 = vpop.xlane.xlu0 %1360 }
 0x48f   : > { %v1377_v44 = vadd.f32 %v1375_v36, %v1361_v43  ;;  %v1405_v49 = vrot.slane %v1378_v42, %v5721_v40  ;;  %v5760_v43 = vsub.s32 6, %v5671_v51 }
 0x490   : > { %v1365_v45 = vpop.xlane.xlu1 %1364 }
 0x491   : > { %v1401_v47 = vrot.slane %v1377_v44, %v5721_v40  ;;  %v1379_v48 = vadd.f32 %v1375_v36, %v1365_v45 }
 0x492   : > { %v1367_v50 = vpop.xlane.xlu0 %1366 }
 0x493   : > { %v1427_v52 = vsel %vm1426_vm1, %v1401_v47, %v1397_v46  ;;  %v1409_v53 = vrot.slane %v1379_v48, %v5721_v40  ;;  %v1380_v54 = vadd.f32 %v1375_v36, %v1367_v50 }
 0x494   : > { %v1429_v55 = vsel %vm1428_vm2, %v1405_v49, %v1427_v52  ;;  %v1369_v56 = vpop.xlane.xlu1 %1368 }
 0x495   : > { %v1431_v57 = vsel %vm1430_vm3, %v1409_v53, %v1429_v55  ;;  %v1413_v59 = vrot.slane %v1380_v54, %v5721_v40  ;;  %v1381_v60 = vadd.f32 %v1375_v36, %v1369_v56 }
 0x496   : > { %v1371_v61 = vpop.xlane.xlu0 %1370 }
 0x497   : > { %v1433_v63 = vsel %vm1432_vm4, %v1413_v59, %v1431_v57  ;;  %v1417_v0 = vrot.slane %v1381_v60, %v5721_v40  ;;  %v1382_v1 = vadd.f32 %v1375_v36, %v1371_v61 }
 0x498   : > { %v1373_v4 = vpop.xlane.xlu1 %1372 }
 0x499   : > { %v1421_v5 = vrot.slane %v1382_v1, %v5721_v40  ;;  %v1383_v6 = vadd.f32 %v1375_v36, %v1373_v4  ;;  %v1435_v8 = vsel %vm1434_vm5, %v1417_v0, %v1433_v63 }
 0x49b   : > { %v1425_v9 = vrot.slane %v1383_v6, %v5721_v40  ;;  %v1437_v10 = vsel %vm1436_vm6, %v1421_v5, %v1435_v8 }
 0x49d   : > { %v1439_v11 = vsel %vm1438_vm7, %v1425_v9, %v1437_v10 }
 0x49e   : > { %v1442_v12 = vsel %vm1441_vm8, %v1439_v11, -inf }
 0x49f   : > { %1443 = vmax.xlane.f32.xlu0 %v1442_v12 }
 0x52c   : > { %v1444_v19 = vpop.xlane.xlu0 %1443 }
 0x52d   : > { %v1449_v20 = vrot.slane %v1444_v19, %v5678_v62  ;;  %v1453_v21 = vrot.slane %v1444_v19, %v5740_v15  ;;  %v1457_v23 = vrot.slane %v1444_v19, %v5743_v16  ;;  %v1461_v25 = vrot.slane %v1444_v19, %v5746_v17 }
 0x52e   : > { %v1465_v36 = vrot.slane %v1444_v19, %v5752_v24  ;;  %v1469_v45 = vrot.slane %v1444_v19, %v5756_v34 }
 0x52f   : > { %v1486_v27 = vsub.f32 %v1376_v41, %v1449_v20  ;;  %v1487_v28 = vsub.f32 %v1377_v44, %v1453_v21  ;;  %v1488_v30 = vsub.f32 %v1378_v42, %v1457_v23  ;;  %v1489_v37 = vsub.f32 %v1379_v48, %v1461_v25 }
 0x530   : > { %v1490_v46 = vsub.f32 %v1380_v54, %v1465_v36  ;;  %v5764_v42 = vsub.s32 7, %v5671_v51  ;;  %v1473_v44 = vrot.slane %v1444_v19, %v5760_v43  ;;  %v1491_v47 = vsub.f32 %v1381_v60, %v1469_v45 }
 0x531   : > { %v1494_v31 = vmul.f32 1.442695, %v1486_v27  ;;  %v1496_v33 = vmul.f32 1.442695, %v1487_v28  ;;  %v1498_v39 = vmul.f32 1.442695, %v1488_v30 }
 0x532   : > { %v1500_v41 = vmul.f32 1.442695, %v1489_v37  ;;  %v1502_v49 = vmul.f32 1.442695, %v1490_v46  ;;  %v1477_v52 = vrot.slane %v1444_v19, %v5764_v42  ;;  %v1492_v53 = vsub.f32 %v1382_v1, %v1473_v44  ;;  %v1732_v44 = vld [vmem:[#allocation24 + $0x8] sm:$0xff] }
 0x533   : > { %4320 = vpow2.f32 %v1494_v31  ;;  %v1504_v54 = vmul.f32 1.442695, %v1491_v47  ;;  %v1733_v47 = vld [vmem:[#allocation24 + $0x10] sm:$0xff] }
 0x534   : > { %4322 = vpow2.f32 %v1496_v33  ;;  %v1493_v56 = vsub.f32 %v1383_v6, %v1477_v52  ;;  %v1506_v57 = vmul.f32 1.442695, %v1492_v53  ;;  %v1734_v52 = vld [vmem:[#allocation24 + $0x18] sm:$0xff] }
 0x535   : > { %4324 = vpow2.f32 %v1498_v39  ;;  %v3981_v53 = vpack.c.bf16 %v1734_v52, %v1733_v47  ;;  %v1840_v47 = vld [vmem:[#allocation27 + $0x8] sm:$0xff] }
 0x536   : > { %4326 = vpow2.f32 %v1500_v41  ;;  %v1508_v60 = vmul.f32 1.442695, %v1493_v56  ;;  %v1731_v41 = vld [vmem:[#allocation24] sm:$0xff]  ;;  %v1736_v56 = vld [vmem:[#allocation24 + $0x28] sm:$0xff] }
 0x537   : > { %4328 = vpow2.f32 %v1502_v49  ;;  %v3978_v49 = vpack.c.bf16 %v1732_v44, %v1731_v41  ;;  %v1839_v44 = vld [vmem:[#allocation27] sm:$0xff]  ;;  %v1950_v52 = vld [vmem:[#allocation27 + $0x88] sm:$0xff] }
 0x538   : > { %4330 = vpow2.f32 %v1504_v54  ;;  %v1735_v54 = vld [vmem:[#allocation24 + $0x20] sm:$0xff] }
 0x539   : > { %4332 = vpow2.f32 %v1506_v57  ;;  %3979 = vmatpush3.bf16.msra.mxu1 %v3978_v49  ;;  %v3984_v57 = vpack.c.bf16 %v1736_v56, %v1735_v54  ;;  %v4002_v49 = vpack.c.bf16 %v1840_v47, %v1839_v44  ;;  %v917_v56 = vld [vmem:[#allocation3] sm:$0xff] }
 0x53a   : > { %4334 = vpow2.f32 %v1508_v60  ;;  %3980 = vmatprep.subr.bf16.mxu1 %v6303_v3  ;;  %v1737_v60 = vld [vmem:[#allocation24 + $0x30] sm:$0xff]  ;;  %v1961_v44 = vld [vmem:[#allocation27 + $0xe0] sm:$0xff] }
 0x53b   : > { %4003 = vmatpush3.bf16.msra.mxu0 %v4002_v49  ;;  %v1853_v49 = vld [vmem:[#allocation27 + $0x70] sm:$0xff] }
 0x53c   : > { %4004 = vmatprep.subr.bf16.mxu0 %v6303_v3 }
 0x53d   : > { %v5767_v48 = vpop.eup %4320  ;;  %3982 = vmatpush3.bf16.msra.mxu1 %v3981_v53 }
 0x53e   : > { %v5769_v50 = vpop.eup %4322  ;;  %1519 = vperm.xlu1 %4318, %v5767_v48   ;;  %3983 = vmatprep.subr.bf16.mxu1 %v6303_v3 }
 0x53f   : > { %1522 = vperm.xlu0 %4319, %v5769_v50   ;;  %v5774_v55 = vpop.eup %4324 }
 0x540   : > { %v5777_v59 = vpop.eup %4326 }
 0x541   : > { %v5780_v61 = vpop.eup %4328  ;;  %3985 = vmatpush3.bf16.msra.mxu1 %v3984_v57 }
 0x542   : > { %1525 = vperm.xlu1 %4318, %v5774_v55   ;;  %v5783_v63 = vpop.eup %4330  ;;  %3986 = vmatprep.subr.bf16.mxu1 %v6303_v3 }
 0x543   : > { %v5786_v0 = vpop.eup %4332 }
 0x544   : > { %v5789_v1 = vpop.eup %4334 }
 0x546   : > { %1528 = vperm.xlu1 %4318, %v5777_v59  }
 0x54a   : > { %1531 = vperm.xlu1 %4318, %v5780_v61  }
 0x54e   : > { %1534 = vperm.xlu1 %4318, %v5783_v63  }
 0x552   : > { %1537 = vperm.xlu1 %4318, %v5786_v0  }
 0x556   : > { %1540 = vperm.xlu1 %4318, %v5789_v1  }
 0x5bd   : > { %v1520_v4 = vpop.permute.xlu1 %1519 }
 0x5be   : > { %v1523_v9 = vpop.permute.xlu0 %1522  ;;  %v1545_v12 = vrot.slane %v1520_v4, %v5721_v40  ;;  %v1738_v4 = vld [vmem:[#allocation24 + $0x38] sm:$0xff] }
 0x5bf   : > { %v1549_v11 = vrot.slane %v1523_v9, %v5721_v40 }
 0x5c1   : > { %v1526_v5 = vpop.permute.xlu1 %1525  ;;  %v1574_v23 = vsel %vm1426_vm1, %v1549_v11, %v1545_v12 }
 0x5c2   : > { %v1553_v13 = vrot.slane %v1526_v5, %v5721_v40  ;;  %v3987_v5 = vpack.c.bf16 %v1738_v4, %v1737_v60  ;;  %v1842_v60 = vld [vmem:[#allocation27 + $0x18] sm:$0xff]  ;;  %v1951_v4 = vld [vmem:[#allocation27 + $0x90] sm:$0xff] }
 0x5c4   : > { %v1575_v27 = vsel %vm1428_vm2, %v1553_v13, %v1574_v23  ;;  %3988 = vmatpush3.bf16.msra.mxu1 %v3987_v5 }
 0x5c5   : > { %v1529_v6 = vpop.permute.xlu1 %1528  ;;  %3989 = vmatprep.subr.bf16.mxu1 %v6303_v3 }
 0x5c6   : > { %v1557_v19 = vrot.slane %v1529_v6, %v5721_v40 }
 0x5c8   : > { %v1576_v30 = vsel %vm1430_vm3, %v1557_v19, %v1575_v27  ;;  %v1739_v19 = vld [vmem:[#allocation24 + $0x40] sm:$0xff]  ;;  %v1742_v27 = vld [vmem:[#allocation24 + $0x58] sm:$0xff] }
 0x5c9   : > { %v1532_v8 = vpop.permute.xlu1 %1531 }
 0x5ca   : > { %v1561_v20 = vrot.slane %v1532_v8, %v5721_v40 }
 0x5cc   : > { %v1577_v31 = vsel %vm1432_vm4, %v1561_v20, %v1576_v30  ;;  %v1740_v20 = vld [vmem:[#allocation24 + $0x48] sm:$0xff] }
 0x5cd   : > { %v1535_v10 = vpop.permute.xlu1 %1534 }
 0x5ce   : > { %v1565_v25 = vrot.slane %v1535_v10, %v5721_v40 }
 0x5d0   : > { %v1578_v37 = vsel %vm1434_vm5, %v1565_v25, %v1577_v31  ;;  %v1743_v31 = vld [vmem:[#allocation24 + $0x60] sm:$0xff] }
 0x5d1   : > { %v1538_v21 = vpop.permute.xlu1 %1537 }
 0x5d2   : > { %v1569_v28 = vrot.slane %v1538_v21, %v5721_v40  ;;  %v3990_v21 = vpack.c.bf16 %v1740_v20, %v1739_v19  ;;  %v1846_v20 = vld [vmem:[#allocation27 + $0x38] sm:$0xff] }
 0x5d4   : > { %v1579_v39 = vsel %vm1436_vm6, %v1569_v28, %v1578_v37  ;;  %3991 = vmatpush3.bf16.msra.mxu1 %v3990_v21  ;;  %v1955_v21 = vld [vmem:[#allocation27 + $0xb0] sm:$0xff] }
 0x5d5   : > { %v1541_v33 = vpop.permute.xlu1 %1540  ;;  %3992 = vmatprep.subr.bf16.mxu1 %v6303_v3 }
 0x5d6   : > { %v1573_v36 = vrot.slane %v1541_v33, %v5721_v40  ;;  %v1744_v33 = vld [vmem:[#allocation24 + $0x68] sm:$0xff] }
 0x5d8   : > { %v1580_v45 = vsel %vm1438_vm7, %v1573_v36, %v1579_v39  ;;  %v1745_v39 = vld [vmem:[#allocation24 + $0x70] sm:$0xff] }
 0x5d9   : > { %v1582_v46 = vsel %vm1441_vm8, %v1580_v45, 0.0  ;;  %v1746_v45 = vld [vmem:[#allocation24 + $0x78] sm:$0xff] }
 0x5da   : > { %1583 = vadd.xlane.f32.xlu1 %v1582_v46 }
 0x667   : > { %v1584_v6 = vpop.xlane.xlu1 %1583 }
 0x668   : > { %4336 = vrcp.f32 %v1584_v6  ;;  %v1952_v6 = vld [vmem:[#allocation27 + $0x98] sm:$0xff] }
 0x672   : > { %v4337_v8 = vpop.eup %4336 }
 0x673   : > { %v1594_v9 = vrot.slane %v4337_v8, %v5740_v15  ;;  %v1598_v11 = vrot.slane %v4337_v8, %v5743_v16  ;;  %v1590_v13 = vrot.slane %v4337_v8, %v5678_v62  ;;  %v1602_v25 = vrot.slane %v4337_v8, %v5746_v17 }
 0x674   : > { %v1610_v37 = vrot.slane %v4337_v8, %v5756_v34  ;;  %v1614_v41 = vrot.slane %v4337_v8, %v5760_v43  ;;  %v1618_v54 = vrot.slane %v4337_v8, %v5764_v42 }
 0x675   : > { %v1628_v10 = vmul.f32 %v5769_v50, %v1594_v9  ;;  %v1629_v12 = vmul.f32 %v5774_v55, %v1598_v11  ;;  %v1627_v23 = vmul.f32 %v5767_v48, %v1590_v13  ;;  %v1741_v50 = vld [vmem:[#allocation24 + $0x50] sm:$0xff]  ;;  %v1630_v30 = vmul.f32 %v5777_v59, %v1602_v25  ;;  %v1953_v11 = vld [vmem:[#allocation27 + $0xa0] sm:$0xff]  ;;  %v1956_v25 = vld [vmem:[#allocation27 + $0xb8] sm:$0xff] }
 0x676   : > { %v3993_v28 = vpack.c.bf16 %v1742_v27, %v1741_v50  ;;  %v1606_v55 = vrot.slane %v4337_v8, %v5752_v24  ;;  %v3996_v48 = vpack.c.bf16 %v1744_v33, %v1743_v31  ;;  %v3999_v59 = vpack.c.bf16 %v1746_v45, %v1745_v39  ;;  %v1843_v8 = vld [vmem:[#allocation27 + $0x20] sm:$0xff]  ;;  %v1954_v13 = vld [vmem:[#allocation27 + $0xa8] sm:$0xff]  ;;  %v1960_v45 = vld [vmem:[#allocation27 + $0xd8] sm:$0xff] }
 0x677   : > { %1642 = vperm.xlu0 %4319, %v1628_v10   ;;  %v1632_v46 = vmul.f32 %v5783_v63, %v1610_v37  ;;  %v1633_v53 = vmul.f32 %v5786_v0, %v1614_v41  ;;  %v1841_v63 = vld [vmem:[#allocation27 + $0x10] sm:$0xff]  ;;  %v1634_v9 = vmul.f32 %v5789_v1, %v1618_v54  ;;  %v4029_v0 = vpack.c.bf16 %v1952_v6, %v1951_v4  ;;  %v1844_v10 = vld [vmem:[#allocation27 + $0x28] sm:$0xff]  ;;  %v1847_v27 = vld [vmem:[#allocation27 + $0x40] sm:$0xff] }
 0x678   : > { %3994 = vmatpush3.bf16.msra.mxu1 %v3993_v28  ;;  %v1631_v36 = vmul.f32 %v5780_v61, %v1606_v55  ;;  %v1949_v61 = vld [vmem:[#allocation27 + $0x80] sm:$0xff]  ;;  %v4005_v5 = vpack.c.bf16 %v1842_v60, %v1841_v63  ;;  %v4032_v19 = vpack.c.bf16 %v1954_v13, %v1953_v11  ;;  %v1845_v1 = vld [vmem:[#allocation27 + $0x30] sm:$0xff]  ;;  %v4035_v50 = vpack.c.bf16 %v1956_v25, %v1955_v21  ;;  %v1848_v28 = vld [vmem:[#allocation27 + $0x48] sm:$0xff] }
 0x679   : > { %3995 = vmatprep.subr.bf16.mxu1 %v6303_v3  ;;  %v4026_v57 = vpack.c.bf16 %v1950_v52, %v1949_v61  ;;  %v4014_v55 = vpack.c.bf16 %v1848_v28, %v1847_v27  ;;  %v1958_v31 = vld [vmem:[#allocation27 + $0xc8] sm:$0xff]  ;;  %v1959_v37 = vld [vmem:[#allocation27 + $0xd0] sm:$0xff]  ;;  %v1854_v52 = vld [vmem:[#allocation27 + $0x78] sm:$0xff] }
 0x67a   : > { %4006 = vmatpush3.bf16.msra.mxu0 %v4005_v5  ;;  %v1852_v41 = vld [vmem:[#allocation27 + $0x68] sm:$0xff]  ;;  %v1963_v54 = vld [vmem:[#allocation27 + $0xf0] sm:$0xff] }
 0x67b   : > { %1647 = vperm.xlu0 %4319, %v1629_v12   ;;  %4007 = vmatprep.subr.bf16.mxu0 %v6303_v3  ;;  %v4008_v12 = vpack.c.bf16 %v1844_v10, %v1843_v8  ;;  %v1962_v61 = vld [vmem:[#allocation27 + $0xe8] sm:$0xff] }
 0x67c   : > { %3997 = vmatpush3.bf16.msra.mxu1 %v3996_v48  ;;  %v1849_v48 = vld [vmem:[#allocation27 + $0x50] sm:$0xff] }
 0x67d   : > { %3998 = vmatprep.subr.bf16.mxu1 %v6303_v3 }
 0x67e   : > { %4009 = vmatpush3.bf16.msra.mxu0 %v4008_v12 }
 0x67f   : > { %1637 = vperm.xlu0 %4319, %v1627_v23   ;;  %4010 = vmatprep.subr.bf16.mxu0 %v6303_v3  ;;  %v4011_v23 = vpack.c.bf16 %v1846_v20, %v1845_v1 }
 0x680   : > { %4000 = vmatpush3.bf16.msra.mxu1 %v3999_v59  ;;  %v4041_v59 = vpack.c.bf16 %v1960_v45, %v1959_v37 }
 0x681   : > { %4025 = vmatprep.subr.bf16.mxu1 %v6303_v3 }
 0x682   : > { %4012 = vmatpush3.bf16.msra.mxu0 %v4011_v23 }
 0x683   : > { %1652 = vperm.xlu0 %4319, %v1630_v30   ;;  %3755 = vmatmul.mubr.f32.vlgmr.msra.gmra.mrb[2].mxu1 %v917_v56  ;;  %v1957_v30 = vld [vmem:[#allocation27 + $0xc0] sm:$0xff]  ;;  %v1964_v56 = vld [vmem:[#allocation27 + $0xf8] sm:$0xff] }
 0x684   : > { %4027 = vmatpush3.bf16.msra.mxu1 %v4026_v57  ;;  %3824 = vmatprep.mubr.msk.f32.mxu1 %vm4996_vm0, %v4997_v38  ;;  %v4038_v33 = vpack.c.bf16 %v1958_v31, %v1957_v30  ;;  %v4023_v57 = vpack.c.bf16 %v1854_v52, %v1853_v49  ;;  %v4047_v63 = vpack.c.bf16 %v1964_v56, %v1963_v54 }
 0x685   : > { %4028 = vmatprep.subr.bf16.mxu1 %v6303_v3  ;;  %4013 = vmatprep.subr.bf16.mxu0 %v6303_v3 }
 0x686   : > { %4015 = vmatpush3.bf16.msra.mxu0 %v4014_v55 }
 0x687   : > { %1657 = vperm.xlu0 %4319, %v1631_v36   ;;  %4016 = vmatprep.subr.bf16.mxu0 %v6303_v3  ;;  %v1850_v36 = vld [vmem:[#allocation27 + $0x58] sm:$0xff] }
 0x688   : > { %4030 = vmatpush3.bf16.msra.mxu1 %v4029_v0  ;;  %v4017_v39 = vpack.c.bf16 %v1850_v36, %v1849_v48 }
 0x689   : > { %4031 = vmatprep.subr.bf16.mxu1 %v6303_v3 }
 0x68a   : > { %4018 = vmatpush3.bf16.msra.mxu0 %v4017_v39 }
 0x68b   : > { %1662 = vperm.xlu0 %4319, %v1632_v46   ;;  %v1851_v46 = vld [vmem:[#allocation27 + $0x60] sm:$0xff]  ;;  %4019 = vmatprep.subr.bf16.mxu0 %v6303_v3 }
 0x68c   : > { %4033 = vmatpush3.bf16.msra.mxu1 %v4032_v19  ;;  %v4020_v47 = vpack.c.bf16 %v1852_v41, %v1851_v46 }
 0x68d   : > { %4034 = vmatprep.subr.bf16.mxu1 %v6303_v3 }
 0x68e   : > { %4021 = vmatpush3.bf16.msra.mxu0 %v4020_v47 }
 0x68f   : > { %1667 = vperm.xlu0 %4319, %v1633_v53   ;;  %v4044_v53 = vpack.c.bf16 %v1962_v61, %v1961_v44  ;;  %4022 = vmatprep.subr.bf16.mxu0 %v6303_v3  ;;  %v3490_v61 = vld [vmem:[#allocation30] ss:$0 sm:$0xff] }
 0x690   : > { %4036 = vmatpush3.bf16.msra.mxu1 %v4035_v50 }
 0x691   : > { %4037 = vmatprep.subr.bf16.mxu1 %v6303_v3 }
 0x692   : > { %4024 = vmatpush3.bf16.msra.mxu0 %v4023_v57 }
 0x693   : > { %1672 = vperm.xlu0 %4319, %v1634_v9   ;;  %4049 = vmatprep.subr.bf16.mxu0 %v6303_v3 }
 0x694   : > { %4039 = vmatpush3.bf16.msra.mxu1 %v4038_v33 }
 0x695   : > { %4040 = vmatprep.subr.bf16.mxu1 %v6303_v3 }
 0x698   : > { %4042 = vmatpush3.bf16.msra.mxu1 %v4041_v59 }
 0x699   : > { %4043 = vmatprep.subr.bf16.mxu1 %v6303_v3 }
 0x69c   : > { %4045 = vmatpush3.bf16.msra.mxu1 %v4044_v53 }
 0x69d   : > { %4046 = vmatprep.subr.bf16.mxu1 %v6303_v3 }
 0x6a0   : > { %4048 = vmatpush3.bf16.msra.mxu1 %v4047_v63 }
 0x6a1   : > { %4073 = vmatprep.subr.bf16.mxu1 %v6303_v3 }
 0x6f6   : > { %v1643_v60 = vpop.permute.xlu0 %1642 }
 0x6f7   : > { %v1676_v4 = vmul.f32 %v1643_v60, %v5692_v14 }
 0x6f9   : > { %v1689_v5 = vrot.slane %v1676_v4, 4 }
 0x6fa   : > { %v1648_v6 = vpop.permute.xlu0 %1647 }
 0x6fb   : > { %v1677_v9 = vmul.f32 %v1648_v6, %v5686_v7  ;;  %v1690_v8 = vadd.f32 %v1689_v5, %v1676_v4  ;;  %v3491_v5 = vld [vmem:[#allocation29] ss:$0 sm:$0xff] }
 0x6fd   : > { %v1695_v0 = vrot.slane %v1677_v9, 4  ;;  %v1691_v19 = vrot.slane %v1690_v8, 2 }
 0x6fe   : > { %v1638_v10 = vpop.permute.xlu0 %1637 }
 0x6ff   : > { %v1675_v11 = vmul.f32 %v1638_v10, %v5682_v2  ;;  %v1696_v12 = vadd.f32 %v1695_v0, %v1677_v9  ;;  %v1692_v50 = vadd.f32 %v1691_v19, %v1690_v8 }
 0x701   : > { %v1683_v13 = vrot.slane %v1675_v11, 4  ;;  %v1697_v23 = vrot.slane %v1696_v12, 2  ;;  %v1693_v55 = vrot.slane %v1692_v50, 1 }
 0x702   : > { %v1653_v1 = vpop.permute.xlu0 %1652 }
 0x703   : > { %v1684_v20 = vadd.f32 %v1683_v13, %v1675_v11  ;;  %v1678_v21 = vmul.f32 %v1653_v1, %v5697_v18  ;;  %v1698_v28 = vadd.f32 %v1697_v23, %v1696_v12  ;;  %v1694_v59 = vadd.f32 %v1693_v55, %v1692_v50 }
 0x705   : > { %v1701_v25 = vrot.slane %v1678_v21, 4  ;;  %v1685_v14 = vrot.slane %v1684_v20, 2  ;;  %v1699_v37 = vrot.slane %v1698_v28, 1  ;;  %v1832_v57 = vmul.f32 %v3490_v61, %v1694_v59 }
 0x706   : > { %v1658_v27 = vpop.permute.xlu0 %1657 }
 0x707   : > { %v1702_v30 = vadd.f32 %v1701_v25, %v1678_v21  ;;  %v1679_v7 = vmul.f32 %v1658_v27, %v5701_v22  ;;  %v1686_v31 = vadd.f32 %v1685_v14, %v1684_v20  ;;  %v1700_v52 = vadd.f32 %v1699_v37, %v1698_v28 }
 0x709   : > { %v1703_v33 = vrot.slane %v1702_v30, 2  ;;  %v1707_v2 = vrot.slane %v1679_v7, 4  ;;  %v1687_v46 = vrot.slane %v1686_v31, 1  ;;  %v1833_v8 = vmul.f32 %v3490_v61, %v1700_v52 }
 0x70a   : > { %v1663_v48 = vpop.permute.xlu0 %1662 }
 0x70b   : > { %v1680_v36 = vmul.f32 %v1663_v48, %v5705_v26  ;;  %v1704_v39 = vadd.f32 %v1703_v33, %v1702_v30  ;;  %v1708_v45 = vadd.f32 %v1707_v2, %v1679_v7  ;;  %v1688_v63 = vadd.f32 %v1687_v46, %v1686_v31 }
 0x70c   : > { %v2044_v25 = vmul.f32 %v3491_v5, %v1833_v8  ;;  %v1863_v7 = vrot.slane %v1832_v57, 7  ;;  %v1865_v33 = vrot.slane %v1833_v8, 6 }
 0x70d   : > { %v1713_v18 = vrot.slane %v1680_v36, 4  ;;  %v1705_v41 = vrot.slane %v1704_v39, 1  ;;  %v1709_v44 = vrot.slane %v1708_v45, 2  ;;  %v1831_v19 = vmul.f32 %v3490_v61, %v1688_v63 }
 0x70e   : > { %v1668_v47 = vpop.permute.xlu0 %1667  ;;  %v3196_v50 = vsel %vm1426_vm1, %v1694_v59, %v1688_v63  ;;  %v2060_v37 = vrot.slane %v2044_v25, 6 }
 0x70f   : > { %v1714_v49 = vadd.f32 %v1713_v18, %v1680_v36  ;;  %v1681_v22 = vmul.f32 %v1668_v47, %v5709_v29  ;;  %v1710_v53 = vadd.f32 %v1709_v44, %v1708_v45  ;;  %v1706_v26 = vadd.f32 %v1705_v41, %v1704_v39 }
 0x710   : > { %v2043_v29 = vmul.f32 %v3491_v5, %v1832_v57  ;;  %v2042_v55 = vmul.f32 %v3491_v5, %v1831_v19  ;;  %v3197_v2 = vsel %vm1428_vm2, %v1700_v52, %v3196_v50  ;;  %v1864_v39 = vsel %vm1426_vm1, %v1863_v7, %v1831_v19 }
 0x711   : > { %v1715_v54 = vrot.slane %v1714_v49, 2  ;;  %v1719_v56 = vrot.slane %v1681_v22, 4  ;;  %v1711_v60 = vrot.slane %v1710_v53, 1  ;;  %v1834_v1 = vmul.f32 %v3490_v61, %v1706_v26 }
 0x712   : > { %v1673_v4 = vpop.permute.xlu0 %1672  ;;  %v3198_v45 = vsel %vm1430_vm3, %v1706_v26, %v3197_v2  ;;  %v1866_v26 = vsel %vm1428_vm2, %v1865_v33, %v1864_v39 }
 0x713   : > { %v1716_v6 = vadd.f32 %v1715_v54, %v1714_v49  ;;  %v1720_v9 = vadd.f32 %v1719_v56, %v1681_v22  ;;  %v1682_v0 = vmul.f32 %v1673_v4, %v5713_v32  ;;  %v1712_v10 = vadd.f32 %v1711_v60, %v1710_v53 }
 0x714   : > { %v2058_v32 = vrot.slane %v2043_v29, 7  ;;  %v2045_v31 = vmul.f32 %v3491_v5, %v1834_v1  ;;  %v1867_v59 = vrot.slane %v1834_v1, 5 }
 0x715   : > { %v1717_v11 = vrot.slane %v1716_v6, 1  ;;  %v1721_v12 = vrot.slane %v1720_v9, 2  ;;  %v1725_v13 = vrot.slane %v1682_v0, 4  ;;  %v1835_v14 = vmul.f32 %v3490_v61, %v1712_v10 }
 0x716   : > { %v2062_v47 = vrot.slane %v2045_v31, 5  ;;  %v3199_v22 = vsel %vm1432_vm4, %v1712_v10, %v3198_v45  ;;  %v2059_v53 = vsel %vm1426_vm1, %v2058_v32, %v2042_v55 }
 0x717   : > { %v1718_v20 = vadd.f32 %v1717_v11, %v1716_v6  ;;  %v1722_v21 = vadd.f32 %v1721_v12, %v1720_v9  ;;  %v1726_v23 = vadd.f32 %v1725_v13, %v1682_v0  ;;  %v2046_v18 = vmul.f32 %v3491_v5, %v1835_v14 }
 0x718   : > { %v1869_v49 = vrot.slane %v1835_v14, 4  ;;  %v1868_v0 = vsel %vm1430_vm3, %v1867_v59, %v1866_v26  ;;  %v2061_v11 = vsel %vm1428_vm2, %v2060_v37, %v2059_v53 }
 0x719   : > { %v1836_v27 = vmul.f32 %v3490_v61, %v1718_v20  ;;  %v1723_v28 = vrot.slane %v1722_v21, 1  ;;  %v1727_v30 = vrot.slane %v1726_v23, 2  ;;  %v3200_v52 = vsel %vm1434_vm5, %v1718_v20, %v3199_v22 }
 0x71a   : > { %v2064_v63 = vrot.slane %v2046_v18, 4  ;;  %v1870_v10 = vsel %vm1432_vm4, %v1869_v49, %v1868_v0  ;;  %v2063_v1 = vsel %vm1430_vm3, %v2062_v47, %v2061_v11  ;;  %v926_v47 = vld [vmem:[#allocation11] sm:$0xff] }
 0x71b   : > { %v1724_v48 = vadd.f32 %v1723_v28, %v1722_v21  ;;  %v1728_v36 = vadd.f32 %v1727_v30, %v1726_v23  ;;  %v2047_v44 = vmul.f32 %v3491_v5, %v1836_v27  ;;  %v1871_v54 = vrot.slane %v1836_v27, 3  ;;  %v3489_v28 = vld [vmem:[#allocation26] ss:$0 sm:$0xff] }
 0x71d   : > { %v1837_v46 = vmul.f32 %v3490_v61, %v1724_v48  ;;  %v1729_v41 = vrot.slane %v1728_v36, 1  ;;  %v3201_v60 = vsel %vm1436_vm6, %v1724_v48, %v3200_v52  ;;  %v2066_v8 = vrot.slane %v2047_v44, 3  ;;  %v927_v44 = vld [vmem:[#allocation11 + $0x8] sm:$0xff] }
 0x71e   : > { %v1872_v13 = vsel %vm1434_vm5, %v1871_v54, %v1870_v10  ;;  %v943_v54 = vld [vmem:[#allocation12 + $0x8] sm:$0xff] }
 0x71f   : > { %v1730_v56 = vadd.f32 %v1729_v41, %v1728_v36  ;;  %v2048_v57 = vmul.f32 %v3491_v5, %v1837_v46  ;;  %v1873_v4 = vrot.slane %v1837_v46, 2 }
 0x721   : > { %v1838_v6 = vmul.f32 %v3490_v61, %v1730_v56  ;;  %v3202_v9 = vsel %vm1438_vm7, %v1730_v56, %v3201_v60  ;;  %v2068_v12 = vrot.slane %v2048_v57, 2  ;;  %v1874_v20 = vsel %vm1436_vm6, %v1873_v4, %v1872_v13  ;;  %v942_v56 = vld [vmem:[#allocation12] sm:$0xff]  ;;  %v5900_v4 = vld [vmem:[#allocation11 + $0x10] sm:$0xff]  ;;  %v951_v13 = vld [vmem:[#allocation12 + $0x48] sm:$0xff] }
 0x722   : > { %3204 = vst [vmem:[#allocation2] sm:$0xff] %v3202_v9  ;;  %v2065_v61 = vsel %vm1432_vm4, %v2064_v63, %v2063_v1  ;;  %v5902_v9 = vld [vmem:[#allocation11 + $0x18] sm:$0xff] }
 0x723   : > { %v1875_v29 = vrot.slane %v1838_v6, 1  ;;  %v2049_v19 = vmul.f32 %v3491_v5, %v1838_v6  ;;  %v2067_v23 = vsel %vm1434_vm5, %v2066_v8, %v2065_v61  ;;  %v944_v6 = vld [vmem:[#allocation12 + $0x10] sm:$0xff] }
 0x724   : > { %v2069_v50 = vsel %vm1436_vm6, %v2068_v12, %v2067_v23  ;;  %v5907_v12 = vld [vmem:[#allocation11 + $0x48] sm:$0xff] }
 0x725   : > { %v1876_v21 = vsel %vm1438_vm7, %v1875_v29, %v1874_v20  ;;  %v2070_v25 = vrot.slane %v2049_v19, 1  ;;  %v945_v29 = vld [vmem:[#allocation12 + $0x18] sm:$0xff] }
 0x726   : > { %3790 = vmatmul.mubr.f32.vlgmr.msra.gmra.mrb[4].mxu0 %v1876_v21  ;;  %3825 = vmatmul.mubr.f32.vlgmr.msra.gmra.mrb[4].mxu1 %v1876_v21 }
 0x727   : > { %v2071_v14 = vsel %vm1438_vm7, %v2070_v25, %v2069_v50  ;;  %3859 = vmatprep.mubr.msk.f32.mxu0 %vm4996_vm0, %v4997_v38  ;;  %3894 = vmatprep.mubr.msk.f32.mxu1 %vm4996_vm0, %v4997_v38 }
 0x728   : > { %2073 = vadd.xlane.f32.xlu1 %v2071_v14 }
 0x756   : > { %v1820_v5 = vpop.f32.mrb[2].mxu1 }
 0x757   : > { %v3756_v27 = vpop.f32.mrb[3].mxu1  ;;  %v1821_v30 = vadd.f32 %v3489_v28, %v1820_v5 }
 0x7f9   : > { %v1944_v7 = vpop.f32.mrb[4].mxu0  ;;  %v2031_v32 = vpop.f32.mrb[4].mxu1 }
 0x7fa   : > { %v2078_v55 = vmul.f32 %v1944_v7, %v1821_v30  ;;  %v2186_v31 = vcombine.high %v2031_v32, %v2031_v32  ;;  %v2193_v33 = vrot.slane %v2031_v32, %v5674_v58  ;;  %v3791_v2 = vpop.f32.mrb[5].mxu0  ;;  %v3826_v48 = vpop.f32.mrb[5].mxu1  ;;  %v953_v30 = vld [vmem:[#allocation12 + $0x58] sm:$0xff] }
 0x7fb   : > { %v947_v2 = vld [vmem:[#allocation12 + $0x28] sm:$0xff] }
 0x7fc   : > { %v2080_v36 = vcombine.high %v2078_v55, %v2078_v55  ;;  %v2087_v37 = vrot.slane %v2078_v55, %v5674_v58  ;;  %v2200_v39 = vrot.slane %v2186_v31, %v5674_v58  ;;  %v2201_v45 = vcombine.high %v2193_v33, %v2193_v33 }
 0x7fd   : > { %v2209_v38 = vrot.slane %v2193_v33, %v5674_v58  ;;  %v946_v33 = vld [vmem:[#allocation12 + $0x20] sm:$0xff] }
 0x7fe   : > { %v2094_v18 = vrot.slane %v2080_v36, %v5674_v58  ;;  %v2095_v59 = vcombine.high %v2087_v37, %v2087_v37  ;;  %v2103_v46 = vrot.slane %v2087_v37, %v5674_v58  ;;  %v2202_v41 = vcombine.high %v2200_v39, %v2200_v39 }
 0x7ff   : > { %v5890_v49 = vrot.slane %v2200_v39, %v5674_v58  ;;  %v5893_v22 = vrot.slane %v2201_v45, %v5674_v58  ;;  %v2231_v53 = vcombine.high %v2209_v38, %v2209_v38  ;;  %v2238_v52 = vrot.slane %v2209_v38, %v5678_v62  ;;  %v5920_v39 = vld [vmem:[#allocation11 + $0x58] sm:$0xff]  ;;  %v5922_v45 = vld [vmem:[#allocation11 + $0x20] sm:$0xff] }
 0x800   : > { %v2096_v57 = vcombine.high %v2094_v18, %v2094_v18  ;;  %v2110_v63 = vrot.slane %v2094_v18, %v5674_v58  ;;  %v5898_v60 = vrot.slane %v2095_v59, %v5674_v58  ;;  %v2125_v26 = vcombine.high %v2103_v46, %v2103_v46  ;;  %v5925_v18 = vld [vmem:[#allocation11 + $0x28] sm:$0xff] }
 0x801   : > { %v2132_v0 = vrot.slane %v2103_v46, %v5678_v62  ;;  %v2276_v8 = vmul.f32 %v2238_v52, %v927_v44  ;;  %v2275_v10 = vmul.f32 %v2238_v52, %v926_v47  ;;  %v2242_v11 = vrot.slane %v5893_v22, %v5678_v62 }
 0x802   : > { %v2136_v19 = vrot.slane %v5898_v60, %v5678_v62  ;;  %v2148_v1 = vrot.slane %v2110_v63, %v5678_v62  ;;  %v2254_v20 = vrot.slane %v5890_v49, %v5678_v62  ;;  %v2124_v61 = vrot.slane %v2096_v57, %v5674_v58 }
 0x803   : > { %v2170_v21 = vmul.f32 %v2132_v0, %v943_v54  ;;  %v2169_v23 = vmul.f32 %v2132_v0, %v942_v56  ;;  %v2277_v25 = vmul.f32 %v2242_v11, %v5900_v4  ;;  %v2278_v50 = vmul.f32 %v2242_v11, %v5902_v9 }
 0x804   : > { %v2171_v14 = vmul.f32 %v2136_v19, %v944_v6  ;;  %v2178_v5 = vmul.f32 %v2148_v1, %v951_v13  ;;  %v2284_v27 = vmul.f32 %v2254_v20, %v5907_v12  ;;  %v2172_v28 = vmul.f32 %v2136_v19, %v945_v29  ;;  %v955_v6 = vld [vmem:[#allocation12 + $0x68] sm:$0xff] }
 0x805   : > { %v2292_v7 = vadd.f32 %v2276_v8, %v2170_v21  ;;  %v2291_v32 = vadd.f32 %v2275_v10, %v2169_v23  ;;  %v2152_v55 = vrot.slane %v2124_v61, %v5678_v62  ;;  %v2230_v31 = vrot.slane %v2202_v41, %v5674_v58  ;;  %v950_v41 = vld [vmem:[#allocation12 + $0x40] sm:$0xff]  ;;  %v5940_v23 = vld [vmem:[#allocation11 + $0x78] sm:$0xff] }
 0x806   : > { %v2293_v48 = vadd.f32 %v2277_v25, %v2171_v14  ;;  %v2300_v36 = vadd.f32 %v2284_v27, %v2178_v5  ;;  %v2294_v37 = vadd.f32 %v2278_v50, %v2172_v28  ;;  %v2140_v38 = vrot.slane %v2125_v26, %v5678_v62  ;;  %v5933_v26 = vld [vmem:[#allocation11 + $0x68] sm:$0xff]  ;;  %v957_v25 = vld [vmem:[#allocation12 + $0x78] sm:$0xff]  ;;  %v5942_v50 = vld [vmem:[#allocation11 + $0x50] sm:$0xff] }
 0x807   : > { %2309 = vadd.xlane.f32.xlu1 %v2292_v7  ;;  %2307 = vadd.xlane.f32.xlu0 %v2291_v32  ;;  %v2180_v59 = vmul.f32 %v2152_v55, %v953_v30  ;;  %v2258_v46 = vrot.slane %v2230_v31, %v5678_v62  ;;  %v2246_v58 = vrot.slane %v2231_v53, %v5678_v62  ;;  %v5948_v28 = vld [vmem:[#allocation11 + $0x30] sm:$0xff] }
 0x808   : > { %v2173_v44 = vmul.f32 %v2140_v38, %v946_v33  ;;  %v2126_v47 = vcombine.high %v2110_v63, %v2110_v63  ;;  %v2232_v54 = vcombine.high %v5890_v49, %v5890_v49  ;;  %v2174_v52 = vmul.f32 %v2140_v38, %v947_v2  ;;  %v5938_v63 = vld [vmem:[#allocation11 + $0x40] sm:$0xff]  ;;  %v952_v49 = vld [vmem:[#allocation12 + $0x50] sm:$0xff] }
 0x809   : > { %v2286_v56 = vmul.f32 %v2258_v46, %v5920_v39  ;;  %v2279_v57 = vmul.f32 %v2246_v58, %v5922_v45  ;;  %v2280_v0 = vmul.f32 %v2246_v58, %v5925_v18  ;;  %v2128_v8 = vcombine.high %v2124_v61, %v2124_v61  ;;  %v954_v33 = vld [vmem:[#allocation12 + $0x60] sm:$0xff]  ;;  %v948_v38 = vld [vmem:[#allocation12 + $0x30] sm:$0xff] }
 0x80a   : > { %v2156_v10 = vrot.slane %v2126_v47, %v5678_v62  ;;  %v2262_v53 = vrot.slane %v2232_v54, %v5678_v62  ;;  %v2234_v11 = vcombine.high %v2230_v31, %v2230_v31  ;;  %v2177_v13 = vmul.f32 %v2148_v1, %v950_v41  ;;  %v5954_v31 = vld [vmem:[#allocation11 + $0x60] sm:$0xff] }
 0x80b   : > { %2311 = vadd.xlane.f32.xlu1 %v2293_v48  ;;  %2325 = vadd.xlane.f32.xlu0 %v2300_v36  ;;  %v2302_v29 = vadd.f32 %v2286_v56, %v2180_v59  ;;  %v2295_v19 = vadd.f32 %v2279_v57, %v2173_v44  ;;  %v2296_v21 = vadd.f32 %v2280_v0, %v2174_v52  ;;  %v5957_v59 = vld [vmem:[#allocation11 + $0x38] sm:$0xff]  ;;  %v956_v44 = vld [vmem:[#allocation12 + $0x70] sm:$0xff] }
 0x80c   : > { %v2182_v61 = vmul.f32 %v2156_v10, %v955_v6  ;;  %v2288_v14 = vmul.f32 %v2262_v53, %v5933_v26  ;;  %v2160_v5 = vrot.slane %v2128_v8, %v5678_v62  ;;  %v2266_v27 = vrot.slane %v2234_v11, %v5678_v62 }
 0x80d   : > { %v2283_v1 = vmul.f32 %v2254_v20, %v5938_v63  ;;  %v2127_v30 = vcombine.high %v5898_v60, %v5898_v60  ;;  %v2233_v7 = vcombine.high %v5893_v22, %v5893_v22  ;;  %v2179_v32 = vmul.f32 %v2152_v55, %v952_v49  ;;  %v949_v20 = vld [vmem:[#allocation12 + $0x38] sm:$0xff]  ;;  %v5962_v55 = vld [vmem:[#allocation11 + $0x70] sm:$0xff] }
 0x80e   : > { %v2304_v2 = vadd.f32 %v2288_v14, %v2182_v61  ;;  %v2184_v48 = vmul.f32 %v2160_v5, %v957_v25  ;;  %v2290_v36 = vmul.f32 %v2266_v27, %v5940_v23  ;;  %v2285_v58 = vmul.f32 %v2258_v46, %v5942_v50 }
 0x80f   : > { %2313 = vadd.xlane.f32.xlu1 %v2294_v37  ;;  %2329 = vadd.xlane.f32.xlu0 %v2302_v29  ;;  %v2299_v60 = vadd.f32 %v2283_v1, %v2177_v13  ;;  %v2144_v41 = vrot.slane %v2127_v30, %v5678_v62  ;;  %v2250_v22 = vrot.slane %v2233_v7, %v5678_v62 }
 0x810   : > { %v2306_v47 = vadd.f32 %v2290_v36, %v2184_v48  ;;  %v2301_v54 = vadd.f32 %v2285_v58, %v2179_v32  ;;  %v2181_v52 = vmul.f32 %v2156_v10, %v954_v33  ;;  %v2287_v56 = vmul.f32 %v2262_v53, %v5954_v31  ;;  %v2074_v53 = vpop.xlane.xlu1 %2073 }
 0x811   : > { %v2175_v57 = vmul.f32 %v2144_v41, %v948_v38  ;;  %v2281_v6 = vmul.f32 %v2250_v22, %v5948_v28  ;;  %v2176_v0 = vmul.f32 %v2144_v41, %v949_v20  ;;  %v2282_v37 = vmul.f32 %v2250_v22, %v5957_v59 }
 0x812   : > { %v2303_v46 = vadd.f32 %v2287_v56, %v2181_v52  ;;  %v2183_v8 = vmul.f32 %v2160_v5, %v956_v44  ;;  %v2289_v11 = vmul.f32 %v2266_v27, %v5962_v55  ;;  %v2076_v10 = vstv %s2075_s12 }
 0x813   : > { %2315 = vadd.xlane.f32.xlu1 %v2295_v19  ;;  %2333 = vadd.xlane.f32.xlu0 %v2304_v2  ;;  %v2297_v13 = vadd.f32 %v2281_v6, %v2175_v57  ;;  %v2298_v49 = vadd.f32 %v2282_v37, %v2176_v0  ;;  %v2077_v25 = vadd.f32 %v2076_v10, %v2074_v53 }
 0x814   : > { %v2305_v29 = vadd.f32 %v2289_v11, %v2183_v8 }
 0x815   : > { %v2343_v61 = vrot.slane %v2077_v25, %v5678_v62  ;;  %v2351_v33 = vrot.slane %v2077_v25, %v5743_v16  ;;  %v2359_v58 = vrot.slane %v2077_v25, %v5752_v24  ;;  %v2355_v44 = vrot.slane %v2077_v25, %v5746_v17 }
 0x816   : > { %v2363_v6 = vrot.slane %v2077_v25, %v5756_v34  ;;  %v2367_v11 = vrot.slane %v2077_v25, %v5760_v43  ;;  %v2371_v53 = vrot.slane %v2077_v25, %v5764_v42 }
 0x817   : > { %2317 = vadd.xlane.f32.xlu1 %v2296_v21  ;;  %2337 = vadd.xlane.f32.xlu0 %v2306_v47  ;;  %v2347_v21 = vrot.slane %v2077_v25, %v5740_v15 }
 0x81b   : > { %2323 = vadd.xlane.f32.xlu1 %v2299_v60 }
 0x81f   : > { %2319 = vadd.xlane.f32.xlu1 %v2297_v13 }
 0x823   : > { %2321 = vadd.xlane.f32.xlu1 %v2298_v49 }
 0x827   : > { %2327 = vadd.xlane.f32.xlu1 %v2301_v54 }
 0x82b   : > { %2331 = vadd.xlane.f32.xlu1 %v2303_v46 }
 0x82f   : > { %2335 = vadd.xlane.f32.xlu1 %v2305_v29 }
 0x894   : > { %v2310_v14 = vpop.xlane.xlu1 %2309  ;;  %v2308_v19 = vpop.xlane.xlu0 %2307 }
 0x895   : > { %v5969_v5 = vadd.f32 %v2343_v61, %v2310_v14  ;;  %v5971_v27 = vadd.f32 %v2343_v61, %v2308_v19 }
 0x897   : > { %2416 = vperm.xlu0 %4319, %v5969_v5   ;;  %2413 = vperm.xlu1 %4318, %v5971_v27  }
 0x898   : > { %v2312_v1 = vpop.xlane.xlu1 %2311  ;;  %v2326_v20 = vpop.xlane.xlu0 %2325 }
 0x899   : > { %v5976_v30 = vadd.f32 %v2347_v21, %v2312_v1  ;;  %v5990_v41 = vadd.f32 %v2359_v58, %v2326_v20  ;;  %v2464_v20 = vadd.s32 4294967288, %v5717_v35 }
 0x89b   : > { %2419 = vperm.xlu1 %4318, %v5976_v30  }
 0x89c   : > { %v2314_v7 = vpop.xlane.xlu1 %2313  ;;  %v2330_v52 = vpop.xlane.xlu0 %2329 }
 0x89d   : > { %v5979_v32 = vadd.f32 %v2347_v21, %v2314_v7  ;;  %v6004_v46 = vadd.f32 %v2363_v6, %v2330_v52 }
 0x89f   : > { %2422 = vperm.xlu1 %4318, %v5979_v32  }
 0x8a0   : > { %v2316_v2 = vpop.xlane.xlu1 %2315  ;;  %v2334_v0 = vpop.xlane.xlu0 %2333 }
 0x8a1   : > { %v5983_v48 = vadd.f32 %v2351_v33, %v2316_v2  ;;  %v6011_v49 = vadd.f32 %v2367_v11, %v2334_v0 }
 0x8a3   : > { %2425 = vperm.xlu0 %4319, %v5983_v48  }
 0x8a4   : > { %v2318_v36 = vpop.xlane.xlu1 %2317  ;;  %v2338_v10 = vpop.xlane.xlu0 %2337 }
 0x8a5   : > { %v5986_v38 = vadd.f32 %v2351_v33, %v2318_v36  ;;  %v6018_v14 = vadd.f32 %v2371_v53, %v2338_v10 }
 0x8a7   : > { %2428 = vperm.xlu1 %4318, %v5986_v38  }
 0x8a8   : > { %v2324_v60 = vpop.xlane.xlu1 %2323 }
 0x8a9   : > { %v5992_v22 = vadd.f32 %v2359_v58, %v2324_v60  ;;  %v6026_v60 = vsub.s32 %v2464_v20, %v5671_v51 }
 0x8ab   : > { %2437 = vperm.xlu0 %4319, %v5992_v22   ;;  %2440 = vperm.xlu1 %4318, %v5990_v41  }
 0x8ac   : > { %v2320_v47 = vpop.xlane.xlu1 %2319 }
 0x8ad   : > { %v5997_v54 = vadd.f32 %v2355_v44, %v2320_v47 }
 0x8af   : > { %2431 = vperm.xlu0 %4319, %v5997_v54  }
 0x8b0   : > { %v2322_v56 = vpop.xlane.xlu1 %2321 }
 0x8b1   : > { %v6000_v57 = vadd.f32 %v2355_v44, %v2322_v56 }
 0x8b3   : > { %2434 = vperm.xlu1 %4318, %v6000_v57  }
 0x8b4   : > { %v2328_v37 = vpop.xlane.xlu1 %2327 }
 0x8b5   : > { %v6006_v8 = vadd.f32 %v2363_v6, %v2328_v37 }
 0x8b7   : > { %2443 = vperm.xlu0 %4319, %v6006_v8   ;;  %2446 = vperm.xlu1 %4318, %v6004_v46  }
 0x8b8   : > { %v2332_v13 = vpop.xlane.xlu1 %2331 }
 0x8b9   : > { %v6013_v29 = vadd.f32 %v2367_v11, %v2332_v13 }
 0x8bb   : > { %2449 = vperm.xlu0 %4319, %v6013_v29   ;;  %2452 = vperm.xlu1 %4318, %v6011_v49  }
 0x8bc   : > { %v2336_v61 = vpop.xlane.xlu1 %2335 }
 0x8bd   : > { %v6020_v19 = vadd.f32 %v2371_v53, %v2336_v61 }
 0x8bf   : > { %2458 = vperm.xlu1 %4318, %v6018_v14   ;;  %2455 = vperm.xlu0 %4319, %v6020_v19  }
 0x916   : > { %v2414_v21 = vpop.permute.xlu1 %2413  ;;  %v2417_v7 = vpop.permute.xlu0 %2416 }
 0x917   : > { %v2468_v6 = vrot.slane %v2417_v7, %v6026_v60  ;;  %v2463_v0 = vrot.slane %v2414_v21, %v5721_v40 }
 0x91a   : > { %v2420_v1 = vpop.permute.xlu1 %2419 }
 0x91b   : > { %v2474_v37 = vrot.slane %v2420_v1, %v5721_v40 }
 0x91e   : > { %v2423_v33 = vpop.permute.xlu1 %2422 }
 0x91f   : > { %v2478_v52 = vrot.slane %v2423_v33, %v6026_v60  ;;  %v2470_v33 = vsel %vm2469_vm9, %v2468_v6, %v2463_v0 }
 0x921   : > { %v2479_v10 = vsel %vm2469_vm9, %v2478_v52, %v2474_v37 }
 0x922   : > { %v2426_v2 = vpop.permute.xlu0 %2425 }
 0x923   : > { %v2483_v35 = vrot.slane %v2426_v2, %v5721_v40 }
 0x926   : > { %v2429_v36 = vpop.permute.xlu1 %2428 }
 0x927   : > { %v2487_v56 = vrot.slane %v2429_v36, %v6026_v60  ;;  %v2534_v36 = vsel %vm1426_vm1, %v2479_v10, %v2470_v33 }
 0x929   : > { %v2488_v61 = vsel %vm2469_vm9, %v2487_v56, %v2483_v35 }
 0x92a   : > { %v2438_v25 = vpop.permute.xlu0 %2437  ;;  %v2441_v58 = vpop.permute.xlu1 %2440 }
 0x92b   : > { %v2501_v2 = vrot.slane %v2438_v25, %v5721_v40  ;;  %v2505_v20 = vrot.slane %v2441_v58, %v6026_v60 }
 0x92e   : > { %v2432_v44 = vpop.permute.xlu0 %2431 }
 0x92f   : > { %v2492_v53 = vrot.slane %v2432_v44, %v5721_v40  ;;  %v2535_v44 = vsel %vm1428_vm2, %v2488_v61, %v2534_v36 }
 0x932   : > { %v2435_v47 = vpop.permute.xlu1 %2434 }
 0x933   : > { %v2496_v11 = vrot.slane %v2435_v47, %v6026_v60 }
 0x935   : > { %v2497_v7 = vsel %vm2469_vm9, %v2496_v11, %v2492_v53  ;;  %v2506_v11 = vsel %vm2469_vm9, %v2505_v20, %v2501_v2 }
 0x936   : > { %v2444_v13 = vpop.permute.xlu0 %2443  ;;  %v2447_v51 = vpop.permute.xlu1 %2446  ;;  %v2536_v0 = vsel %vm1430_vm3, %v2497_v7, %v2535_v44 }
 0x937   : > { %v2510_v21 = vrot.slane %v2444_v13, %v5721_v40  ;;  %v2514_v1 = vrot.slane %v2447_v51, %v6026_v60  ;;  %v2537_v10 = vsel %vm1432_vm4, %v2506_v11, %v2536_v0 }
 0x939   : > { %v2515_v37 = vsel %vm2469_vm9, %v2514_v1, %v2510_v21 }
 0x93a   : > { %v2450_v47 = vpop.permute.xlu0 %2449  ;;  %v2453_v52 = vpop.permute.xlu1 %2452  ;;  %v2538_v53 = vsel %vm1434_vm5, %v2515_v37, %v2537_v10 }
 0x93b   : > { %v2519_v56 = vrot.slane %v2450_v47, %v5721_v40  ;;  %v2523_v6 = vrot.slane %v2453_v52, %v6026_v60 }
 0x93d   : > { %v2524_v35 = vsel %vm2469_vm9, %v2523_v6, %v2519_v56 }
 0x93e   : > { %v2456_v13 = vpop.permute.xlu0 %2455  ;;  %v2459_v25 = vpop.permute.xlu1 %2458  ;;  %v2539_v33 = vsel %vm1436_vm6, %v2524_v35, %v2538_v53 }
 0x93f   : > { %v2528_v58 = vrot.slane %v2456_v13, %v5721_v40  ;;  %v2532_v51 = vrot.slane %v2459_v25, %v6026_v60 }
 0x941   : > { %v2533_v61 = vsel %vm2469_vm9, %v2532_v51, %v2528_v58 }
 0x942   : > { %v2540_v7 = vsel %vm1438_vm7, %v2533_v61, %v2539_v33 }
 0x943   : > { %v2543_v21 = vsel %vm2542_vm10, %v2540_v7, -inf }
 0x944   : > { %2544 = vmax.xlane.f32.xlu0 %v2543_v21 }
 0x9d1   : > { %v2545_v1 = vpop.xlane.xlu0 %2544 }
 0x9d2   : > { %v2550_v36 = vrot.slane %v2545_v1, %v5678_v62  ;;  %v2554_v20 = vrot.slane %v2545_v1, %v5740_v15  ;;  %v2566_v47 = vrot.slane %v2545_v1, %v5752_v24  ;;  %v6068_v37 = vrot.slane %v2545_v1, %v5764_v42 }
 0x9d3   : > { %v2558_v35 = vrot.slane %v2545_v1, %v5743_v16  ;;  %v2562_v51 = vrot.slane %v2545_v1, %v5746_v17 }
 0x9d4   : > { %v2587_v2 = vsub.f32 %v5971_v27, %v2550_v36  ;;  %v2588_v52 = vsub.f32 %v5969_v5, %v2550_v36  ;;  %v2589_v56 = vsub.f32 %v5976_v30, %v2554_v20  ;;  %v2595_v6 = vsub.f32 %v5992_v22, %v2566_v47 }
 0x9d5   : > { %v2590_v27 = vsub.f32 %v5979_v32, %v2554_v20  ;;  %v2601_v5 = vsub.f32 %v6020_v19, %v6068_v37  ;;  %v2591_v30 = vsub.f32 %v5983_v48, %v2558_v35  ;;  %v2592_v10 = vsub.f32 %v5986_v38, %v2558_v35 }
 0x9d6   : > { %v2603_v44 = vmul.f32 1.442695, %v2587_v2  ;;  %v2605_v0 = vmul.f32 1.442695, %v2588_v52  ;;  %v2607_v11 = vmul.f32 1.442695, %v2589_v56  ;;  %v2593_v48 = vsub.f32 %v5997_v54, %v2562_v51 }
 0x9d7   : > { %v2619_v13 = vmul.f32 1.442695, %v2595_v6  ;;  %v2609_v25 = vmul.f32 1.442695, %v2590_v27  ;;  %v2631_v58 = vmul.f32 1.442695, %v2601_v5  ;;  %v2594_v38 = vsub.f32 %v6000_v57, %v2562_v51 }
 0x9d8   : > { %4338 = vpow2.f32 %v2603_v44  ;;  %v2611_v32 = vmul.f32 1.442695, %v2591_v30  ;;  %v2613_v19 = vmul.f32 1.442695, %v2592_v10  ;;  %v2615_v7 = vmul.f32 1.442695, %v2593_v48 }
 0x9d9   : > { %4340 = vpow2.f32 %v2605_v0  ;;  %v2570_v54 = vrot.slane %v2545_v1, %v5756_v34  ;;  %v2596_v2 = vsub.f32 %v5990_v41, %v2566_v47  ;;  %v2617_v20 = vmul.f32 1.442695, %v2594_v38 }
 0x9da   : > { %4342 = vpow2.f32 %v2607_v11  ;;  %v2574_v6 = vrot.slane %v2545_v1, %v5760_v43 }
 0x9db   : > { %4344 = vpow2.f32 %v2619_v13  ;;  %v2597_v57 = vsub.f32 %v6006_v8, %v2570_v54  ;;  %v2621_v44 = vmul.f32 1.442695, %v2596_v2  ;;  %v2598_v41 = vsub.f32 %v6004_v46, %v2570_v54 }
 0x9dc   : > { %4346 = vpow2.f32 %v2609_v25  ;;  %v2599_v11 = vsub.f32 %v6013_v29, %v2574_v6  ;;  %v2600_v27 = vsub.f32 %v6011_v49, %v2574_v6  ;;  %v2602_v46 = vsub.f32 %v6018_v14, %v6068_v37 }
 0x9dd   : > { %4348 = vpow2.f32 %v2631_v58  ;;  %v2623_v47 = vmul.f32 1.442695, %v2597_v57  ;;  %v2625_v8 = vmul.f32 1.442695, %v2598_v41 }
 0x9de   : > { %4350 = vpow2.f32 %v2611_v32  ;;  %v2627_v1 = vmul.f32 1.442695, %v2599_v11  ;;  %v2629_v5 = vmul.f32 1.442695, %v2600_v27  ;;  %v2633_v30 = vmul.f32 1.442695, %v2602_v46 }
 0x9df   : > { %4352 = vpow2.f32 %v2613_v19 }
 0x9e0   : > { %4354 = vpow2.f32 %v2615_v7 }
 0x9e1   : > { %4356 = vpow2.f32 %v2617_v20 }
 0x9e2   : > { %v6075_v22 = vpop.eup %4338  ;;  %4358 = vpow2.f32 %v2621_v44 }
 0x9e3   : > { %2652 = vperm.xlu1 %4318, %v6075_v22   ;;  %v6080_v53 = vpop.eup %4340  ;;  %4360 = vpow2.f32 %v2623_v47 }
 0x9e4   : > { %v6084_v61 = vpop.eup %4342  ;;  %4362 = vpow2.f32 %v2625_v8 }
 0x9e5   : > { %v6086_v33 = vpop.eup %4344  ;;  %4364 = vpow2.f32 %v2627_v1 }
 0x9e6   : > { %2676 = vperm.xlu0 %4319, %v6086_v33   ;;  %v6091_v21 = vpop.eup %4346  ;;  %4366 = vpow2.f32 %v2629_v5 }
 0x9e7   : > { %2655 = vperm.xlu1 %4318, %v6080_v53   ;;  %v6094_v36 = vpop.eup %4348  ;;  %4368 = vpow2.f32 %v2633_v30 }
 0x9e8   : > { %v6099_v52 = vpop.eup %4350 }
 0x9e9   : > { %v6103_v56 = vpop.eup %4352 }
 0x9ea   : > { %2694 = vperm.xlu0 %4319, %v6094_v36   ;;  %v6108_v0 = vpop.eup %4354 }
 0x9eb   : > { %2658 = vperm.xlu1 %4318, %v6084_v61   ;;  %v6112_v35 = vpop.eup %4356 }
 0x9ec   : > { %v6116_v13 = vpop.eup %4358 }
 0x9ed   : > { %v6121_v29 = vpop.eup %4360 }
 0x9ee   : > { %v6124_v25 = vpop.eup %4362 }
 0x9ef   : > { %2661 = vperm.xlu1 %4318, %v6091_v21   ;;  %v6127_v49 = vpop.eup %4364 }
 0x9f0   : > { %v6130_v58 = vpop.eup %4366 }
 0x9f1   : > { %v4369_v14 = vpop.eup %4368 }
 0x9f3   : > { %2664 = vperm.xlu1 %4318, %v6099_v52  }
 0x9f7   : > { %2667 = vperm.xlu1 %4318, %v6103_v56  }
 0x9fb   : > { %2670 = vperm.xlu1 %4318, %v6108_v0  }
 0x9ff   : > { %2673 = vperm.xlu1 %4318, %v6112_v35  }
 0xa03   : > { %2679 = vperm.xlu1 %4318, %v6116_v13  }
 0xa07   : > { %2682 = vperm.xlu1 %4318, %v6121_v29  }
 0xa0b   : > { %2685 = vperm.xlu1 %4318, %v6124_v25  }
 0xa0f   : > { %2688 = vperm.xlu1 %4318, %v6127_v49  }
 0xa13   : > { %2691 = vperm.xlu1 %4318, %v6130_v58  }
 0xa17   : > { %2697 = vperm.xlu1 %4318, %v4369_v14  }
 0xa62   : > { %v2653_v37 = vpop.permute.xlu1 %2652 }
 0xa63   : > { %v2702_v46 = vrot.slane %v2653_v37, %v5721_v40 }
 0xa65   : > { %v2677_v44 = vpop.permute.xlu0 %2676 }
 0xa66   : > { %v2656_v51 = vpop.permute.xlu1 %2655 }
 0xa67   : > { %v2706_v47 = vrot.slane %v2656_v51, %v6026_v60 }
 0xa69   : > { %v2695_v37 = vpop.permute.xlu0 %2694 }
 0xa6a   : > { %v2659_v10 = vpop.permute.xlu1 %2658 }
 0xa6b   : > { %v2711_v11 = vrot.slane %v2659_v10, %v5721_v40  ;;  %v2707_v10 = vsel %vm2469_vm9, %v2706_v47, %v2702_v46 }
 0xa6e   : > { %v2662_v32 = vpop.permute.xlu1 %2661 }
 0xa6f   : > { %v2715_v57 = vrot.slane %v2662_v32, %v6026_v60 }
 0xa71   : > { %v2716_v5 = vsel %vm2469_vm9, %v2715_v57, %v2711_v11 }
 0xa72   : > { %v2665_v48 = vpop.permute.xlu1 %2664  ;;  %v2771_v57 = vsel %vm1426_vm1, %v2716_v5, %v2707_v10 }
 0xa73   : > { %v2720_v27 = vrot.slane %v2665_v48, %v5721_v40 }
 0xa76   : > { %v2668_v19 = vpop.permute.xlu1 %2667 }
 0xa77   : > { %v2724_v6 = vrot.slane %v2668_v19, %v6026_v60  ;;  %v2738_v19 = vrot.slane %v2677_v44, %v5721_v40 }
 0xa79   : > { %v2725_v51 = vsel %vm2469_vm9, %v2724_v6, %v2720_v27 }
 0xa7a   : > { %v2671_v38 = vpop.permute.xlu1 %2670  ;;  %v2772_v44 = vsel %vm1428_vm2, %v2725_v51, %v2771_v57 }
 0xa7b   : > { %v2729_v30 = vrot.slane %v2671_v38, %v5721_v40 }
 0xa7e   : > { %v2674_v7 = vpop.permute.xlu1 %2673 }
 0xa7f   : > { %v2733_v8 = vrot.slane %v2674_v7, %v6026_v60 }
 0xa81   : > { %v2734_v7 = vsel %vm2469_vm9, %v2733_v8, %v2729_v30 }
 0xa82   : > { %v2680_v54 = vpop.permute.xlu1 %2679  ;;  %v2773_v11 = vsel %vm1430_vm3, %v2734_v7, %v2772_v44 }
 0xa83   : > { %v2742_v1 = vrot.slane %v2680_v54, %v6026_v60 }
 0xa85   : > { %v2743_v38 = vsel %vm2469_vm9, %v2742_v1, %v2738_v19 }
 0xa86   : > { %v2683_v2 = vpop.permute.xlu1 %2682 }
 0xa87   : > { %v2747_v48 = vrot.slane %v2683_v2, %v5721_v40  ;;  %v2765_v2 = vrot.slane %v2695_v37, %v5721_v40 }
 0xa8a   : > { %v2686_v20 = vpop.permute.xlu1 %2685 }
 0xa8b   : > { %v2751_v32 = vrot.slane %v2686_v20, %v6026_v60 }
 0xa8d   : > { %v2752_v6 = vsel %vm2469_vm9, %v2751_v32, %v2747_v48 }
 0xa8e   : > { %v2689_v41 = vpop.permute.xlu1 %2688 }
 0xa8f   : > { %v2756_v20 = vrot.slane %v2689_v41, %v5721_v40 }
 0xa92   : > { %v2692_v3 = vpop.permute.xlu1 %2691 }
 0xa93   : > { %v2760_v54 = vrot.slane %v2692_v3, %v6026_v60  ;;  %v2774_v3 = vsel %vm1432_vm4, %v2743_v38, %v2773_v11  ;;  %v2992_v38 = vld [vmem:[#allocation32] sm:$0xff] }
 0xa94   : > { %v2775_v46 = vsel %vm1434_vm5, %v2752_v6, %v2774_v3  ;;  %v2995_v6 = vld [vmem:[#allocation32 + $0x18] sm:$0xff]  ;;  %v3012_v11 = vld [vmem:[#allocation32 + $0xa0] sm:$0xff]  ;;  %v2997_v3 = vld [vmem:[#allocation32 + $0x28] sm:$0xff] }
 0xa95   : > { %v2761_v47 = vsel %vm2469_vm9, %v2760_v54, %v2756_v20  ;;  %v2993_v20 = vld [vmem:[#allocation32 + $0x8] sm:$0xff] }
 0xa96   : > { %v2698_v8 = vpop.permute.xlu1 %2697  ;;  %v2776_v41 = vsel %vm1436_vm6, %v2761_v47, %v2775_v46  ;;  %v3014_v46 = vld [vmem:[#allocation32 + $0xb0] sm:$0xff] }
 0xa97   : > { %v2769_v27 = vrot.slane %v2698_v8, %v6026_v60  ;;  %v3013_v8 = vld [vmem:[#allocation32 + $0xa8] sm:$0xff] }
 0xa99   : > { %v2770_v1 = vsel %vm2469_vm9, %v2769_v27, %v2765_v2  ;;  %v2996_v2 = vld [vmem:[#allocation32 + $0x20] sm:$0xff]  ;;  %v4056_v27 = vpack.c.bf16 %v3013_v8, %v3012_v11 }
 0xa9a   : > { %v2777_v5 = vsel %vm1438_vm7, %v2770_v1, %v2776_v41  ;;  %v3015_v1 = vld [vmem:[#allocation32 + $0xb8] sm:$0xff] }
 0xa9b   : > { %v2779_v30 = vsel %vm2542_vm10, %v2777_v5, 0.0  ;;  %v4059_v41 = vpack.c.bf16 %v3015_v1, %v3014_v46  ;;  %v2998_v5 = vld [vmem:[#allocation32 + $0x30] sm:$0xff] }
 0xa9c   : > { %2780 = vadd.xlane.f32.xlu0 %v2779_v30  ;;  %v2999_v30 = vld [vmem:[#allocation32 + $0x38] sm:$0xff] }
 0xb29   : > { %v2781_v32 = vpop.xlane.xlu0 %2780 }
 0xb2a   : > { %4370 = vrcp.f32 %v2781_v32  ;;  %v4083_v32 = vpack.c.bf16 %v2999_v30, %v2998_v5 }
 0xb34   : > { %v4371_v19 = vpop.eup %4370 }
 0xb35   : > { %v2803_v40 = vrot.slane %v4371_v19, %v5752_v24  ;;  %v2787_v51 = vrot.slane %v4371_v19, %v5678_v62  ;;  %v2815_v7 = vrot.slane %v4371_v19, %v5764_v42  ;;  %v2791_v37 = vrot.slane %v4371_v19, %v5740_v15 }
 0xb36   : > { %v2795_v24 = vrot.slane %v4371_v19, %v5743_v16 }
 0xb37   : > { %v2832_v60 = vmul.f32 %v6086_v33, %v2803_v40  ;;  %v2824_v10 = vmul.f32 %v6075_v22, %v2787_v51  ;;  %v2839_v48 = vmul.f32 %v4369_v14, %v2815_v7  ;;  %v2825_v54 = vmul.f32 %v6080_v53, %v2787_v51  ;;  %v3009_v14 = vld [vmem:[#allocation32 + $0x88] sm:$0xff]  ;;  %v3000_v51 = vld [vmem:[#allocation32 + $0x40] sm:$0xff] }
 0xb38   : > { %v2826_v57 = vmul.f32 %v6084_v61, %v2791_v37  ;;  %v2827_v62 = vmul.f32 %v6091_v21, %v2791_v37  ;;  %v2828_v22 = vmul.f32 %v6099_v52, %v2795_v24  ;;  %v2829_v42 = vmul.f32 %v6103_v56, %v2795_v24  ;;  %v3002_v37 = vld [vmem:[#allocation32 + $0x50] sm:$0xff] }
 0xb39   : > { %2882 = vperm.xlu0 %4319, %v2832_v60   ;;  %2842 = vperm.xlu1 %4318, %v2824_v10   ;;  %v2799_v33 = vrot.slane %v4371_v19, %v5746_v17  ;;  %v2833_v61 = vmul.f32 %v6116_v13, %v2803_v40  ;;  %v2807_v21 = vrot.slane %v4371_v19, %v5756_v34  ;;  %v3017_v40 = vld [vmem:[#allocation32 + $0xc8] sm:$0xff] }
 0xb3a   : > { %v2811_v56 = vrot.slane %v4371_v19, %v5760_v43  ;;  %v4074_v34 = vpack.c.bf16 %v2993_v20, %v2992_v38  ;;  %v3010_v43 = vld [vmem:[#allocation32 + $0x90] sm:$0xff]  ;;  %v3016_v19 = vld [vmem:[#allocation32 + $0xc0] sm:$0xff]  ;;  %v3001_v10 = vld [vmem:[#allocation32 + $0x48] sm:$0xff] }
 0xb3b   : > { %v2830_v15 = vmul.f32 %v6108_v0, %v2799_v33  ;;  %v2831_v53 = vmul.f32 %v6112_v35, %v2799_v33  ;;  %v2834_v16 = vmul.f32 %v6121_v29, %v2807_v21  ;;  %v2835_v52 = vmul.f32 %v6124_v25, %v2807_v21  ;;  %v3008_v35 = vld [vmem:[#allocation32 + $0x80] sm:$0xff]  ;;  %v3022_v21 = vld [vmem:[#allocation32 + $0xf0] sm:$0xff] }
 0xb3c   : > { %v2836_v17 = vmul.f32 %v6127_v49, %v2811_v56  ;;  %v2837_v0 = vmul.f32 %v6130_v58, %v2811_v56  ;;  %v4050_v13 = vpack.c.bf16 %v3009_v14, %v3008_v35  ;;  %v2838_v29 = vmul.f32 %v6094_v36, %v2815_v7  ;;  %4075 = vmatpush3.bf16.msra.mxu1 %v4074_v34  ;;  %v3011_v49 = vld [vmem:[#allocation32 + $0x98] sm:$0xff]  ;;  %v2994_v58 = vld [vmem:[#allocation32 + $0x10] sm:$0xff]  ;;  %v3004_v33 = vld [vmem:[#allocation32 + $0x60] sm:$0xff] }
 0xb3d   : > { %2917 = vperm.xlu0 %4319, %v2839_v48   ;;  %2847 = vperm.xlu1 %4318, %v2825_v54   ;;  %v6343_v25 = vmov 0.0|0.0   ;;  %v4053_v44 = vpack.c.bf16 %v3011_v49, %v3010_v43  ;;  %v4077_v47 = vpack.c.bf16 %v2995_v6, %v2994_v58  ;;  %v4080_v36 = vpack.c.bf16 %v2997_v3, %v2996_v2  ;;  %v3018_v7 = vld [vmem:[#allocation32 + $0xd0] sm:$0xff]  ;;  %v3019_v48 = vld [vmem:[#allocation32 + $0xd8] sm:$0xff] }
 0xb3e   : > { %4051 = vmatpush3.bf16.msra.mxu0 %v4050_v13  ;;  %4076 = vmatprep.subr.bf16.mxu1 %v6343_v25  ;;  %v4062_v60 = vpack.c.bf16 %v3017_v40, %v3016_v19  ;;  %v4086_v54 = vpack.c.bf16 %v3001_v10, %v3000_v51  ;;  %v3007_v56 = vld [vmem:[#allocation32 + $0x78] sm:$0xff] }
 0xb3f   : > { %4052 = vmatprep.subr.bf16.mxu0 %v6343_v25  ;;  %v4372_v35 = vld [vmem:[#allocation3] sm:$0xff] }
 0xb40   : > { %4078 = vmatpush3.bf16.msra.mxu1 %v4077_v47  ;;  %v4373_v47 = vld [vmem:[#allocation11 + $0x8] sm:$0xff] }
 0xb41   : > { %2852 = vperm.xlu1 %4318, %v2826_v57   ;;  %4079 = vmatprep.subr.bf16.mxu1 %v6343_v25  ;;  %v3003_v57 = vld [vmem:[#allocation32 + $0x58] sm:$0xff] }
 0xb42   : > { %4054 = vmatpush3.bf16.msra.mxu0 %v4053_v44  ;;  %v4089_v24 = vpack.c.bf16 %v3003_v57, %v3002_v37 }
 0xb43   : > { %4055 = vmatprep.subr.bf16.mxu0 %v6343_v25 }
 0xb44   : > { %4081 = vmatpush3.bf16.msra.mxu1 %v4080_v36  ;;  %v4374_v36 = vld [vmem:[#allocation11] sm:$0xff] }
 0xb45   : > { %2857 = vperm.xlu1 %4318, %v2827_v62   ;;  %4082 = vmatprep.subr.bf16.mxu1 %v6343_v25  ;;  %v4065_v62 = vpack.c.bf16 %v3019_v48, %v3018_v7 }
 0xb46   : > { %4057 = vmatpush3.bf16.msra.mxu0 %v4056_v27 }
 0xb47   : > { %4058 = vmatprep.subr.bf16.mxu0 %v6343_v25 }
 0xb48   : > { %4084 = vmatpush3.bf16.msra.mxu1 %v4083_v32 }
 0xb49   : > { %2862 = vperm.xlu1 %4318, %v2828_v22   ;;  %4085 = vmatprep.subr.bf16.mxu1 %v6343_v25  ;;  %v3020_v22 = vld [vmem:[#allocation32 + $0xe0] sm:$0xff] }
 0xb4a   : > { %4060 = vmatpush3.bf16.msra.mxu0 %v4059_v41 }
 0xb4b   : > { %4061 = vmatprep.subr.bf16.mxu0 %v6343_v25 }
 0xb4c   : > { %4087 = vmatpush3.bf16.msra.mxu1 %v4086_v54 }
 0xb4d   : > { %2867 = vperm.xlu1 %4318, %v2829_v42   ;;  %v3021_v42 = vld [vmem:[#allocation32 + $0xe8] sm:$0xff]  ;;  %4088 = vmatprep.subr.bf16.mxu1 %v6343_v25 }
 0xb4e   : > { %4063 = vmatpush3.bf16.msra.mxu0 %v4062_v60 }
 0xb4f   : > { %4064 = vmatprep.subr.bf16.mxu0 %v6343_v25 }
 0xb50   : > { %4090 = vmatpush3.bf16.msra.mxu1 %v4089_v24 }
 0xb51   : > { %2872 = vperm.xlu1 %4318, %v2830_v15   ;;  %v3005_v15 = vld [vmem:[#allocation32 + $0x68] sm:$0xff]  ;;  %4091 = vmatprep.subr.bf16.mxu1 %v6343_v25 }
 0xb52   : > { %4066 = vmatpush3.bf16.msra.mxu0 %v4065_v62 }
 0xb53   : > { %4067 = vmatprep.subr.bf16.mxu0 %v6343_v25 }
 0xb55   : > { %2877 = vperm.xlu1 %4318, %v2831_v53   ;;  %v4068_v53 = vpack.c.bf16 %v3021_v42, %v3020_v22 }
 0xb57   : > { %4069 = vmatpush3.bf16.msra.mxu0 %v4068_v53 }
 0xb58   : > { %4070 = vmatprep.subr.bf16.mxu0 %v6343_v25 }
 0xb59   : > { %2887 = vperm.xlu1 %4318, %v2833_v61   ;;  %v4092_v61 = vpack.c.bf16 %v3005_v15, %v3004_v33 }
 0xb5b   : > { %4093 = vmatpush3.bf16.msra.mxu1 %v4092_v61 }
 0xb5c   : > { %4094 = vmatprep.subr.bf16.mxu1 %v6343_v25 }
 0xb5d   : > { %2892 = vperm.xlu1 %4318, %v2834_v16   ;;  %v3023_v16 = vld [vmem:[#allocation32 + $0xf8] sm:$0xff] }
 0xb61   : > { %2897 = vperm.xlu1 %4318, %v2835_v52   ;;  %v3006_v52 = vld [vmem:[#allocation32 + $0x70] sm:$0xff] }
 0xb65   : > { %2902 = vperm.xlu1 %4318, %v2836_v17   ;;  %v4071_v17 = vpack.c.bf16 %v3023_v16, %v3022_v21 }
 0xb67   : > { %4072 = vmatpush3.bf16.msra.mxu0 %v4071_v17 }
 0xb69   : > { %2907 = vperm.xlu1 %4318, %v2837_v0   ;;  %v4095_v0 = vpack.c.bf16 %v3007_v56, %v3006_v52 }
 0xb6a   : > { %3860 = vmatmul.mubr.f32.vlgmr.msra.gmra.mrb[6].mxu0 %v4372_v35 }
 0xb6b   : > { %4096 = vmatpush3.bf16.msra.mxu1 %v4095_v0 }
 0xb6d   : > { %2912 = vperm.xlu1 %4318, %v2838_v29  }
 0xbb8   : > { %v2843_v14 = vpop.permute.xlu1 %2842  ;;  %v2883_v11 = vpop.permute.xlu0 %2882 }
 0xbb9   : > { %v2920_v46 = vmul.f32 %v4374_v36, %v2843_v14 }
 0xbbc   : > { %v2848_v38 = vpop.permute.xlu1 %2847  ;;  %v2918_v15 = vpop.permute.xlu0 %2917 }
 0xbbd   : > { %v2921_v25 = vmul.f32 %v4373_v47, %v2848_v38  ;;  %v2935_v17 = vmul.f32 %v2918_v15, %v5940_v23 }
 0xbbf   : > { %v2936_v30 = vadd.f32 %v2921_v25, %v2920_v46 }
 0xbc0   : > { %v2853_v13 = vpop.permute.xlu1 %2852 }
 0xbc1   : > { %v2922_v8 = vmul.f32 %v2853_v13, %v5900_v4 }
 0xbc4   : > { %v2858_v20 = vpop.permute.xlu1 %2857 }
 0xbc5   : > { %v2923_v44 = vmul.f32 %v2858_v20, %v5902_v9  ;;  %v2928_v9 = vmul.f32 %v2883_v11, %v5938_v63 }
 0xbc7   : > { %v2943_v1 = vadd.f32 %v2923_v44, %v2922_v8 }
 0xbc8   : > { %v2863_v34 = vpop.permute.xlu1 %2862 }
 0xbc9   : > { %v2924_v3 = vmul.f32 %v2863_v34, %v5922_v45  ;;  %v2944_v40 = vrot.slane %v2943_v1, 4 }
 0xbcb   : > { %v2945_v7 = vadd.f32 %v2944_v40, %v2943_v1 }
 0xbcc   : > { %v2868_v29 = vpop.permute.xlu1 %2867 }
 0xbcd   : > { %v2925_v58 = vmul.f32 %v2868_v29, %v5925_v18  ;;  %v2946_v24 = vrot.slane %v2945_v7, 2 }
 0xbcf   : > { %v2950_v18 = vadd.f32 %v2925_v58, %v2924_v3  ;;  %v2947_v16 = vadd.f32 %v2946_v24, %v2945_v7  ;;  %v3492_v7 = vld [vmem:[#allocation33] ss:$0 sm:$0xff] }
 0xbd0   : > { %v2873_v43 = vpop.permute.xlu1 %2872 }
 0xbd1   : > { %v2926_v41 = vmul.f32 %v2873_v43, %v5948_v28  ;;  %v2951_v4 = vrot.slane %v2950_v18, 4  ;;  %v2948_v29 = vrot.slane %v2947_v16, 1 }
 0xbd3   : > { %v2952_v28 = vadd.f32 %v2951_v4, %v2950_v18  ;;  %v2949_v25 = vadd.f32 %v2948_v29, %v2947_v16 }
 0xbd4   : > { %v2878_v49 = vpop.permute.xlu1 %2877 }
 0xbd5   : > { %v2927_v2 = vmul.f32 %v2878_v49, %v5957_v59  ;;  %v2937_v59 = vrot.slane %v2936_v30, 4  ;;  %v2953_v42 = vrot.slane %v2952_v28, 2 }
 0xbd7   : > { %v2957_v32 = vadd.f32 %v2927_v2, %v2926_v41  ;;  %v2938_v63 = vadd.f32 %v2937_v59, %v2936_v30  ;;  %v2954_v0 = vadd.f32 %v2953_v42, %v2952_v28 }
 0xbd8   : > { %v2888_v6 = vpop.permute.xlu1 %2887 }
 0xbd9   : > { %v2929_v27 = vmul.f32 %v2888_v6, %v5907_v12  ;;  %v2958_v60 = vrot.slane %v2957_v32, 4  ;;  %v2939_v53 = vrot.slane %v2938_v63, 2  ;;  %v2955_v44 = vrot.slane %v2954_v0, 1 }
 0xbdb   : > { %v2964_v19 = vadd.f32 %v2929_v27, %v2928_v9  ;;  %v2959_v37 = vadd.f32 %v2958_v60, %v2957_v32  ;;  %v2940_v14 = vadd.f32 %v2939_v53, %v2938_v63  ;;  %v2956_v3 = vadd.f32 %v2955_v44, %v2954_v0 }
 0xbdc   : > { %v2893_v5 = vpop.permute.xlu1 %2892 }
 0xbdd   : > { %v2930_v45 = vmul.f32 %v2893_v5, %v5942_v50  ;;  %v2965_v10 = vrot.slane %v2964_v19, 4  ;;  %v2960_v61 = vrot.slane %v2959_v37, 2 }
 0xbdf   : > { %v2966_v62 = vadd.f32 %v2965_v10, %v2964_v19  ;;  %v2961_v38 = vadd.f32 %v2960_v61, %v2959_v37 }
 0xbe0   : > { %v2898_v51 = vpop.permute.xlu1 %2897 }
 0xbe1   : > { %v2931_v12 = vmul.f32 %v2898_v51, %v5920_v39  ;;  %v2967_v21 = vrot.slane %v2966_v62, 2  ;;  %v2962_v58 = vrot.slane %v2961_v38, 1 }
 0xbe3   : > { %v2971_v48 = vadd.f32 %v2931_v12, %v2930_v45  ;;  %v2968_v34 = vadd.f32 %v2967_v21, %v2966_v62  ;;  %v2963_v36 = vadd.f32 %v2962_v58, %v2961_v38 }
 0xbe4   : > { %v2903_v54 = vpop.permute.xlu1 %2902 }
 0xbe5   : > { %v2972_v57 = vrot.slane %v2971_v48, 4  ;;  %v2932_v50 = vmul.f32 %v2903_v54, %v5954_v31  ;;  %v2969_v47 = vrot.slane %v2968_v34, 1 }
 0xbe7   : > { %v2973_v22 = vadd.f32 %v2972_v57, %v2971_v48  ;;  %v2970_v1 = vadd.f32 %v2969_v47, %v2968_v34 }
 0xbe8   : > { %v2908_v33 = vpop.permute.xlu1 %2907 }
 0xbe9   : > { %v2933_v39 = vmul.f32 %v2908_v33, %v5933_v26  ;;  %v2974_v52 = vrot.slane %v2973_v22, 2  ;;  %v2941_v26 = vrot.slane %v2940_v14, 1 }
 0xbeb   : > { %v2978_v56 = vadd.f32 %v2933_v39, %v2932_v50  ;;  %v2975_v43 = vadd.f32 %v2974_v52, %v2973_v22  ;;  %v2942_v27 = vadd.f32 %v2941_v26, %v2940_v14 }
 0xbec   : > { %v2913_v35 = vpop.permute.xlu1 %2912 }
 0xbed   : > { %v2979_v13 = vrot.slane %v2978_v56, 4  ;;  %v2934_v20 = vmul.f32 %v2913_v35, %v5962_v55  ;;  %v2976_v23 = vrot.slane %v2975_v43, 1  ;;  %v3102_v41 = vsel %vm1426_vm1, %v2949_v25, %v2942_v27 }
 0xbee   : > { %v3103_v5 = vsel %vm1428_vm2, %v2956_v3, %v3102_v41 }
 0xbef   : > { %v2980_v49 = vadd.f32 %v2979_v13, %v2978_v56  ;;  %v2985_v31 = vadd.f32 %v2935_v17, %v2934_v20  ;;  %v2977_v9 = vadd.f32 %v2976_v23, %v2975_v43  ;;  %v3104_v19 = vsel %vm1430_vm3, %v2963_v36, %v3103_v5 }
 0xbf0   : > { %v3105_v40 = vsel %vm1432_vm4, %v2970_v1, %v3104_v19 }
 0xbf1   : > { %v2981_v6 = vrot.slane %v2980_v49, 2  ;;  %v2986_v11 = vrot.slane %v2985_v31, 4  ;;  %v3106_v51 = vsel %vm1434_vm5, %v2977_v9, %v3105_v40 }
 0xbf3   : > { %v2982_v8 = vadd.f32 %v2981_v6, %v2980_v49  ;;  %v2987_v2 = vadd.f32 %v2986_v11, %v2985_v31 }
 0xbf5   : > { %v2983_v46 = vrot.slane %v2982_v8, 1  ;;  %v2988_v55 = vrot.slane %v2987_v2, 2 }
 0xbf7   : > { %v2989_v18 = vadd.f32 %v2988_v55, %v2987_v2  ;;  %v2984_v30 = vadd.f32 %v2983_v46, %v2982_v8 }
 0xbf9   : > { %v2990_v32 = vrot.slane %v2989_v18, 1  ;;  %v3107_v59 = vsel %vm1436_vm6, %v2984_v30, %v3106_v51 }
 0xbfb   : > { %v2991_v4 = vadd.f32 %v2990_v32, %v2989_v18 }
 0xbfd   : > { %v3108_v60 = vsel %vm1438_vm7, %v2991_v4, %v3107_v59 }
 0xbfe   : > { %3895 = vmatmul.mubr.f32.vlgmr.msra.gmra.mrb[6].mxu1 %v3108_v60 }
 0xc3d   : > { %v3090_v45 = vpop.f32.mrb[6].mxu0 }
 0xc3e   : > { %v3861_v12 = vpop.f32.mrb[7].mxu0 }
 0xcd0   : > { %3209 = sbr.rel (%p3493_p7) target bundleno = 3287 (0xcd7), region = 180 }
 0xcd1   : > { %v3176_v10 = vpop.f32.mrb[6].mxu1 }
 0xcd2   : > { %v3177_v48 = vadd.f32 %v3176_v10, %v3090_v45  ;;  %v3896_v28 = vpop.f32.mrb[7].mxu1 }
 0xcd4   : > { %v3187_v54 = vadd.f32 %v3492_v7, %v3177_v48 }
 0xcd6   : > { %3205 = vst [vmem:[#allocation3] sm:$0xff] %v3187_v54  ;;  %3210 = vst [vmem:[#allocation35] sm:$0xff] (!%p3493_p7), %v3187_v54 }
 0xcd7 PF: > { %s6344_s23 = sld [smem:[#allocation48_spill]]  ;;  %s5000_s1 = smov [#allocation35]  }
 0xcd8   : > { %s3220_s4 = sshll.u32 %s5000_s1, 4  ;;  %s3221_s4 = int_to_ptr.vmem [resolvable:$true] %s3220_s4 }
 0xcd9   : > { %s4879_s29 = scalar_lea.vmem %s3221_s4, 128  ;;  %p4886_p8 = scmp.lt.s32.totalorder %s3221_s4, %s3221_s4 }
 0xcda   : > { %p4880_p1 = scmp.ne.s32.totalorder %s3221_s4, %s4879_s29  ;;  %p4887_p9 = scmp.lt.s32.totalorder %s4879_s29, %s4879_s29 }
 0xcdc   : > { %p4888_p10 = por %p4887_p9, %p4886_p8 }
 0xcdd   : > { %s6345_s7 = sadd.s32 4294967295, %s6344_s23  }
 0xcde   : > { %p6226_p0 = scmp.eq.s32.totalorder %s6345_s7, 3 }
 0xce0   : > { %p4881_p4 = pnand %p4880_p1, %p6226_p0 }
 0xce2   : > { %p4882_p6 = pneg %p4881_p4 }
 0xce4   : > { %p4889_p11 = pnand %p4888_p10, %p4882_p6 }
 0xce6   : > { %4892 = shalt.err (!%p4889_p11)
}
 0xce7   : > { %s6347_s20 = sld [smem:[#allocation60_spill]] }
 0xced   : > { %s4893_s9 = scalar_lea.hbm %s6347_s20, 128 }
 0xcee   : > { %p4894_p12 = scmp.ne.s32.totalorder %s6347_s20, %s4893_s9  ;;  %p4899_p13 = scmp.lt.u32.totalorder %s4893_s9, %s6347_s20 }
 0xcf0   : > { %p4895_p3 = pnand %p4894_p12, %p6226_p0 }
 0xcf2   : > { %p4896_p2 = pneg %p4895_p3 }
 0xcf4   : > { %p4901_p5 = pnand %p4899_p13, %p4896_p2 }
 0xcf6   : > { %4904 = shalt.err (!%p4901_p5)
}
 0xcf7   : > { %4170 = dma.vmem_to_hbm [thread:$0]  (%p6226_p0), %s3221_s4, 128, %s6347_s20, [#allocation8]  }
 0xcf8   : > { %4958 = dma.done.wait (%p6226_p0), [#allocation8], 128  }
 0xcf9   : > { %4960 = vsyncadd (%p6226_p0), [#allocation8], 4294967168 }
 0xcfa PF: > { %s6348_s12 = sld [smem:[#allocation48_spill]]  ;;  %s6349_s2 = smov %s4967_s25 }
 0xcfb   : > { %s6350_s25 = smov %s6352_s28 }
 0xd00   : > { %s43_s11 = sadd.s32 1, %s6348_s12  }
 0xd01   : > { %p40_p7 = scmp.ge.s32.totalorder %s43_s11, 6  }
 0xd03   :  { %42 = sbr.rel (!%p40_p7) target bundleno = 25 (0x19), region = 213 }
 0xd0a   :  { %3233 = vsyncpa [#allocation7], 1 }
 0xd0b   :  { %3235 = vsyncpa [#allocation7 + $0x1], 1 }
 0xd0c   :  { %3236 = vsyncpa [#allocation10], 1 }
 0xd0d   :  { %3237 = vsyncpa [#allocation13], 1 }
 0xd0e   :  { %3238 = vsyncpa [#allocation16], 1 }
 0xd0f   :  { %3239 = vsyncpa [#allocation19], 1 }
 0xd10   :  { %3240 = vsyncpa [#allocation22], 1 }
 0xd11   :  { %3241 = vsyncpa [#allocation25], 1 }
 0xd12   :  { %3242 = vsyncpa [#allocation28], 1 }
 0xd13   :  { %3243 = vsyncpa [#allocation31], 1 }
 0xd14   :  { %3244 = vsyncpa [#allocation34], 1 }
 0xd15   :  { %3245 = vsyncpa [#allocation8], 1 }
 0xd16   :  { %3247 = vsyncpa [#allocation8 + $0x1], 1 }

</bundles_post_ra>
